<compile_context>
chip_gen: v5e
topology: v5e:2x2
jax: 0.10.0
libtpu: 0.0.40
codegen_flags: <defaults>
</compile_context>

<pallas_src>
import functools

import jax
import jax.numpy as jnp
from jax import lax
from jax.experimental import pallas as pl
from jax.experimental.pallas import tpu as pltpu

N_HEADS = 4
N_BLOCKS = 2
LN_EPS = 1e-5
LANE = 128


# --------------------------------------------------------------------------
# helpers
# --------------------------------------------------------------------------
def _round_up(n, m):
    return ((n + m - 1) // m) * m


def _pad_to(a, axis, target):
    cur = a.shape[axis]
    if cur == target:
        return a
    pads = [(0, 0)] * a.ndim
    pads[axis] = (0, target - cur)
    return jnp.pad(a, pads)


def _pick_b_blk(B, T, row_target=1024):
    """Sequences folded per grid step.

    Target ~1024 residual rows per step (v5e/v6e have 128 MiB VMEM and a
    single TensorCore, so fewer/serial bigger steps win), but keep >=2 equal
    'parallel' steps when each step still holds >=256 rows so both v7x
    TensorCores get work."""
    b_blk = max(1, min(B, max(1, row_target // max(T, 1))))
    while B % b_blk:
        b_blk -= 1
    if B // b_blk < 2 and B > 1 and B % 2 == 0 and (B // 2) * T >= 256:
        b_blk = B // 2
    if (b_blk * T) % 8 and b_blk != B:
        b_blk = B  # keep the row block sublane-aligned (or make it the full array)
    return b_blk


# --------------------------------------------------------------------------
# kernel
# --------------------------------------------------------------------------
def transformer_kernel(
    x_ref,                                 # (M, Cp)   M = b_blk*T residual rows
    mask_ref,                              # (T, T)    additive causal bias (0 / -1e30)
    ln1_g_ref, ln1_b_ref,                  # (NB, 1, Cp)
    wqkv_ref,                              # (NB, Cp, 3*Cp)  fused Q|K|V, lane-aligned segments
    wproj_ref, bproj_ref,                  # (NB, C, Cp), (NB, 1, Cp)
    ln2_g_ref, ln2_b_ref,                  # (NB, 1, Cp)
    w1_ref, b1_ref,                        # (NB, Cp, Hp), (NB, 1, Hp)
    w2_ref, b2_ref,                        # (NB, Hp, Cp), (NB, 1, Cp)
    lnf_g_ref, lnf_b_ref,                  # (1, Cp)
    wlm_ref, blm_ref,                      # (Cp, Vp), (1, Vp)
    out_ref,                               # (M, Vp)   lane-dense logits block
    *, b_blk, seq_len, n_embd, n_heads, mm_dtype,
):
    T, C = seq_len, n_embd
    hs = C // n_heads
    M, Cp = x_ref.shape
    inv_c = 1.0 / float(C)
    scale = float(hs) ** -0.5

    # Lanes >= C of the residual stream are exactly 0 (all padded weight
    # rows/cols and biases are zero), so LN statistics over the real C
    # channels just need a lane mask on the centered values.
    lane_mask = (lax.broadcasted_iota(jnp.int32, (1, Cp), 1) < C).astype(jnp.float32)

    def layer_norm(h, g, b):
        # Two-pass mean/variance (matches the reference formulation exactly).
        mu = jnp.sum(h, axis=-1, keepdims=True) * inv_c
        d = (h - mu) * lane_mask
        var = jnp.sum(d * d, axis=-1, keepdims=True) * inv_c
        return d * lax.rsqrt(var + LN_EPS) * g + b

    def split_heads(a):                    # (M, Cp) -> (b_blk*n_heads, T, hs)
        a = a[:, :C].reshape(b_blk, T, n_heads, hs)
        return jnp.transpose(a, (0, 2, 1, 3)).reshape(b_blk * n_heads, T, hs)

    x = x_ref[...].astype(jnp.float32)                           # (M, Cp)
    mask_bias = mask_ref[...][None, :, :]                        # (1, T, T), f32

    for blk in range(N_BLOCKS):
        # ---- multi-head causal self-attention (pre-LN) + residual ----
        h = layer_norm(x, ln1_g_ref[blk], ln1_b_ref[blk])
        qkv = jnp.dot(h.astype(mm_dtype), wqkv_ref[blk],
                      preferred_element_type=jnp.float32)        # (M, 3*Cp)
        # 128-lane-aligned views of the fused output, then head-batched attention.
        qh = split_heads(qkv[:, 0 * Cp:1 * Cp])
        kh = split_heads(qkv[:, 1 * Cp:2 * Cp])
        vh = split_heads(qkv[:, 2 * Cp:3 * Cp])

        sc = jnp.einsum("bqd,bkd->bqk", qh.astype(mm_dtype), kh.astype(mm_dtype),
                        preferred_element_type=jnp.float32) * scale
        sc = sc + mask_bias
        sc = sc - jnp.max(sc, axis=-1, keepdims=True)
        p = jnp.exp(sc)
        p = p / jnp.sum(p, axis=-1, keepdims=True)               # exact softmax (no approx rcp)
        oh = jnp.einsum("bqk,bkd->bqd", p.astype(mm_dtype), vh.astype(mm_dtype),
                        preferred_element_type=jnp.float32)      # (b_blk*H, T, hs)

        # Reassemble the head-concatenated layout and do ONE K=C projection.
        att_in = jnp.transpose(oh.reshape(b_blk, n_heads, T, hs),
                               (0, 2, 1, 3)).reshape(M, C)
        att = jnp.dot(att_in.astype(mm_dtype), wproj_ref[blk],
                      preferred_element_type=jnp.float32) + bproj_ref[blk]
        x = x + att

        # ---- feed-forward (pre-LN) + residual ----
        h2 = layer_norm(x, ln2_g_ref[blk], ln2_b_ref[blk])
        ff = jnp.dot(h2.astype(mm_dtype), w1_ref[blk],
                     preferred_element_type=jnp.float32) + b1_ref[blk]
        ff = jnp.maximum(ff, 0.0)
        ff = jnp.dot(ff.astype(mm_dtype), w2_ref[blk],
                     preferred_element_type=jnp.float32) + b2_ref[blk]
        x = x + ff

    # ---- final layer norm + lm head (lane-dense Vp-wide store) ----
    xf = layer_norm(x, lnf_g_ref[...], lnf_b_ref[...])
    logits = jnp.dot(xf.astype(mm_dtype), wlm_ref[...],
                     preferred_element_type=jnp.float32) + blm_ref[...]
    out_ref[...] = logits.astype(out_ref.dtype)


# --------------------------------------------------------------------------
# parameter packing
# --------------------------------------------------------------------------
def pack_params(params, *, n_embd, vocab_size, mm_dtype):
    """Pad channel/hidden/vocab dims to 128-lane tiles, fuse QKV so each of
    Q/K/V starts on a 128-lane boundary, and cast matmul weights to mm_dtype.
    All padded rows/cols are zero so padded lanes stay exactly 0 everywhere."""
    C, V = n_embd, vocab_size
    Cp = _round_up(C, LANE)
    Vp = _round_up(V, LANE)
    Hp = _round_up(4 * C, LANE)

    def pad_out(w):                        # (NB, C, C) -> (NB, C, Cp) zero cols
        return _pad_to(w, -1, Cp)

    wqkv = jnp.concatenate([pad_out(params["wq"]), pad_out(params["wk"]),
                            pad_out(params["wv"])], axis=-1)      # (NB, C, 3*Cp)
    wqkv = _pad_to(wqkv, 1, Cp)                                   # zero input rows

    packed = {
        "ln1_g": _pad_to(params["ln1_g"], -1, Cp),
        "ln1_b": _pad_to(params["ln1_b"], -1, Cp),
        "wqkv": wqkv.astype(mm_dtype),
        "wproj": _pad_to(params["wproj"], -1, Cp).astype(mm_dtype),   # (NB, C, Cp)
        "bproj": _pad_to(params["bproj"], -1, Cp),
        "ln2_g": _pad_to(params["ln2_g"], -1, Cp),
        "ln2_b": _pad_to(params["ln2_b"], -1, Cp),
        "w1": _pad_to(_pad_to(params["w1"], 1, Cp), -1, Hp).astype(mm_dtype),
        "b1": _pad_to(params["b1"], -1, Hp),
        "w2": _pad_to(_pad_to(params["w2"], 1, Hp), -1, Cp).astype(mm_dtype),
        "b2": _pad_to(params["b2"], -1, Cp),
        "lnf_g": _pad_to(params["lnf_g"], -1, Cp),
        "lnf_b": _pad_to(params["lnf_b"], -1, Cp),
        "wlm": _pad_to(_pad_to(params["wlm"], 0, Cp), -1, Vp).astype(mm_dtype),
        "blm": _pad_to(params["blm"], -1, Vp),
    }
    return packed, Cp, Vp


# --------------------------------------------------------------------------
# wrapper
# --------------------------------------------------------------------------
def mini_transformer_forward(idx, params, *, n_embd, vocab_size, block_size,
                             mm_dtype=jnp.bfloat16, b_blk=None):
    """idx: (B, T) int32 token ids. Returns logits (B, T, vocab_size) f32.

    mm_dtype is the MXU-feed dtype (accumulation is always f32, and softmax /
    LayerNorm / residuals stay f32). bfloat16 is the native feed on v6e/v7x;
    pass jnp.float32 for exact f32 semantics matching the PyTorch module."""
    B, T = idx.shape
    C, V = n_embd, vocab_size
    hs = C // N_HEADS

    packed, Cp, Vp = pack_params(params, n_embd=C, vocab_size=V, mm_dtype=mm_dtype)

    # --- plain-JAX glue: embedding lookups, channel padding, row flatten ---
    x = (jnp.take(params["tok_table"], idx, axis=0)
         + params["pos_table"][:T][None, :, :]).astype(jnp.float32)     # (B, T, C)
    x = _pad_to(x, -1, Cp).reshape(B * T, Cp)                           # (B*T, Cp)

    # additive causal bias, built once and shared by every block/head/step
    tri = jnp.arange(T)
    mask_bias = jnp.where(tri[:, None] >= tri[None, :], 0.0, -1e30).astype(jnp.float32)

    if b_blk is None:
        b_blk = _pick_b_blk(B, T)
    M = b_blk * T
    grid = (B // b_blk,)

    param_order = [
        "ln1_g", "ln1_b", "wqkv", "wproj", "bproj",
        "ln2_g", "ln2_b", "w1", "b1", "w2", "b2",
        "lnf_g", "lnf_b", "wlm", "blm",
    ]
    param_arrays = [packed[name] for name in param_order]

    def full(arr):
        # Replicated weight: constant index_map across the grid, and a single
        # VMEM buffer (no double-buffer needed when the block never changes).
        nd = arr.ndim
        return pl.BlockSpec(arr.shape, lambda g, _nd=nd: (0,) * _nd,
                            pipeline_mode=pl.Buffered(1))

    grid_spec = pltpu.PrefetchScalarGridSpec(
        num_scalar_prefetch=0,
        grid=grid,
        in_specs=[pl.BlockSpec((M, Cp), lambda g: (g, 0)), full(mask_bias)]
                 + [full(a) for a in param_arrays],
        out_specs=pl.BlockSpec((M, Vp), lambda g: (g, 0)),
    )

    # advisory cost estimate so XLA doesn't treat the call as zero-cost
    dense_flops = N_BLOCKS * (2 * C * 3 * C + 2 * C * C + 2 * C * 4 * C
                              + 2 * 4 * C * C) + 2 * C * V
    attn_flops = N_BLOCKS * N_HEADS * (2 * T * hs + 2 * T * hs)
    cost = pl.CostEstimate(
        flops=int(B * T * (dense_flops + attn_flops)),
        transcendentals=int(B * T * (N_BLOCKS * N_HEADS * T + 2 * N_BLOCKS + 1)),
        bytes_accessed=int(x.size * x.dtype.itemsize + B * T * Vp * 4
                           + sum(int(a.size) * a.dtype.itemsize
                                 for a in param_arrays)),
    )

    kernel = functools.partial(
        transformer_kernel, b_blk=b_blk, seq_len=T, n_embd=C,
        n_heads=N_HEADS, mm_dtype=mm_dtype)

    # TODO(synk): for a realistic vocab (>=32k) the LM head should be tiled
    # over Vp (second grid axis or a separate pallas_call) so the (M, Vp)
    # output block + wlm fit v7x's 64 MiB VMEM; Vp=128 here makes it moot.
    logits_flat = pl.pallas_call(
        kernel,
        out_shape=jax.ShapeDtypeStruct((B * T, Vp), jnp.float32),
        grid_spec=grid_spec,
        compiler_params=pltpu.CompilerParams(
            dimension_semantics=("parallel",),
            # 48 MiB: inside v7x's 64 MiB physical VMEM, generous headroom on
            # v5e/v6e (128 MiB) for the ~1024-row activation blocks.
            vmem_limit_bytes=48 * 1024 * 1024),
        cost_estimate=cost,
    )(x, mask_bias, *param_arrays)

    # drop padded vocab columns (they are exactly 0) and restore (B, T, V)
    return logits_flat[:, :V].reshape(B, T, V)


# --------------------------------------------------------------------------
# parameters / reference
# --------------------------------------------------------------------------
def init_params(key, *, vocab_size, n_embd, block_size):
    """Deterministic synthetic parameters (Linear weights stored (in, out))."""
    C, V, T = n_embd, vocab_size, block_size
    H = 4 * C
    keys = iter(jax.random.split(key, 32))

    def dense(k, fan_in, fan_out):
        return (jax.random.normal(k, (fan_in, fan_out), jnp.float32)
                / jnp.sqrt(jnp.float32(fan_in)))

    def stack(fn):
        return jnp.stack([fn(next(keys)) for _ in range(N_BLOCKS)], axis=0)

    return {
        "tok_table": jax.random.normal(next(keys), (V, C), jnp.float32) * 0.02,
        "pos_table": jax.random.normal(next(keys), (T, C), jnp.float32) * 0.02,
        "ln1_g": jnp.ones((N_BLOCKS, 1, C), jnp.float32),
        "ln1_b": jnp.zeros((N_BLOCKS, 1, C), jnp.float32),
        "wq": stack(lambda k: dense(k, C, C)),
        "wk": stack(lambda k: dense(k, C, C)),
        "wv": stack(lambda k: dense(k, C, C)),
        "wproj": stack(lambda k: dense(k, C, C)),
        "bproj": jnp.zeros((N_BLOCKS, 1, C), jnp.float32),
        "ln2_g": jnp.ones((N_BLOCKS, 1, C), jnp.float32),
        "ln2_b": jnp.zeros((N_BLOCKS, 1, C), jnp.float32),
        "w1": stack(lambda k: dense(k, C, H)),
        "b1": jnp.zeros((N_BLOCKS, 1, H), jnp.float32),
        "w2": stack(lambda k: dense(k, H, C)),
        "b2": jnp.zeros((N_BLOCKS, 1, C), jnp.float32),
        "lnf_g": jnp.ones((1, C), jnp.float32),
        "lnf_b": jnp.zeros((1, C), jnp.float32),
        "wlm": dense(next(keys), C, V),
        "blm": jnp.zeros((1, V), jnp.float32),
    }


def _layer_norm_ref(h, g, b):
    mu = jnp.mean(h, axis=-1, keepdims=True)
    var = jnp.mean((h - mu) ** 2, axis=-1, keepdims=True)
    return (h - mu) * lax.rsqrt(var + LN_EPS) * g + b


def reference_forward(idx, params, *, n_embd, vocab_size, block_size):
    """Pure-JAX f32 reference mirroring the PyTorch module semantics."""
    B, T = idx.shape
    C = n_embd
    hs = C // N_HEADS
    x = (jnp.take(params["tok_table"], idx, axis=0)
         + params["pos_table"][:T][None]).astype(jnp.float32)
    causal = jnp.tril(jnp.ones((T, T), bool))
    for blk in range(N_BLOCKS):
        h = _layer_norm_ref(x, params["ln1_g"][blk], params["ln1_b"][blk])
        q = h @ params["wq"][blk]
        k = h @ params["wk"][blk]
        v = h @ params["wv"][blk]
        outs = []
        for hd in range(N_HEADS):
            sl = slice(hd * hs, (hd + 1) * hs)
            wei = (q[..., sl] @ jnp.swapaxes(k[..., sl], -1, -2)) * hs ** -0.5
            wei = jnp.where(causal, wei, -1e30)
            wei = jax.nn.softmax(wei, axis=-1)
            outs.append(wei @ v[..., sl])
        att = (jnp.concatenate(outs, axis=-1) @ params["wproj"][blk]
               + params["bproj"][blk])
        x = x + att
        h2 = _layer_norm_ref(x, params["ln2_g"][blk], params["ln2_b"][blk])
        ff = jnp.maximum(h2 @ params["w1"][blk] + params["b1"][blk], 0.0)
        x = x + ff @ params["w2"][blk] + params["b2"][blk]
    xf = _layer_norm_ref(x, params["lnf_g"], params["lnf_b"])
    return xf @ params["wlm"] + params["blm"]


# --------------------------------------------------------------------------
if __name__ == "__main__":
    vocab_size = 64
    n_embd = 32
    block_size = 8
    B, T = 2, block_size

    key = jax.random.PRNGKey(0)
    k_idx, k_params = jax.random.split(key)
    idx = jax.random.randint(k_idx, (B, T), 0, vocab_size, dtype=jnp.int32)
    params = init_params(k_params, vocab_size=vocab_size, n_embd=n_embd,
                         block_size=block_size)

    fwd = functools.partial(mini_transformer_forward, n_embd=n_embd,
                            vocab_size=vocab_size, block_size=block_size)

    # exact-semantics path (f32 matmuls, exact softmax/LN)
    logits = jax.block_until_ready(fwd(idx, params, mm_dtype=jnp.float32))
    ref = reference_forward(idx, params, n_embd=n_embd,
                            vocab_size=vocab_size, block_size=block_size)
    assert logits.shape == (B, T, vocab_size)
    assert jnp.allclose(logits, ref, rtol=2e-3, atol=2e-3), \
        float(jnp.max(jnp.abs(logits - ref)))

    # default bf16 MXU-feed path (native on v6e/v7x): f32 accumulation, loose check
    logits_bf16 = jax.block_until_ready(fwd(idx, params))
    assert jnp.allclose(logits_bf16, ref, rtol=2e-1, atol=2e-1), \
        float(jnp.max(jnp.abs(logits_bf16 - ref)))

    # TODO(synk): cross-entropy loss (targets branch) and the generate()
    # sampling loop are host-level control flow, left outside the kernel.
    print("KERNEL_OK")
</pallas_src>

<mosaic_0001>
module attributes {stable_mosaic.version = 11 : i64} {
  func.func @transformer_kernel(%arg0: i32, %arg1: memref<16x128xf32, #tpu.memory_space<vmem>>, %arg2: memref<8x8xf32, #tpu.memory_space<vmem>>, %arg3: memref<2x1x128xf32, #tpu.memory_space<vmem>>, %arg4: memref<2x1x128xf32, #tpu.memory_space<vmem>>, %arg5: memref<2x128x384xf32, #tpu.memory_space<vmem>>, %arg6: memref<2x32x128xf32, #tpu.memory_space<vmem>>, %arg7: memref<2x1x128xf32, #tpu.memory_space<vmem>>, %arg8: memref<2x1x128xf32, #tpu.memory_space<vmem>>, %arg9: memref<2x1x128xf32, #tpu.memory_space<vmem>>, %arg10: memref<2x128x128xf32, #tpu.memory_space<vmem>>, %arg11: memref<2x1x128xf32, #tpu.memory_space<vmem>>, %arg12: memref<2x128x128xf32, #tpu.memory_space<vmem>>, %arg13: memref<2x1x128xf32, #tpu.memory_space<vmem>>, %arg14: memref<1x128xf32, #tpu.memory_space<vmem>>, %arg15: memref<1x128xf32, #tpu.memory_space<vmem>>, %arg16: memref<128x128xf32, #tpu.memory_space<vmem>>, %arg17: memref<1x128xf32, #tpu.memory_space<vmem>>, %arg18: memref<16x128xf32, #tpu.memory_space<vmem>>) attributes {dimension_semantics = [#tpu.dimension_semantics<parallel>], iteration_bounds = array<i64: 1>, scalar_prefetch = 0 : i64, scratch_operands = 0 : i64, tpu.core_type = #tpu.core_type<tc>, window_params = [{transform_indices = @transform_0, window_bounds = array<i64: 16, 128>}, {pipeline_mode = #tpu.pipeline_mode<synchronous>, transform_indices = @transform_1, window_bounds = array<i64: 8, 8>}, {pipeline_mode = #tpu.pipeline_mode<synchronous>, transform_indices = @transform_2, window_bounds = array<i64: 2, 1, 128>}, {pipeline_mode = #tpu.pipeline_mode<synchronous>, transform_indices = @transform_3, window_bounds = array<i64: 2, 1, 128>}, {pipeline_mode = #tpu.pipeline_mode<synchronous>, transform_indices = @transform_4, window_bounds = array<i64: 2, 128, 384>}, {pipeline_mode = #tpu.pipeline_mode<synchronous>, transform_indices = @transform_5, window_bounds = array<i64: 2, 32, 128>}, {pipeline_mode = #tpu.pipeline_mode<synchronous>, transform_indices = @transform_6, window_bounds = array<i64: 2, 1, 128>}, {pipeline_mode = #tpu.pipeline_mode<synchronous>, transform_indices = @transform_7, window_bounds = array<i64: 2, 1, 128>}, {pipeline_mode = #tpu.pipeline_mode<synchronous>, transform_indices = @transform_8, window_bounds = array<i64: 2, 1, 128>}, {pipeline_mode = #tpu.pipeline_mode<synchronous>, transform_indices = @transform_9, window_bounds = array<i64: 2, 128, 128>}, {pipeline_mode = #tpu.pipeline_mode<synchronous>, transform_indices = @transform_10, window_bounds = array<i64: 2, 1, 128>}, {pipeline_mode = #tpu.pipeline_mode<synchronous>, transform_indices = @transform_11, window_bounds = array<i64: 2, 128, 128>}, {pipeline_mode = #tpu.pipeline_mode<synchronous>, transform_indices = @transform_12, window_bounds = array<i64: 2, 1, 128>}, {pipeline_mode = #tpu.pipeline_mode<synchronous>, transform_indices = @transform_13, window_bounds = array<i64: 1, 128>}, {pipeline_mode = #tpu.pipeline_mode<synchronous>, transform_indices = @transform_14, window_bounds = array<i64: 1, 128>}, {pipeline_mode = #tpu.pipeline_mode<synchronous>, transform_indices = @transform_15, window_bounds = array<i64: 128, 128>}, {pipeline_mode = #tpu.pipeline_mode<synchronous>, transform_indices = @transform_16, window_bounds = array<i64: 1, 128>}, {transform_indices = @transform_17, window_bounds = array<i64: 16, 128>}]} {
    %0 = tpu.iota {dimensions = array<i32: 1>} : vector<1x128xi32>
    %c32_i32 = arith.constant 32 : i32
    %1 = vector.broadcast %c32_i32 : i32 to vector<1x128xi32>
    %2 = arith.cmpi slt, %0, %1 : vector<1x128xi32>
    %3 = arith.extui %2 : vector<1x128xi1> to vector<1x128xi32>
    %4 = arith.sitofp %3 : vector<1x128xi32> to vector<1x128xf32>
    %c0 = arith.constant 0 : index
    %c0_0 = arith.constant 0 : index
    %5 = vector.load %arg1[%c0, %c0_0] : memref<16x128xf32, #tpu.memory_space<vmem>>, vector<16x128xf32>
    %c0_1 = arith.constant 0 : index
    %c0_2 = arith.constant 0 : index
    %6 = vector.load %arg2[%c0_1, %c0_2] : memref<8x8xf32, #tpu.memory_space<vmem>>, vector<8x8xf32>
    %7 = vector.shape_cast %6 : vector<8x8xf32> to vector<1x8x8xf32>
    %c0_3 = arith.constant 0 : index
    %c0_4 = arith.constant 0 : index
    %c0_5 = arith.constant 0 : index
    %8 = vector.load %arg3[%c0_3, %c0_4, %c0_5] : memref<2x1x128xf32, #tpu.memory_space<vmem>>, vector<1x1x128xf32>
    %9 = vector.shape_cast %8 : vector<1x1x128xf32> to vector<1x128xf32>
    %c0_6 = arith.constant 0 : index
    %c0_7 = arith.constant 0 : index
    %c0_8 = arith.constant 0 : index
    %10 = vector.load %arg4[%c0_6, %c0_7, %c0_8] : memref<2x1x128xf32, #tpu.memory_space<vmem>>, vector<1x1x128xf32>
    %11 = vector.shape_cast %10 : vector<1x1x128xf32> to vector<1x128xf32>
    %cst = arith.constant dense<0.000000e+00> : vector<16xf32>
    %12 = vector.multi_reduction <add>, %5, %cst [1] : vector<16x128xf32> to vector<16xf32>
    %13 = vector.shape_cast %12 : vector<16xf32> to vector<16x1xf32>
    %cst_9 = arith.constant 3.125000e-02 : f32
    %14 = vector.broadcast %cst_9 : f32 to vector<16x1xf32>
    %15 = arith.mulf %13, %14 : vector<16x1xf32>
    %16 = vector.broadcast %15 : vector<16x1xf32> to vector<16x128xf32>
    %17 = arith.subf %5, %16 : vector<16x128xf32>
    %18 = vector.broadcast %4 : vector<1x128xf32> to vector<16x128xf32>
    %19 = arith.mulf %17, %18 : vector<16x128xf32>
    %20 = arith.mulf %19, %19 : vector<16x128xf32>
    %cst_10 = arith.constant dense<0.000000e+00> : vector<16xf32>
    %21 = vector.multi_reduction <add>, %20, %cst_10 [1] : vector<16x128xf32> to vector<16xf32>
    %22 = vector.shape_cast %21 : vector<16xf32> to vector<16x1xf32>
    %cst_11 = arith.constant 3.125000e-02 : f32
    %23 = vector.broadcast %cst_11 : f32 to vector<16x1xf32>
    %24 = arith.mulf %22, %23 : vector<16x1xf32>
    %cst_12 = arith.constant 9.99999974E-6 : f32
    %25 = vector.broadcast %cst_12 : f32 to vector<16x1xf32>
    %26 = arith.addf %24, %25 : vector<16x1xf32>
    %27 = math.rsqrt %26 : vector<16x1xf32>
    %28 = vector.broadcast %27 : vector<16x1xf32> to vector<16x128xf32>
    %29 = arith.mulf %19, %28 : vector<16x128xf32>
    %30 = vector.broadcast %9 : vector<1x128xf32> to vector<16x128xf32>
    %31 = arith.mulf %29, %30 : vector<16x128xf32>
    %32 = vector.broadcast %11 : vector<1x128xf32> to vector<16x128xf32>
    %33 = arith.addf %31, %32 : vector<16x128xf32>
    %c0_13 = arith.constant 0 : index
    %c0_14 = arith.constant 0 : index
    %c0_15 = arith.constant 0 : index
    %34 = vector.load %arg5[%c0_13, %c0_14, %c0_15] : memref<2x128x384xf32, #tpu.memory_space<vmem>>, vector<1x128x384xf32>
    %35 = vector.shape_cast %34 : vector<1x128x384xf32> to vector<128x384xf32>
    %cst_16 = arith.constant dense<0.000000e+00> : vector<16x384xf32>
    %36 = tpu.matmul %33, %35, %cst_16 {dimension_numbers = #tpu.dot_dimension_numbers<[1], [0], [0], [1], [0, 0, 1, 1], [], []>} : vector<16x128xf32>, vector<128x384xf32>, vector<16x384xf32> -> vector<16x384xf32>
    %37 = vector.extract_strided_slice %36 {offsets = [0, 0], sizes = [16, 128], strides = [1, 1]} : vector<16x384xf32> to vector<16x128xf32>
    %38 = vector.extract_strided_slice %37 {offsets = [0, 0], sizes = [16, 32], strides = [1, 1]} : vector<16x128xf32> to vector<16x32xf32>
    %39 = vector.shape_cast %38 : vector<16x32xf32> to vector<2x8x4x8xf32>
    %40 = tpu.transpose %39, [0, 2, 1, 3] : vector<2x8x4x8xf32> -> vector<2x4x8x8xf32>
    %41 = vector.shape_cast %40 : vector<2x4x8x8xf32> to vector<8x8x8xf32>
    %42 = vector.extract_strided_slice %36 {offsets = [0, 128], sizes = [16, 128], strides = [1, 1]} : vector<16x384xf32> to vector<16x128xf32>
    %43 = vector.extract_strided_slice %42 {offsets = [0, 0], sizes = [16, 32], strides = [1, 1]} : vector<16x128xf32> to vector<16x32xf32>
    %44 = vector.shape_cast %43 : vector<16x32xf32> to vector<2x8x4x8xf32>
    %45 = tpu.transpose %44, [0, 2, 1, 3] : vector<2x8x4x8xf32> -> vector<2x4x8x8xf32>
    %46 = vector.shape_cast %45 : vector<2x4x8x8xf32> to vector<8x8x8xf32>
    %47 = vector.extract_strided_slice %36 {offsets = [0, 256], sizes = [16, 128], strides = [1, 1]} : vector<16x384xf32> to vector<16x128xf32>
    %48 = vector.extract_strided_slice %47 {offsets = [0, 0], sizes = [16, 32], strides = [1, 1]} : vector<16x128xf32> to vector<16x32xf32>
    %49 = vector.shape_cast %48 : vector<16x32xf32> to vector<2x8x4x8xf32>
    %50 = tpu.transpose %49, [0, 2, 1, 3] : vector<2x8x4x8xf32> -> vector<2x4x8x8xf32>
    %51 = vector.shape_cast %50 : vector<2x4x8x8xf32> to vector<8x8x8xf32>
    "tpu.trace_start"() <{level = 10 : i32, message = "bqd,bkd->bqk"}> : () -> ()
    %cst_17 = arith.constant dense<0.000000e+00> : vector<8x8x8xf32>
    %52 = tpu.matmul %41, %46, %cst_17 {dimension_numbers = #tpu.dot_dimension_numbers<[2], [2], [1], [1], [0, 0, 0, 1, 1, 1], [0], [0]>} : vector<8x8x8xf32>, vector<8x8x8xf32>, vector<8x8x8xf32> -> vector<8x8x8xf32>
    "tpu.trace_stop"() : () -> ()
    %cst_18 = arith.constant 0.353553385 : f32
    %53 = vector.broadcast %cst_18 : f32 to vector<8x8x8xf32>
    %54 = arith.mulf %52, %53 : vector<8x8x8xf32>
    %55 = vector.broadcast %7 : vector<1x8x8xf32> to vector<8x8x8xf32>
    %56 = arith.addf %54, %55 : vector<8x8x8xf32>
    %cst_19 = arith.constant dense<0xFF800000> : vector<8x8xf32>
    %57 = vector.multi_reduction <maximumf>, %56, %cst_19 [2] : vector<8x8x8xf32> to vector<8x8xf32>
    %58 = vector.shape_cast %57 : vector<8x8xf32> to vector<8x8x1xf32>
    %59 = vector.broadcast %58 : vector<8x8x1xf32> to vector<8x8x8xf32>
    %60 = arith.subf %56, %59 : vector<8x8x8xf32>
    %61 = math.exp %60 : vector<8x8x8xf32>
    %cst_20 = arith.constant dense<0.000000e+00> : vector<8x8xf32>
    %62 = vector.multi_reduction <add>, %61, %cst_20 [2] : vector<8x8x8xf32> to vector<8x8xf32>
    %63 = vector.shape_cast %62 : vector<8x8xf32> to vector<8x8x1xf32>
    %64 = vector.broadcast %63 : vector<8x8x1xf32> to vector<8x8x8xf32>
    %65 = arith.divf %61, %64 : vector<8x8x8xf32>
    "tpu.trace_start"() <{level = 10 : i32, message = "bqk,bkd->bqd"}> : () -> ()
    %cst_21 = arith.constant dense<0.000000e+00> : vector<8x8x8xf32>
    %66 = tpu.matmul %65, %51, %cst_21 {dimension_numbers = #tpu.dot_dimension_numbers<[2], [1], [1], [2], [0, 0, 0, 1, 1, 2], [0], [0]>} : vector<8x8x8xf32>, vector<8x8x8xf32>, vector<8x8x8xf32> -> vector<8x8x8xf32>
    "tpu.trace_stop"() : () -> ()
    %67 = vector.shape_cast %66 : vector<8x8x8xf32> to vector<2x4x8x8xf32>
    %68 = tpu.transpose %67, [0, 2, 1, 3] : vector<2x4x8x8xf32> -> vector<2x8x4x8xf32>
    %69 = vector.shape_cast %68 : vector<2x8x4x8xf32> to vector<16x32xf32>
    %c0_22 = arith.constant 0 : index
    %c0_23 = arith.constant 0 : index
    %c0_24 = arith.constant 0 : index
    %70 = vector.load %arg6[%c0_22, %c0_23, %c0_24] : memref<2x32x128xf32, #tpu.memory_space<vmem>>, vector<1x32x128xf32>
    %71 = vector.shape_cast %70 : vector<1x32x128xf32> to vector<32x128xf32>
    %cst_25 = arith.constant dense<0.000000e+00> : vector<16x128xf32>
    %72 = tpu.matmul %69, %71, %cst_25 {dimension_numbers = #tpu.dot_dimension_numbers<[1], [0], [0], [1], [0, 0, 1, 1], [], []>} : vector<16x32xf32>, vector<32x128xf32>, vector<16x128xf32> -> vector<16x128xf32>
    %c0_26 = arith.constant 0 : index
    %c0_27 = arith.constant 0 : index
    %c0_28 = arith.constant 0 : index
    %73 = vector.load %arg7[%c0_26, %c0_27, %c0_28] : memref<2x1x128xf32, #tpu.memory_space<vmem>>, vector<1x1x128xf32>
    %74 = vector.shape_cast %73 : vector<1x1x128xf32> to vector<1x128xf32>
    %75 = vector.broadcast %74 : vector<1x128xf32> to vector<16x128xf32>
    %76 = arith.addf %72, %75 : vector<16x128xf32>
    %77 = arith.addf %5, %76 : vector<16x128xf32>
    %c0_29 = arith.constant 0 : index
    %c0_30 = arith.constant 0 : index
    %c0_31 = arith.constant 0 : index
    %78 = vector.load %arg8[%c0_29, %c0_30, %c0_31] : memref<2x1x128xf32, #tpu.memory_space<vmem>>, vector<1x1x128xf32>
    %79 = vector.shape_cast %78 : vector<1x1x128xf32> to vector<1x128xf32>
    %c0_32 = arith.constant 0 : index
    %c0_33 = arith.constant 0 : index
    %c0_34 = arith.constant 0 : index
    %80 = vector.load %arg9[%c0_32, %c0_33, %c0_34] : memref<2x1x128xf32, #tpu.memory_space<vmem>>, vector<1x1x128xf32>
    %81 = vector.shape_cast %80 : vector<1x1x128xf32> to vector<1x128xf32>
    %cst_35 = arith.constant dense<0.000000e+00> : vector<16xf32>
    %82 = vector.multi_reduction <add>, %77, %cst_35 [1] : vector<16x128xf32> to vector<16xf32>
    %83 = vector.shape_cast %82 : vector<16xf32> to vector<16x1xf32>
    %cst_36 = arith.constant 3.125000e-02 : f32
    %84 = vector.broadcast %cst_36 : f32 to vector<16x1xf32>
    %85 = arith.mulf %83, %84 : vector<16x1xf32>
    %86 = vector.broadcast %85 : vector<16x1xf32> to vector<16x128xf32>
    %87 = arith.subf %77, %86 : vector<16x128xf32>
    %88 = vector.broadcast %4 : vector<1x128xf32> to vector<16x128xf32>
    %89 = arith.mulf %87, %88 : vector<16x128xf32>
    %90 = arith.mulf %89, %89 : vector<16x128xf32>
    %cst_37 = arith.constant dense<0.000000e+00> : vector<16xf32>
    %91 = vector.multi_reduction <add>, %90, %cst_37 [1] : vector<16x128xf32> to vector<16xf32>
    %92 = vector.shape_cast %91 : vector<16xf32> to vector<16x1xf32>
    %cst_38 = arith.constant 3.125000e-02 : f32
    %93 = vector.broadcast %cst_38 : f32 to vector<16x1xf32>
    %94 = arith.mulf %92, %93 : vector<16x1xf32>
    %cst_39 = arith.constant 9.99999974E-6 : f32
    %95 = vector.broadcast %cst_39 : f32 to vector<16x1xf32>
    %96 = arith.addf %94, %95 : vector<16x1xf32>
    %97 = math.rsqrt %96 : vector<16x1xf32>
    %98 = vector.broadcast %97 : vector<16x1xf32> to vector<16x128xf32>
    %99 = arith.mulf %89, %98 : vector<16x128xf32>
    %100 = vector.broadcast %79 : vector<1x128xf32> to vector<16x128xf32>
    %101 = arith.mulf %99, %100 : vector<16x128xf32>
    %102 = vector.broadcast %81 : vector<1x128xf32> to vector<16x128xf32>
    %103 = arith.addf %101, %102 : vector<16x128xf32>
    %c0_40 = arith.constant 0 : index
    %c0_41 = arith.constant 0 : index
    %c0_42 = arith.constant 0 : index
    %104 = vector.load %arg10[%c0_40, %c0_41, %c0_42] : memref<2x128x128xf32, #tpu.memory_space<vmem>>, vector<1x128x128xf32>
    %105 = vector.shape_cast %104 : vector<1x128x128xf32> to vector<128x128xf32>
    %cst_43 = arith.constant dense<0.000000e+00> : vector<16x128xf32>
    %106 = tpu.matmul %103, %105, %cst_43 {dimension_numbers = #tpu.dot_dimension_numbers<[1], [0], [0], [1], [0, 0, 1, 1], [], []>} : vector<16x128xf32>, vector<128x128xf32>, vector<16x128xf32> -> vector<16x128xf32>
    %c0_44 = arith.constant 0 : index
    %c0_45 = arith.constant 0 : index
    %c0_46 = arith.constant 0 : index
    %107 = vector.load %arg11[%c0_44, %c0_45, %c0_46] : memref<2x1x128xf32, #tpu.memory_space<vmem>>, vector<1x1x128xf32>
    %108 = vector.shape_cast %107 : vector<1x1x128xf32> to vector<1x128xf32>
    %109 = vector.broadcast %108 : vector<1x128xf32> to vector<16x128xf32>
    %110 = arith.addf %106, %109 : vector<16x128xf32>
    %cst_47 = arith.constant 0.000000e+00 : f32
    %111 = vector.broadcast %cst_47 : f32 to vector<16x128xf32>
    %112 = arith.maximumf %110, %111 : vector<16x128xf32>
    %c0_48 = arith.constant 0 : index
    %c0_49 = arith.constant 0 : index
    %c0_50 = arith.constant 0 : index
    %113 = vector.load %arg12[%c0_48, %c0_49, %c0_50] : memref<2x128x128xf32, #tpu.memory_space<vmem>>, vector<1x128x128xf32>
    %114 = vector.shape_cast %113 : vector<1x128x128xf32> to vector<128x128xf32>
    %cst_51 = arith.constant dense<0.000000e+00> : vector<16x128xf32>
    %115 = tpu.matmul %112, %114, %cst_51 {dimension_numbers = #tpu.dot_dimension_numbers<[1], [0], [0], [1], [0, 0, 1, 1], [], []>} : vector<16x128xf32>, vector<128x128xf32>, vector<16x128xf32> -> vector<16x128xf32>
    %c0_52 = arith.constant 0 : index
    %c0_53 = arith.constant 0 : index
    %c0_54 = arith.constant 0 : index
    %116 = vector.load %arg13[%c0_52, %c0_53, %c0_54] : memref<2x1x128xf32, #tpu.memory_space<vmem>>, vector<1x1x128xf32>
    %117 = vector.shape_cast %116 : vector<1x1x128xf32> to vector<1x128xf32>
    %118 = vector.broadcast %117 : vector<1x128xf32> to vector<16x128xf32>
    %119 = arith.addf %115, %118 : vector<16x128xf32>
    %120 = arith.addf %77, %119 : vector<16x128xf32>
    %c1 = arith.constant 1 : index
    %c0_55 = arith.constant 0 : index
    %c0_56 = arith.constant 0 : index
    %121 = vector.load %arg3[%c1, %c0_55, %c0_56] : memref<2x1x128xf32, #tpu.memory_space<vmem>>, vector<1x1x128xf32>
    %122 = vector.shape_cast %121 : vector<1x1x128xf32> to vector<1x128xf32>
    %c1_57 = arith.constant 1 : index
    %c0_58 = arith.constant 0 : index
    %c0_59 = arith.constant 0 : index
    %123 = vector.load %arg4[%c1_57, %c0_58, %c0_59] : memref<2x1x128xf32, #tpu.memory_space<vmem>>, vector<1x1x128xf32>
    %124 = vector.shape_cast %123 : vector<1x1x128xf32> to vector<1x128xf32>
    %cst_60 = arith.constant dense<0.000000e+00> : vector<16xf32>
    %125 = vector.multi_reduction <add>, %120, %cst_60 [1] : vector<16x128xf32> to vector<16xf32>
    %126 = vector.shape_cast %125 : vector<16xf32> to vector<16x1xf32>
    %cst_61 = arith.constant 3.125000e-02 : f32
    %127 = vector.broadcast %cst_61 : f32 to vector<16x1xf32>
    %128 = arith.mulf %126, %127 : vector<16x1xf32>
    %129 = vector.broadcast %128 : vector<16x1xf32> to vector<16x128xf32>
    %130 = arith.subf %120, %129 : vector<16x128xf32>
    %131 = vector.broadcast %4 : vector<1x128xf32> to vector<16x128xf32>
    %132 = arith.mulf %130, %131 : vector<16x128xf32>
    %133 = arith.mulf %132, %132 : vector<16x128xf32>
    %cst_62 = arith.constant dense<0.000000e+00> : vector<16xf32>
    %134 = vector.multi_reduction <add>, %133, %cst_62 [1] : vector<16x128xf32> to vector<16xf32>
    %135 = vector.shape_cast %134 : vector<16xf32> to vector<16x1xf32>
    %cst_63 = arith.constant 3.125000e-02 : f32
    %136 = vector.broadcast %cst_63 : f32 to vector<16x1xf32>
    %137 = arith.mulf %135, %136 : vector<16x1xf32>
    %cst_64 = arith.constant 9.99999974E-6 : f32
    %138 = vector.broadcast %cst_64 : f32 to vector<16x1xf32>
    %139 = arith.addf %137, %138 : vector<16x1xf32>
    %140 = math.rsqrt %139 : vector<16x1xf32>
    %141 = vector.broadcast %140 : vector<16x1xf32> to vector<16x128xf32>
    %142 = arith.mulf %132, %141 : vector<16x128xf32>
    %143 = vector.broadcast %122 : vector<1x128xf32> to vector<16x128xf32>
    %144 = arith.mulf %142, %143 : vector<16x128xf32>
    %145 = vector.broadcast %124 : vector<1x128xf32> to vector<16x128xf32>
    %146 = arith.addf %144, %145 : vector<16x128xf32>
    %c1_65 = arith.constant 1 : index
    %c0_66 = arith.constant 0 : index
    %c0_67 = arith.constant 0 : index
    %147 = vector.load %arg5[%c1_65, %c0_66, %c0_67] : memref<2x128x384xf32, #tpu.memory_space<vmem>>, vector<1x128x384xf32>
    %148 = vector.shape_cast %147 : vector<1x128x384xf32> to vector<128x384xf32>
    %cst_68 = arith.constant dense<0.000000e+00> : vector<16x384xf32>
    %149 = tpu.matmul %146, %148, %cst_68 {dimension_numbers = #tpu.dot_dimension_numbers<[1], [0], [0], [1], [0, 0, 1, 1], [], []>} : vector<16x128xf32>, vector<128x384xf32>, vector<16x384xf32> -> vector<16x384xf32>
    %150 = vector.extract_strided_slice %149 {offsets = [0, 0], sizes = [16, 128], strides = [1, 1]} : vector<16x384xf32> to vector<16x128xf32>
    %151 = vector.extract_strided_slice %150 {offsets = [0, 0], sizes = [16, 32], strides = [1, 1]} : vector<16x128xf32> to vector<16x32xf32>
    %152 = vector.shape_cast %151 : vector<16x32xf32> to vector<2x8x4x8xf32>
    %153 = tpu.transpose %152, [0, 2, 1, 3] : vector<2x8x4x8xf32> -> vector<2x4x8x8xf32>
    %154 = vector.shape_cast %153 : vector<2x4x8x8xf32> to vector<8x8x8xf32>
    %155 = vector.extract_strided_slice %149 {offsets = [0, 128], sizes = [16, 128], strides = [1, 1]} : vector<16x384xf32> to vector<16x128xf32>
    %156 = vector.extract_strided_slice %155 {offsets = [0, 0], sizes = [16, 32], strides = [1, 1]} : vector<16x128xf32> to vector<16x32xf32>
    %157 = vector.shape_cast %156 : vector<16x32xf32> to vector<2x8x4x8xf32>
    %158 = tpu.transpose %157, [0, 2, 1, 3] : vector<2x8x4x8xf32> -> vector<2x4x8x8xf32>
    %159 = vector.shape_cast %158 : vector<2x4x8x8xf32> to vector<8x8x8xf32>
    %160 = vector.extract_strided_slice %149 {offsets = [0, 256], sizes = [16, 128], strides = [1, 1]} : vector<16x384xf32> to vector<16x128xf32>
    %161 = vector.extract_strided_slice %160 {offsets = [0, 0], sizes = [16, 32], strides = [1, 1]} : vector<16x128xf32> to vector<16x32xf32>
    %162 = vector.shape_cast %161 : vector<16x32xf32> to vector<2x8x4x8xf32>
    %163 = tpu.transpose %162, [0, 2, 1, 3] : vector<2x8x4x8xf32> -> vector<2x4x8x8xf32>
    %164 = vector.shape_cast %163 : vector<2x4x8x8xf32> to vector<8x8x8xf32>
    "tpu.trace_start"() <{level = 10 : i32, message = "bqd,bkd->bqk"}> : () -> ()
    %cst_69 = arith.constant dense<0.000000e+00> : vector<8x8x8xf32>
    %165 = tpu.matmul %154, %159, %cst_69 {dimension_numbers = #tpu.dot_dimension_numbers<[2], [2], [1], [1], [0, 0, 0, 1, 1, 1], [0], [0]>} : vector<8x8x8xf32>, vector<8x8x8xf32>, vector<8x8x8xf32> -> vector<8x8x8xf32>
    "tpu.trace_stop"() : () -> ()
    %cst_70 = arith.constant 0.353553385 : f32
    %166 = vector.broadcast %cst_70 : f32 to vector<8x8x8xf32>
    %167 = arith.mulf %165, %166 : vector<8x8x8xf32>
    %168 = vector.broadcast %7 : vector<1x8x8xf32> to vector<8x8x8xf32>
    %169 = arith.addf %167, %168 : vector<8x8x8xf32>
    %cst_71 = arith.constant dense<0xFF800000> : vector<8x8xf32>
    %170 = vector.multi_reduction <maximumf>, %169, %cst_71 [2] : vector<8x8x8xf32> to vector<8x8xf32>
    %171 = vector.shape_cast %170 : vector<8x8xf32> to vector<8x8x1xf32>
    %172 = vector.broadcast %171 : vector<8x8x1xf32> to vector<8x8x8xf32>
    %173 = arith.subf %169, %172 : vector<8x8x8xf32>
    %174 = math.exp %173 : vector<8x8x8xf32>
    %cst_72 = arith.constant dense<0.000000e+00> : vector<8x8xf32>
    %175 = vector.multi_reduction <add>, %174, %cst_72 [2] : vector<8x8x8xf32> to vector<8x8xf32>
    %176 = vector.shape_cast %175 : vector<8x8xf32> to vector<8x8x1xf32>
    %177 = vector.broadcast %176 : vector<8x8x1xf32> to vector<8x8x8xf32>
    %178 = arith.divf %174, %177 : vector<8x8x8xf32>
    "tpu.trace_start"() <{level = 10 : i32, message = "bqk,bkd->bqd"}> : () -> ()
    %cst_73 = arith.constant dense<0.000000e+00> : vector<8x8x8xf32>
    %179 = tpu.matmul %178, %164, %cst_73 {dimension_numbers = #tpu.dot_dimension_numbers<[2], [1], [1], [2], [0, 0, 0, 1, 1, 2], [0], [0]>} : vector<8x8x8xf32>, vector<8x8x8xf32>, vector<8x8x8xf32> -> vector<8x8x8xf32>
    "tpu.trace_stop"() : () -> ()
    %180 = vector.shape_cast %179 : vector<8x8x8xf32> to vector<2x4x8x8xf32>
    %181 = tpu.transpose %180, [0, 2, 1, 3] : vector<2x4x8x8xf32> -> vector<2x8x4x8xf32>
    %182 = vector.shape_cast %181 : vector<2x8x4x8xf32> to vector<16x32xf32>
    %c1_74 = arith.constant 1 : index
    %c0_75 = arith.constant 0 : index
    %c0_76 = arith.constant 0 : index
    %183 = vector.load %arg6[%c1_74, %c0_75, %c0_76] : memref<2x32x128xf32, #tpu.memory_space<vmem>>, vector<1x32x128xf32>
    %184 = vector.shape_cast %183 : vector<1x32x128xf32> to vector<32x128xf32>
    %cst_77 = arith.constant dense<0.000000e+00> : vector<16x128xf32>
    %185 = tpu.matmul %182, %184, %cst_77 {dimension_numbers = #tpu.dot_dimension_numbers<[1], [0], [0], [1], [0, 0, 1, 1], [], []>} : vector<16x32xf32>, vector<32x128xf32>, vector<16x128xf32> -> vector<16x128xf32>
    %c1_78 = arith.constant 1 : index
    %c0_79 = arith.constant 0 : index
    %c0_80 = arith.constant 0 : index
    %186 = vector.load %arg7[%c1_78, %c0_79, %c0_80] : memref<2x1x128xf32, #tpu.memory_space<vmem>>, vector<1x1x128xf32>
    %187 = vector.shape_cast %186 : vector<1x1x128xf32> to vector<1x128xf32>
    %188 = vector.broadcast %187 : vector<1x128xf32> to vector<16x128xf32>
    %189 = arith.addf %185, %188 : vector<16x128xf32>
    %190 = arith.addf %120, %189 : vector<16x128xf32>
    %c1_81 = arith.constant 1 : index
    %c0_82 = arith.constant 0 : index
    %c0_83 = arith.constant 0 : index
    %191 = vector.load %arg8[%c1_81, %c0_82, %c0_83] : memref<2x1x128xf32, #tpu.memory_space<vmem>>, vector<1x1x128xf32>
    %192 = vector.shape_cast %191 : vector<1x1x128xf32> to vector<1x128xf32>
    %c1_84 = arith.constant 1 : index
    %c0_85 = arith.constant 0 : index
    %c0_86 = arith.constant 0 : index
    %193 = vector.load %arg9[%c1_84, %c0_85, %c0_86] : memref<2x1x128xf32, #tpu.memory_space<vmem>>, vector<1x1x128xf32>
    %194 = vector.shape_cast %193 : vector<1x1x128xf32> to vector<1x128xf32>
    %cst_87 = arith.constant dense<0.000000e+00> : vector<16xf32>
    %195 = vector.multi_reduction <add>, %190, %cst_87 [1] : vector<16x128xf32> to vector<16xf32>
    %196 = vector.shape_cast %195 : vector<16xf32> to vector<16x1xf32>
    %cst_88 = arith.constant 3.125000e-02 : f32
    %197 = vector.broadcast %cst_88 : f32 to vector<16x1xf32>
    %198 = arith.mulf %196, %197 : vector<16x1xf32>
    %199 = vector.broadcast %198 : vector<16x1xf32> to vector<16x128xf32>
    %200 = arith.subf %190, %199 : vector<16x128xf32>
    %201 = vector.broadcast %4 : vector<1x128xf32> to vector<16x128xf32>
    %202 = arith.mulf %200, %201 : vector<16x128xf32>
    %203 = arith.mulf %202, %202 : vector<16x128xf32>
    %cst_89 = arith.constant dense<0.000000e+00> : vector<16xf32>
    %204 = vector.multi_reduction <add>, %203, %cst_89 [1] : vector<16x128xf32> to vector<16xf32>
    %205 = vector.shape_cast %204 : vector<16xf32> to vector<16x1xf32>
    %cst_90 = arith.constant 3.125000e-02 : f32
    %206 = vector.broadcast %cst_90 : f32 to vector<16x1xf32>
    %207 = arith.mulf %205, %206 : vector<16x1xf32>
    %cst_91 = arith.constant 9.99999974E-6 : f32
    %208 = vector.broadcast %cst_91 : f32 to vector<16x1xf32>
    %209 = arith.addf %207, %208 : vector<16x1xf32>
    %210 = math.rsqrt %209 : vector<16x1xf32>
    %211 = vector.broadcast %210 : vector<16x1xf32> to vector<16x128xf32>
    %212 = arith.mulf %202, %211 : vector<16x128xf32>
    %213 = vector.broadcast %192 : vector<1x128xf32> to vector<16x128xf32>
    %214 = arith.mulf %212, %213 : vector<16x128xf32>
    %215 = vector.broadcast %194 : vector<1x128xf32> to vector<16x128xf32>
    %216 = arith.addf %214, %215 : vector<16x128xf32>
    %c1_92 = arith.constant 1 : index
    %c0_93 = arith.constant 0 : index
    %c0_94 = arith.constant 0 : index
    %217 = vector.load %arg10[%c1_92, %c0_93, %c0_94] : memref<2x128x128xf32, #tpu.memory_space<vmem>>, vector<1x128x128xf32>
    %218 = vector.shape_cast %217 : vector<1x128x128xf32> to vector<128x128xf32>
    %cst_95 = arith.constant dense<0.000000e+00> : vector<16x128xf32>
    %219 = tpu.matmul %216, %218, %cst_95 {dimension_numbers = #tpu.dot_dimension_numbers<[1], [0], [0], [1], [0, 0, 1, 1], [], []>} : vector<16x128xf32>, vector<128x128xf32>, vector<16x128xf32> -> vector<16x128xf32>
    %c1_96 = arith.constant 1 : index
    %c0_97 = arith.constant 0 : index
    %c0_98 = arith.constant 0 : index
    %220 = vector.load %arg11[%c1_96, %c0_97, %c0_98] : memref<2x1x128xf32, #tpu.memory_space<vmem>>, vector<1x1x128xf32>
    %221 = vector.shape_cast %220 : vector<1x1x128xf32> to vector<1x128xf32>
    %222 = vector.broadcast %221 : vector<1x128xf32> to vector<16x128xf32>
    %223 = arith.addf %219, %222 : vector<16x128xf32>
    %cst_99 = arith.constant 0.000000e+00 : f32
    %224 = vector.broadcast %cst_99 : f32 to vector<16x128xf32>
    %225 = arith.maximumf %223, %224 : vector<16x128xf32>
    %c1_100 = arith.constant 1 : index
    %c0_101 = arith.constant 0 : index
    %c0_102 = arith.constant 0 : index
    %226 = vector.load %arg12[%c1_100, %c0_101, %c0_102] : memref<2x128x128xf32, #tpu.memory_space<vmem>>, vector<1x128x128xf32>
    %227 = vector.shape_cast %226 : vector<1x128x128xf32> to vector<128x128xf32>
    %cst_103 = arith.constant dense<0.000000e+00> : vector<16x128xf32>
    %228 = tpu.matmul %225, %227, %cst_103 {dimension_numbers = #tpu.dot_dimension_numbers<[1], [0], [0], [1], [0, 0, 1, 1], [], []>} : vector<16x128xf32>, vector<128x128xf32>, vector<16x128xf32> -> vector<16x128xf32>
    %c1_104 = arith.constant 1 : index
    %c0_105 = arith.constant 0 : index
    %c0_106 = arith.constant 0 : index
    %229 = vector.load %arg13[%c1_104, %c0_105, %c0_106] : memref<2x1x128xf32, #tpu.memory_space<vmem>>, vector<1x1x128xf32>
    %230 = vector.shape_cast %229 : vector<1x1x128xf32> to vector<1x128xf32>
    %231 = vector.broadcast %230 : vector<1x128xf32> to vector<16x128xf32>
    %232 = arith.addf %228, %231 : vector<16x128xf32>
    %233 = arith.addf %190, %232 : vector<16x128xf32>
    %c0_107 = arith.constant 0 : index
    %c0_108 = arith.constant 0 : index
    %234 = vector.load %arg14[%c0_107, %c0_108] : memref<1x128xf32, #tpu.memory_space<vmem>>, vector<1x128xf32>
    %c0_109 = arith.constant 0 : index
    %c0_110 = arith.constant 0 : index
    %235 = vector.load %arg15[%c0_109, %c0_110] : memref<1x128xf32, #tpu.memory_space<vmem>>, vector<1x128xf32>
    %cst_111 = arith.constant dense<0.000000e+00> : vector<16xf32>
    %236 = vector.multi_reduction <add>, %233, %cst_111 [1] : vector<16x128xf32> to vector<16xf32>
    %237 = vector.shape_cast %236 : vector<16xf32> to vector<16x1xf32>
    %cst_112 = arith.constant 3.125000e-02 : f32
    %238 = vector.broadcast %cst_112 : f32 to vector<16x1xf32>
    %239 = arith.mulf %237, %238 : vector<16x1xf32>
    %240 = vector.broadcast %239 : vector<16x1xf32> to vector<16x128xf32>
    %241 = arith.subf %233, %240 : vector<16x128xf32>
    %242 = vector.broadcast %4 : vector<1x128xf32> to vector<16x128xf32>
    %243 = arith.mulf %241, %242 : vector<16x128xf32>
    %244 = arith.mulf %243, %243 : vector<16x128xf32>
    %cst_113 = arith.constant dense<0.000000e+00> : vector<16xf32>
    %245 = vector.multi_reduction <add>, %244, %cst_113 [1] : vector<16x128xf32> to vector<16xf32>
    %246 = vector.shape_cast %245 : vector<16xf32> to vector<16x1xf32>
    %cst_114 = arith.constant 3.125000e-02 : f32
    %247 = vector.broadcast %cst_114 : f32 to vector<16x1xf32>
    %248 = arith.mulf %246, %247 : vector<16x1xf32>
    %cst_115 = arith.constant 9.99999974E-6 : f32
    %249 = vector.broadcast %cst_115 : f32 to vector<16x1xf32>
    %250 = arith.addf %248, %249 : vector<16x1xf32>
    %251 = math.rsqrt %250 : vector<16x1xf32>
    %252 = vector.broadcast %251 : vector<16x1xf32> to vector<16x128xf32>
    %253 = arith.mulf %243, %252 : vector<16x128xf32>
    %254 = vector.broadcast %234 : vector<1x128xf32> to vector<16x128xf32>
    %255 = arith.mulf %253, %254 : vector<16x128xf32>
    %256 = vector.broadcast %235 : vector<1x128xf32> to vector<16x128xf32>
    %257 = arith.addf %255, %256 : vector<16x128xf32>
    %c0_116 = arith.constant 0 : index
    %c0_117 = arith.constant 0 : index
    %258 = vector.load %arg16[%c0_116, %c0_117] : memref<128x128xf32, #tpu.memory_space<vmem>>, vector<128x128xf32>
    %cst_118 = arith.constant dense<0.000000e+00> : vector<16x128xf32>
    %259 = tpu.matmul %257, %258, %cst_118 {dimension_numbers = #tpu.dot_dimension_numbers<[1], [0], [0], [1], [0, 0, 1, 1], [], []>} : vector<16x128xf32>, vector<128x128xf32>, vector<16x128xf32> -> vector<16x128xf32>
    %c0_119 = arith.constant 0 : index
    %c0_120 = arith.constant 0 : index
    %260 = vector.load %arg17[%c0_119, %c0_120] : memref<1x128xf32, #tpu.memory_space<vmem>>, vector<1x128xf32>
    %261 = vector.broadcast %260 : vector<1x128xf32> to vector<16x128xf32>
    %262 = arith.addf %259, %261 : vector<16x128xf32>
    %c0_121 = arith.constant 0 : index
    %c0_122 = arith.constant 0 : index
    %263 = vector.load %arg18[%c0_121, %c0_122] : memref<16x128xf32, #tpu.memory_space<vmem>>, vector<16x128xf32>
    tpu.vector_store %arg18[%c0_121, %c0_122], %262 {strides = array<i32>} : memref<16x128xf32, #tpu.memory_space<vmem>>, vector<16x128xf32>,
    return
  }
  func.func @transform_0(%arg0: i32) -> (i32, i32) {
    %c0_i32 = arith.constant 0 : i32
    %c0_i32_0 = arith.constant 0 : i32
    return %arg0, %c0_i32 : i32, i32
  }
  func.func @transform_1(%arg0: i32) -> (i32, i32) {
    %c0_i32 = arith.constant 0 : i32
    %c0_i32_0 = arith.constant 0 : i32
    %c0_i32_1 = arith.constant 0 : i32
    return %c0_i32, %c0_i32_0 : i32, i32
  }
  func.func @transform_2(%arg0: i32) -> (i32, i32, i32) {
    %c0_i32 = arith.constant 0 : i32
    %c0_i32_0 = arith.constant 0 : i32
    %c0_i32_1 = arith.constant 0 : i32
    %c0_i32_2 = arith.constant 0 : i32
    return %c0_i32, %c0_i32_0, %c0_i32_1 : i32, i32, i32
  }
  func.func @transform_3(%arg0: i32) -> (i32, i32, i32) {
    %c0_i32 = arith.constant 0 : i32
    %c0_i32_0 = arith.constant 0 : i32
    %c0_i32_1 = arith.constant 0 : i32
    %c0_i32_2 = arith.constant 0 : i32
    return %c0_i32, %c0_i32_0, %c0_i32_1 : i32, i32, i32
  }
  func.func @transform_4(%arg0: i32) -> (i32, i32, i32) {
    %c0_i32 = arith.constant 0 : i32
    %c0_i32_0 = arith.constant 0 : i32
    %c0_i32_1 = arith.constant 0 : i32
    %c0_i32_2 = arith.constant 0 : i32
    return %c0_i32, %c0_i32_0, %c0_i32_1 : i32, i32, i32
  }
  func.func @transform_5(%arg0: i32) -> (i32, i32, i32) {
    %c0_i32 = arith.constant 0 : i32
    %c0_i32_0 = arith.constant 0 : i32
    %c0_i32_1 = arith.constant 0 : i32
    %c0_i32_2 = arith.constant 0 : i32
    return %c0_i32, %c0_i32_0, %c0_i32_1 : i32, i32, i32
  }
  func.func @transform_6(%arg0: i32) -> (i32, i32, i32) {
    %c0_i32 = arith.constant 0 : i32
    %c0_i32_0 = arith.constant 0 : i32
    %c0_i32_1 = arith.constant 0 : i32
    %c0_i32_2 = arith.constant 0 : i32
    return %c0_i32, %c0_i32_0, %c0_i32_1 : i32, i32, i32
  }
  func.func @transform_7(%arg0: i32) -> (i32, i32, i32) {
    %c0_i32 = arith.constant 0 : i32
    %c0_i32_0 = arith.constant 0 : i32
    %c0_i32_1 = arith.constant 0 : i32
    %c0_i32_2 = arith.constant 0 : i32
    return %c0_i32, %c0_i32_0, %c0_i32_1 : i32, i32, i32
  }
  func.func @transform_8(%arg0: i32) -> (i32, i32, i32) {
    %c0_i32 = arith.constant 0 : i32
    %c0_i32_0 = arith.constant 0 : i32
    %c0_i32_1 = arith.constant 0 : i32
    %c0_i32_2 = arith.constant 0 : i32
    return %c0_i32, %c0_i32_0, %c0_i32_1 : i32, i32, i32
  }
  func.func @transform_9(%arg0: i32) -> (i32, i32, i32) {
    %c0_i32 = arith.constant 0 : i32
    %c0_i32_0 = arith.constant 0 : i32
    %c0_i32_1 = arith.constant 0 : i32
    %c0_i32_2 = arith.constant 0 : i32
    return %c0_i32, %c0_i32_0, %c0_i32_1 : i32, i32, i32
  }
  func.func @transform_10(%arg0: i32) -> (i32, i32, i32) {
    %c0_i32 = arith.constant 0 : i32
    %c0_i32_0 = arith.constant 0 : i32
    %c0_i32_1 = arith.constant 0 : i32
    %c0_i32_2 = arith.constant 0 : i32
    return %c0_i32, %c0_i32_0, %c0_i32_1 : i32, i32, i32
  }
  func.func @transform_11(%arg0: i32) -> (i32, i32, i32) {
    %c0_i32 = arith.constant 0 : i32
    %c0_i32_0 = arith.constant 0 : i32
    %c0_i32_1 = arith.constant 0 : i32
    %c0_i32_2 = arith.constant 0 : i32
    return %c0_i32, %c0_i32_0, %c0_i32_1 : i32, i32, i32
  }
  func.func @transform_12(%arg0: i32) -> (i32, i32, i32) {
    %c0_i32 = arith.constant 0 : i32
    %c0_i32_0 = arith.constant 0 : i32
    %c0_i32_1 = arith.constant 0 : i32
    %c0_i32_2 = arith.constant 0 : i32
    return %c0_i32, %c0_i32_0, %c0_i32_1 : i32, i32, i32
  }
  func.func @transform_13(%arg0: i32) -> (i32, i32) {
    %c0_i32 = arith.constant 0 : i32
    %c0_i32_0 = arith.constant 0 : i32
    %c0_i32_1 = arith.constant 0 : i32
    return %c0_i32, %c0_i32_0 : i32, i32
  }
  func.func @transform_14(%arg0: i32) -> (i32, i32) {
    %c0_i32 = arith.constant 0 : i32
    %c0_i32_0 = arith.constant 0 : i32
    %c0_i32_1 = arith.constant 0 : i32
    return %c0_i32, %c0_i32_0 : i32, i32
  }
  func.func @transform_15(%arg0: i32) -> (i32, i32) {
    %c0_i32 = arith.constant 0 : i32
    %c0_i32_0 = arith.constant 0 : i32
    %c0_i32_1 = arith.constant 0 : i32
    return %c0_i32, %c0_i32_0 : i32, i32
  }
  func.func @transform_16(%arg0: i32) -> (i32, i32) {
    %c0_i32 = arith.constant 0 : i32
    %c0_i32_0 = arith.constant 0 : i32
    %c0_i32_1 = arith.constant 0 : i32
    return %c0_i32, %c0_i32_0 : i32, i32
  }
  func.func @transform_17(%arg0: i32) -> (i32, i32) {
    %c0_i32 = arith.constant 0 : i32
    %c0_i32_0 = arith.constant 0 : i32
    return %arg0, %c0_i32 : i32, i32
  }
}

</mosaic_0001>

<bundles_post_ra>
// kernel: tpu_custom_call.1
= control target key start
LH: loop header
LB: loop body
LE: loop exit
PB: predicated region body
PF: predicated region fallthrough
CT: control target
= control target key end

     0   :  { %s5896_s0 = inlined_call_operand.hbm [shape: f32[16,128], index: 0, kind: input, shape index: {}]   ;;  %s5897_s1 = inlined_call_operand.hbm [shape: f32[8,8], index: 1, kind: input, shape index: {}]   ;;  %s5898_s2 = inlined_call_operand.hbm [shape: f32[2,1,128], index: 2, kind: input, shape index: {}]   ;;  %s5899_s3 = inlined_call_operand.vmem [shape: f32[2,1,128], index: 3, kind: input, shape index: {}]   ;;  %s5900_s4 = inlined_call_operand.hbm [shape: f32[2,128,384], index: 4, kind: input, shape index: {}]   ;;  %s5901_s5 = inlined_call_operand.hbm [shape: f32[2,32,128], index: 5, kind: input, shape index: {}]   ;;  %s5902_s6 = inlined_call_operand.vmem [shape: f32[2,1,128], index: 6, kind: input, shape index: {}]   ;;  %s5903_s7 = inlined_call_operand.vmem [shape: f32[2,1,128], index: 7, kind: input, shape index: {}]   ;;  %s5904_s8 = inlined_call_operand.hbm [shape: f32[2,1,128], index: 8, kind: input, shape index: {}]   ;;  %s5905_s9 = inlined_call_operand.hbm [shape: f32[2,128,128], index: 9, kind: input, shape index: {}]   ;;  %s5906_s10 = inlined_call_operand.vmem [shape: f32[2,1,128], index: 10, kind: input, shape index: {}]   ;;  %s5907_s11 = inlined_call_operand.hbm [shape: f32[2,128,128], index: 11, kind: input, shape index: {}]   ;;  %s5908_s12 = inlined_call_operand.vmem [shape: f32[2,1,128], index: 12, kind: input, shape index: {}]   ;;  %s5909_s13 = inlined_call_operand.vmem [shape: f32[1,128], index: 13, kind: input, shape index: {}]   ;;  %s5910_s14 = inlined_call_operand.vmem [shape: f32[1,128], index: 14, kind: input, shape index: {}]   ;;  %s5911_s15 = inlined_call_operand.hbm [shape: f32[128,128], index: 15, kind: input, shape index: {}]   ;;  %s5912_s16 = inlined_call_operand.vmem [shape: f32[1,128], index: 16, kind: input, shape index: {}]   ;;  %s5913_s17 = inlined_call_operand.hbm [shape: f32[16,128], index: 17, kind: output, shape index: {}]  }
   0x1   :  { %5914 = sst [smem:[#allocation24_spill]] %s5896_s0 }
   0x2   :  { %5915 = sst [smem:[#allocation25_spill]] %s5897_s1 }
   0x3   :  { %22 = vsyncpa [#allocation3], 0 }
   0x4   :  { %23 = vsyncpa [#allocation6], 0 }
   0x5   :  { %24 = vsyncpa [#allocation9], 0 }
   0x6   :  { %25 = vsyncpa [#allocation12], 0 }
   0x7   :  { %26 = vsyncpa [#allocation15], 0  ;;  %s5916_s26 = sld [smem:[#allocation25_spill]] }
   0xd   :  { %s46_s27 = sshll.u32 %s5916_s26, 4  ;;  %s47_s27 = int_to_ptr.hbm [resolvable:$true] %s46_s27 }
   0xe   :  { %27 = vsyncpa [#allocation4], 0  ;;  %s4655_s28 = smov [#allocation5]   ;;  %s71_s18 = sshll.u32 %s5900_s4, 4  ;;  %s72_s18 = int_to_ptr.hbm [resolvable:$true] %s71_s18 }
   0xf   :  { %s48_s29 = sshll.u32 %s4655_s28, 4  ;;  %s4656_s19 = smov [#allocation8]   ;;  %s49_s29 = int_to_ptr.vmem [resolvable:$true] %s48_s29 }
  0x10   :  { %51 = dma.hbm_to_vmem [thread:$0]  %s47_s27, 128, %s49_s29, [#allocation6]  }
  0x11   :  { %s73_s1 = sshll.u32 %s4656_s19, 4  ;;  %s4657_s20 = smov 384   ;;  %s74_s1 = int_to_ptr.vmem [resolvable:$true] %s73_s1 }
  0x12   :  { %s4658_s21 = smov 24   ;;  %s101_s24 = sshll.u32 %s5904_s8, 4  ;;  %s102_s24 = int_to_ptr.hbm [resolvable:$true] %s101_s24 }
  0x13   :  { %79 = dma.hbm_to_vmem [thread:$0]  %s72_s18, 12288, %s74_s1, [#allocation9], %s4657_s20, %s4657_s20, %s4658_s21  }
  0x14   :  { %s4659_s25 = smov [#allocation11]   ;;  %s4660_s28 = smov 16  }
  0x15   :  { %s103_s26 = sshll.u32 %s4659_s25, 4  ;;  %s4661_s0 = smov 1   ;;  %s104_s26 = int_to_ptr.vmem [resolvable:$true] %s103_s26 }
  0x16   :  { %109 = dma.hbm_to_vmem [thread:$0]  %s102_s24, 32, %s104_s26, [#allocation12], %s4660_s28, %s4660_s28, %s4661_s0  }
  0x17   :  { %s129_s29 = sshll.u32 %s5907_s11, 4  ;;  %s4662_s30 = smov [#allocation14]   ;;  %s130_s29 = int_to_ptr.hbm [resolvable:$true] %s129_s29 }
  0x18   :  { %s131_s18 = sshll.u32 %s4662_s30, 4  ;;  %s5917_s20 = sld [smem:[#allocation24_spill]]  ;;  %s132_s18 = int_to_ptr.vmem [resolvable:$true] %s131_s18 }
  0x19   :  { %s4663_s22 = smov 128   ;;  %s4664_s23 = smov 8  }
  0x1a   :  { %137 = dma.hbm_to_vmem [thread:$0]  %s130_s29, 4096, %s132_s18, [#allocation15], %s4663_s22, %s4663_s22, %s4664_s23  }
  0x1b   :  { %s56_s26 = sshll.u32 %s5898_s2, 4  ;;  %s4665_s11 = smov [#allocation2]   ;;  %s57_s26 = int_to_ptr.hbm [resolvable:$true] %s56_s26 }
  0x1c   :  { %s34_s4 = sshll.u32 %s4665_s11, 4  ;;  %s4666_s27 = smov [#allocation7]   ;;  %s35_s4 = int_to_ptr.vmem [resolvable:$true] %s34_s4 }
  0x1d   :  { %s58_s30 = sshll.u32 %s4666_s27, 4  ;;  %s114_s18 = sshll.u32 %s5905_s9, 4  ;;  %s59_s30 = int_to_ptr.vmem [resolvable:$true] %s58_s30  ;;  %s115_s18 = int_to_ptr.hbm [resolvable:$true] %s114_s18 }
  0x1e   :  { %s32_s8 = sshll.u32 %s5917_s20, 4  ;;  %s84_s20 = sshll.u32 %s5901_s5, 4  ;;  %s33_s8 = int_to_ptr.hbm [resolvable:$true] %s32_s8  ;;  %s85_s20 = int_to_ptr.hbm [resolvable:$true] %s84_s20 }
  0x1f   :  { %40 = dma.hbm_to_vmem [thread:$0]  %s33_s8, 256, %s35_s4, [#allocation3], %s4663_s22, %s4663_s22, %s4664_s23  }
  0x20   :  { %64 = dma.hbm_to_vmem [thread:$0]  %s57_s26, 32, %s59_s30, [#allocation6], %s4660_s28, %s4660_s28, %s4661_s0  }
  0x21   :  { %s4667_s24 = smov [#allocation10]   ;;  %s4668_s8 = smov [#allocation13]  }
  0x22   :  { %s86_s25 = sshll.u32 %s4667_s24, 4  ;;  %s116_s11 = sshll.u32 %s4668_s8, 4  ;;  %s87_s25 = int_to_ptr.vmem [resolvable:$true] %s86_s25  ;;  %s117_s11 = int_to_ptr.vmem [resolvable:$true] %s116_s11 }
  0x23   :  { %92 = dma.hbm_to_vmem [thread:$0]  %s85_s20, 1024, %s87_s25, [#allocation9], %s4663_s22, %s4663_s22, %s4664_s23  }
  0x24   :  { %s148_s27 = sshll.u32 %s5911_s15, 4  ;;  %s4669_s9 = smov [#allocation16]   ;;  %s149_s27 = int_to_ptr.hbm [resolvable:$true] %s148_s27 }
  0x25   :  { %122 = dma.hbm_to_vmem [thread:$0]  %s115_s18, 4096, %s117_s11, [#allocation12], %s4663_s22, %s4663_s22, %s4664_s23  }
  0x26   :  { %s150_s0 = sshll.u32 %s4669_s9, 4  ;;  %s151_s0 = int_to_ptr.vmem [resolvable:$true] %s150_s0 }
  0x27   :  { %156 = dma.hbm_to_vmem [thread:$0]  %s149_s27, 2048, %s151_s0, [#allocation15], %s4663_s22, %s4663_s22, %s4664_s23  }
  0x28   :  { %4643 = dma.done.wait [#allocation3], 256  }
  0x29   :  { %4644 = vsyncadd [#allocation3], 4294967040 }
  0x2a   :  { %4645 = dma.done.wait [#allocation6], 160  }
  0x2b   :  { %4646 = vsyncadd [#allocation6], 4294967136 }
  0x2c   :  { %4647 = dma.done.wait [#allocation9], 13312  }
  0x2d   :  { %4648 = vsyncadd [#allocation9], 4294953984 }
  0x2e   :  { %4649 = dma.done.wait [#allocation12], 4128  }
  0x2f   :  { %4650 = vsyncadd [#allocation12], 4294963168 }
  0x30   :  { %4651 = dma.done.wait [#allocation15], 6144  }
  0x31   :  { %4652 = vsyncadd [#allocation15], 4294961152  ;;  %v200_v0 = vld [vmem:[#allocation2] sm:$0xff]  ;;  %v201_v1 = vld [vmem:[#allocation2 + $0x8] sm:$0xff]  ;;  %v195_v8 = vlaneseq  ;;  %v4670_v12 = vmov 0.0   ;;  %s4671_s30 = smov 104  }
  0x32   :  { %205 = vadd.xlane.f32.xlu0 %v200_v0  ;;  %v302_v2 = vld [vmem:[#allocation8 + $0x168] sm:$0xff]  ;;  %v303_v3 = vld [vmem:[#allocation8 + $0x170] sm:$0xff]  ;;  %v304_v4 = vld [vmem:[#allocation8 + $0x178] sm:$0xff]  ;;  %s4672_s19 = smov 120   ;;  %s4673_s1 = smov 112   ;;  %vm395_vm7 = vcmask 1047556  }
  0x33   :  { %305 = vmatpush.msra.mxu0 %v302_v2  ;;  %328 = vmatpush.msra.mxu1 %v303_v3  ;;  %v299_v5 = vld [vmem:[#allocation8 + $0x150] sm:$0xff]  ;;  %v300_v6 = vld [vmem:[#allocation8 + $0x158] sm:$0xff]  ;;  %v301_v7 = vld [vmem:[#allocation8 + $0x160] sm:$0xff]  ;;  %v196_v9 = vand.u32 127, %v195_v8  ;;  %vm1095_vm8 = vcmask 64512   ;;  %s4172_s2 = sshll.u32 %s5913_s17, 4  ;;  %s4173_s2 = int_to_ptr.hbm [resolvable:$true] %s4172_s2 }
  0x34   :  { %351 = vmatpush.msra.mxu2 %v304_v4  ;;  %v296_v22 = vld [vmem:[#allocation8 + $0x138] sm:$0xff]  ;;  %v297_v23 = vld [vmem:[#allocation8 + $0x140] sm:$0xff]  ;;  %v298_v24 = vld [vmem:[#allocation8 + $0x148] sm:$0xff] }
  0x35   :  { %306 = vmatpush.msra.mxu0 %v299_v5  ;;  %329 = vmatpush.msra.mxu1 %v300_v6  ;;  %vm197_vm0 = vcmp.lt.s32.totalorder %v196_v9, 32  ;;  %v293_v25 = vld [vmem:[#allocation8 + $0x120] sm:$0xff]  ;;  %v294_v26 = vld [vmem:[#allocation8 + $0x128] sm:$0xff]  ;;  %v295_v27 = vld [vmem:[#allocation8 + $0x130] sm:$0xff] }
  0x36   :  { %352 = vmatpush.msra.mxu2 %v301_v7  ;;  %v4814_v13 = vsel %vm197_vm0, 1.0, %v4670_v12  ;;  %v290_v28 = vld [vmem:[#allocation8 + $0x108] sm:$0xff]  ;;  %v291_v29 = vld [vmem:[#allocation8 + $0x110] sm:$0xff]  ;;  %v292_v30 = vld [vmem:[#allocation8 + $0x118] sm:$0xff] }
  0x37   :  { %307 = vmatpush.msra.mxu0 %v296_v22  ;;  %330 = vmatpush.msra.mxu1 %v297_v23  ;;  %v287_v31 = vld [vmem:[#allocation8 + $0xf0] sm:$0xff]  ;;  %v288_v32 = vld [vmem:[#allocation8 + $0xf8] sm:$0xff]  ;;  %v289_v33 = vld [vmem:[#allocation8 + $0x100] sm:$0xff] }
  0x38   :  { %353 = vmatpush.msra.mxu2 %v298_v24  ;;  %v284_v34 = vld [vmem:[#allocation8 + $0xd8] sm:$0xff]  ;;  %v285_v35 = vld [vmem:[#allocation8 + $0xe0] sm:$0xff]  ;;  %v286_v36 = vld [vmem:[#allocation8 + $0xe8] sm:$0xff] }
  0x39   :  { %308 = vmatpush.msra.mxu0 %v293_v25  ;;  %331 = vmatpush.msra.mxu1 %v294_v26  ;;  %v281_v37 = vld [vmem:[#allocation8 + $0xc0] sm:$0xff]  ;;  %v282_v38 = vld [vmem:[#allocation8 + $0xc8] sm:$0xff]  ;;  %v283_v39 = vld [vmem:[#allocation8 + $0xd0] sm:$0xff] }
  0x3a   :  { %207 = vadd.xlane.f32.xlu0 %v201_v1  ;;  %354 = vmatpush.msra.mxu2 %v295_v27  ;;  %v278_v40 = vld [vmem:[#allocation8 + $0xa8] sm:$0xff]  ;;  %v279_v41 = vld [vmem:[#allocation8 + $0xb0] sm:$0xff]  ;;  %v280_v42 = vld [vmem:[#allocation8 + $0xb8] sm:$0xff] }
  0x3b   :  { %309 = vmatpush.msra.mxu0 %v290_v28  ;;  %332 = vmatpush.msra.mxu1 %v291_v29  ;;  %v275_v43 = vld [vmem:[#allocation8 + $0x90] sm:$0xff]  ;;  %v276_v44 = vld [vmem:[#allocation8 + $0x98] sm:$0xff]  ;;  %v277_v45 = vld [vmem:[#allocation8 + $0xa0] sm:$0xff] }
  0x3c   :  { %355 = vmatpush.msra.mxu2 %v292_v30  ;;  %v272_v46 = vld [vmem:[#allocation8 + $0x78] sm:$0xff]  ;;  %v273_v47 = vld [vmem:[#allocation8 + $0x80] sm:$0xff]  ;;  %v274_v48 = vld [vmem:[#allocation8 + $0x88] sm:$0xff] }
  0x3d   :  { %310 = vmatpush.msra.mxu0 %v287_v31  ;;  %333 = vmatpush.msra.mxu1 %v288_v32  ;;  %v269_v49 = vld [vmem:[#allocation8 + $0x60] sm:$0xff]  ;;  %v270_v50 = vld [vmem:[#allocation8 + $0x68] sm:$0xff]  ;;  %v271_v51 = vld [vmem:[#allocation8 + $0x70] sm:$0xff] }
  0x3e   :  { %356 = vmatpush.msra.mxu2 %v289_v33  ;;  %v266_v52 = vld [vmem:[#allocation8 + $0x48] sm:$0xff]  ;;  %v267_v53 = vld [vmem:[#allocation8 + $0x50] sm:$0xff]  ;;  %v268_v54 = vld [vmem:[#allocation8 + $0x58] sm:$0xff] }
  0x3f   :  { %311 = vmatpush.msra.mxu0 %v284_v34  ;;  %334 = vmatpush.msra.mxu1 %v285_v35  ;;  %v263_v55 = vld [vmem:[#allocation8 + $0x30] sm:$0xff]  ;;  %v264_v56 = vld [vmem:[#allocation8 + $0x38] sm:$0xff]  ;;  %v265_v57 = vld [vmem:[#allocation8 + $0x40] sm:$0xff] }
  0x40   :  { %357 = vmatpush.msra.mxu2 %v286_v36  ;;  %v260_v58 = vld [vmem:[#allocation8 + $0x18] sm:$0xff]  ;;  %v261_v59 = vld [vmem:[#allocation8 + $0x20] sm:$0xff]  ;;  %v262_v60 = vld [vmem:[#allocation8 + $0x28] sm:$0xff]  ;;  %v4674_v36 = vmov 1983009808  }
  0x41   :  { %312 = vmatpush.msra.mxu0 %v281_v37  ;;  %335 = vmatpush.msra.mxu1 %v282_v38  ;;  %v257_v61 = vld [vmem:[#allocation8] sm:$0xff]  ;;  %v258_v62 = vld [vmem:[#allocation8 + $0x8] sm:$0xff]  ;;  %v259_v63 = vld [vmem:[#allocation8 + $0x10] sm:$0xff]  ;;  %v400_v37 = vunpack.c.l.s4 %v4674_v36 }
  0x42   :  { %358 = vmatpush.msra.mxu2 %v283_v39 }
  0x43   :  { %313 = vmatpush.msra.mxu0 %v278_v40  ;;  %336 = vmatpush.msra.mxu1 %v279_v41  ;;  %v4853_v40 = vunpack.c.0.s8 %v400_v37 }
  0x44   :  { %359 = vmatpush.msra.mxu2 %v280_v42 }
  0x45   :  { %314 = vmatpush.msra.mxu0 %v275_v43  ;;  %337 = vmatpush.msra.mxu1 %v276_v44 }
  0x46   :  { %360 = vmatpush.msra.mxu2 %v277_v45 }
  0x47   :  { %315 = vmatpush.msra.mxu0 %v272_v46  ;;  %338 = vmatpush.msra.mxu1 %v273_v47  ;;  %v4675_v47 = vmov 1934713408  }
  0x48   :  { %361 = vmatpush.msra.mxu2 %v274_v48  ;;  %v424_v48 = vunpack.c.l.s4 %v4675_v47 }
  0x49   :  { %316 = vmatpush.msra.mxu0 %v269_v49  ;;  %339 = vmatpush.msra.mxu1 %v270_v50 }
  0x4a   :  { %362 = vmatpush.msra.mxu2 %v271_v51 }
  0x4b   :  { %317 = vmatpush.msra.mxu0 %v266_v52  ;;  %340 = vmatpush.msra.mxu1 %v267_v53 }
  0x4c   :  { %363 = vmatpush.msra.mxu2 %v268_v54 }
  0x4d   :  { %318 = vmatpush.msra.mxu0 %v263_v55  ;;  %341 = vmatpush.msra.mxu1 %v264_v56 }
  0x4e   :  { %364 = vmatpush.msra.mxu2 %v265_v57 }
  0x4f   :  { %319 = vmatpush.msra.mxu0 %v260_v58  ;;  %342 = vmatpush.msra.mxu1 %v261_v59 }
  0x50   :  { %365 = vmatpush.msra.mxu2 %v262_v60 }
  0x51   :  { %320 = vmatpush.msra.mxu0 %v257_v61  ;;  %343 = vmatpush.msra.mxu1 %v258_v62 }
  0x52   :  { %366 = vmatpush.msra.mxu2 %v259_v63 }
  0xa5   :  { %v206_v10 = vpop.xlane.xlu0 %205 }
  0xa6   :  { %v209_v11 = vmul.f32 0.03125, %v206_v10 }
  0xa8   :  { %v211_v14 = vsub.f32 %v200_v0, %v209_v11 }
  0xaa   :  { %v4817_v15 = vmul.f32 %v4814_v13, %v211_v14 }
  0xac   :  { %v215_v16 = vmul.f32 %v4817_v15, %v4817_v15 }
  0xad   :  { %v208_v17 = vpop.xlane.xlu0 %207 }
  0xae   :  { %v210_v18 = vmul.f32 0.03125, %v208_v17  ;;  %217 = vadd.xlane.f32.xlu1 %v215_v16  ;;  %v4299_v16 = vld [vmem:[#allocation7] ss:$0 sm:$0xff] }
  0xb0   :  { %v212_v19 = vsub.f32 %v201_v1, %v210_v18 }
  0xb2   :  { %v4822_v20 = vmul.f32 %v4814_v13, %v212_v19 }
  0xb4   :  { %v216_v21 = vmul.f32 %v4822_v20, %v4822_v20 }
  0xb6   :  { %219 = vadd.xlane.f32.xlu1 %v216_v21  ;;  %v4300_v21 = vld [vmem:[%s5899_s3] ss:$0 sm:$0xff] }
 0x121   :  { %v218_v0 = vpop.xlane.xlu1 %217 }
 0x122   :  { %v221_v1 = vmul.f32 0.03125, %v218_v0 }
 0x124   :  { %v223_v2 = vadd.f32 1e-05, %v221_v1  ;;  %v4866_v1 = vunpack.c.0.s8 %v424_v48 }
 0x126   :  { %4316 = vrsqrt.f32 %v223_v2  ;;  %vm231_vm2 = vweird.f32 %v223_v2 }
 0x129   :  { %v220_v3 = vpop.xlane.xlu1 %219 }
 0x12a   :  { %v222_v4 = vmul.f32 0.03125, %v220_v3 }
 0x12c   :  { %v4317_v5 = vpop.eup %4316  ;;  %v224_v6 = vadd.f32 1e-05, %v222_v4 }
 0x12d   :  { %v226_v7 = vmul.f32 %v4317_v5, %v223_v2  ;;  %vm232_vm1 = vweird.f32 %v4317_v5 }
 0x12e   :  { %4318 = vrsqrt.f32 %v224_v6  ;;  %vm233_vm3 = vmor %vm231_vm2, %vm232_vm1  ;;  %vm241_vm4 = vweird.f32 %v224_v6 }
 0x12f   :  { %v227_v8 = vmul.f32 %v4317_v5, %v226_v7 }
 0x131   :  { %v228_v9 = vmul.f32 0.5, %v227_v8 }
 0x133   :  { %v229_v10 = vsub.f32 1.5, %v228_v9 }
 0x134   :  { %v4319_v11 = vpop.eup %4318 }
 0x135   :  { %v230_v12 = vmul.f32 %v4317_v5, %v229_v10  ;;  %v236_v14 = vmul.f32 %v4319_v11, %v224_v6  ;;  %vm242_vm5 = vweird.f32 %v4319_v11 }
 0x136   :  { %vm243_vm6 = vmor %vm241_vm4, %vm242_vm5 }
 0x137   :  { %v234_v17 = vsel %vm233_vm3, %v4317_v5, %v230_v12  ;;  %v237_v18 = vmul.f32 %v4319_v11, %v236_v14 }
 0x138   :  { %v245_v19 = vmul.f32 %v234_v17, %v4817_v15 }
 0x139   :  { %v238_v22 = vmul.f32 0.5, %v237_v18 }
 0x13a   :  { %v250_v23 = vmul.f32 %v4299_v16, %v245_v19 }
 0x13b   :  { %v239_v24 = vsub.f32 1.5, %v238_v22 }
 0x13c   :  { %v255_v25 = vadd.f32 %v4300_v21, %v250_v23 }
 0x13d   :  { %v240_v26 = vmul.f32 %v4319_v11, %v239_v24 }
 0x13e   :  { %321 = vmatmul.f32.vlgmr.msra.gmra.mxu0 %v255_v25  ;;  %344 = vmatmul.f32.vlgmr.msra.gmra.mxu1 %v255_v25 }
 0x13f   :  { %v244_v27 = vsel %vm243_vm6, %v4319_v11, %v240_v26  ;;  %367 = vmatmul.f32.vlgmr.msra.gmra.mxu2 %v255_v25 }
 0x140   :  { %v246_v28 = vmul.f32 %v244_v27, %v4822_v20 }
 0x142   :  { %v251_v29 = vmul.f32 %v4299_v16, %v246_v28 }
 0x144   :  { %v256_v15 = vadd.f32 %v4300_v21, %v251_v29 }
 0x146   :  { %324 = vmatmul.f32.gmra.mxu0 %v256_v15  ;;  %347 = vmatmul.f32.gmra.mxu1 %v256_v15 }
 0x147   :  { %370 = vmatmul.f32.gmra.mxu2 %v256_v15 }
 0x1bb   :  { %v322_v30 = vpop.f32.mrf.mxu0  ;;  %v345_v31 = vpop.f32.mrf.mxu1 }
 0x1bc   :  { %629 = vrot.lane.b32.xlu0 %v345_v31, %s4671_s30  ;;  %617 = vrot.lane.b32.xlu2 %v345_v31, %s4672_s19  ;;  %v637_v39 = vrot.slane %v345_v31, 4  ;;  %v397_v60 = vrot.slane %v322_v30, 4 }
 0x1bd   :  { %376 = vrot.lane.b32.xlu1 %v322_v30, %s4672_s19 }
 0x1c3   :  { %v4834_v32 = vpop.f32.mrf.mxu0  ;;  %v4836_v33 = vpop.f32.mrf.mxu1 }
 0x1c4   :  { %623 = vrot.lane.b32.xlu2 %v345_v31, %s4673_s1  ;;  %625 = vrot.lane.b32.xlu0 %v4836_v33, %s4673_s1 }
 0x1c5   :  { %378 = vrot.lane.b32.xlu1 %v4834_v32, %s4672_s19 }
 0x1cc   :  { %382 = vrot.lane.b32.xlu2 %v322_v30, %s4673_s1  ;;  %384 = vrot.lane.b32.xlu0 %v4834_v32, %s4673_s1 }
 0x1d4   :  { %388 = vrot.lane.b32.xlu2 %v322_v30, %s4671_s30 }
 0x1dc   :  { %619 = vrot.lane.b32.xlu2 %v4836_v33, %s4672_s19 }
 0x1e4   :  { %631 = vrot.lane.b32.xlu2 %v4836_v33, %s4671_s30 }
 0x1ec   :  { %390 = vrot.lane.b32.xlu2 %v4834_v32, %s4671_s30 }
 0x216   :  { %v618_v20 = vpop.permute.xlu2 %617 }
 0x217   :  { %v649_v44 = vrot.slane %v618_v20, 4 }
 0x21e   :  { %v624_v34 = vpop.permute.xlu2 %623 }
 0x21f   :  { %v635_v38 = vrot.slane %v624_v34, 4  ;;  %v638_v42 = vsel %vm395_vm7, %v624_v34, %v637_v39 }
 0x220   :  { %v646_v50 = vperm.slane %v638_v42, %v4853_v40 }
 0x221   :  { %v636_v41 = vsel %vm395_vm7, %v635_v38, %v345_v31  ;;  %v693_v31 = vrot.slane %v4836_v33, 4 }
 0x222   :  { %v642_v45 = vperm.slane %v636_v41, %v4853_v40  ;;  %v673_v63 = vrot.slane %v646_v50, 4 }
 0x224   :  { %v661_v59 = vrot.slane %v642_v45, 4 }
 0x226   :  { %v383_v35 = vpop.permute.xlu2 %382 }
 0x227   :  { %v394_v43 = vrot.slane %v383_v35, 4  ;;  %v398_v3 = vsel %vm395_vm7, %v383_v35, %v397_v60 }
 0x228   :  { %v406_v12 = vperm.slane %v398_v3, %v4853_v40 }
 0x229   :  { %v396_v55 = vsel %vm395_vm7, %v394_v43, %v322_v30 }
 0x22a   :  { %v402_v0 = vperm.slane %v396_v55, %v4853_v40  ;;  %v433_v26 = vrot.slane %v406_v12, 4 }
 0x22c   :  { %v421_v14 = vrot.slane %v402_v0, 4 }
 0x22e   :  { %v389_v46 = vpop.permute.xlu2 %388  ;;  %v630_v49 = vpop.permute.xlu0 %629 }
 0x22f   :  { %v407_v51 = vrot.slane %v389_v46, 4  ;;  %v377_v52 = vpop.permute.xlu1 %376  ;;  %v647_v53 = vrot.slane %v630_v49, 4  ;;  %v650_v54 = vsel %vm395_vm7, %v630_v49, %v649_v44 }
 0x230   :  { %v658_v56 = vperm.slane %v650_v54, %v4853_v40  ;;  %v409_v57 = vrot.slane %v377_v52, 4 }
 0x231   :  { %v648_v58 = vsel %vm395_vm7, %v647_v53, %v618_v20  ;;  %v408_v61 = vsel %vm395_vm7, %v407_v51, %v377_v52 }
 0x232   :  { %v654_v62 = vperm.slane %v648_v58, %v4853_v40  ;;  %v671_v2 = vrot.slane %v658_v56, 4  ;;  %v410_v6 = vsel %vm395_vm7, %v389_v46, %v409_v57  ;;  %v414_v7 = vperm.slane %v408_v61, %v4853_v40 }
 0x233   :  { %v674_v9 = vsel %vm395_vm7, %v658_v56, %v673_v63  ;;  %v418_v17 = vperm.slane %v410_v6, %v4853_v40 }
 0x234   :  { %v659_v4 = vrot.slane %v654_v62, 4  ;;  %v662_v5 = vsel %vm395_vm7, %v654_v62, %v661_v59  ;;  %v672_v16 = vsel %vm395_vm7, %v671_v2, %v646_v50  ;;  %v682_v19 = vperm.slane %v674_v9, %v4866_v1 }
 0x235   :  { %v670_v8 = vperm.slane %v662_v5, %v4866_v1  ;;  %v419_v21 = vrot.slane %v414_v7, 4  ;;  %v422_v22 = vsel %vm395_vm7, %v414_v7, %v421_v14  ;;  %v678_v24 = vperm.slane %v672_v16, %v4866_v1 }
 0x236   :  { %v660_v10 = vsel %vm395_vm7, %v659_v4, %v642_v45  ;;  %v620_v11 = vpop.permute.xlu2 %619  ;;  %v626_v25 = vpop.permute.xlu0 %625  ;;  %v689_v28 = vrot.slane %v682_v19, 4  ;;  %v430_v29 = vperm.slane %v422_v22, %v4866_v1  ;;  %v431_v15 = vrot.slane %v418_v17, 4 }
 0x237   :  { %v666_v18 = vperm.slane %v660_v10, %v4866_v1  ;;  %v685_v23 = vrot.slane %v670_v8, 4  ;;  %v420_v20 = vsel %vm395_vm7, %v419_v21, %v402_v0  ;;  %v434_v34 = vsel %vm395_vm7, %v418_v17, %v433_v26 }
 0x238   :  { %v705_v35 = vrot.slane %v620_v11, 4  ;;  %v691_v36 = vrot.slane %v626_v25, 4  ;;  %v687_v37 = vrot.slane %v678_v24, 4  ;;  %v690_v38 = vsel %vm395_vm7, 0.0, %v689_v28 }
 0x239   :  { %v686_v27 = vsel %vm395_vm7, 0.0, %v685_v23  ;;  %v683_v30 = vrot.slane %v666_v18, 4  ;;  %v694_v41 = vsel %vm395_vm7, %v626_v25, %v693_v31  ;;  %v4896_v49 = vperm.slane %v420_v20, %v4866_v1 }
 0x23a   :  { %v752_v39 = vrot.slane %v686_v27, 4  ;;  %v692_v43 = vsel %vm395_vm7, %v691_v36, %v4836_v33  ;;  %v702_v44 = vperm.slane %v694_v41, %v4853_v40  ;;  %v432_v50 = vsel %vm395_vm7, %v431_v15, %v406_v12 }
 0x23b   :  { %v684_v48 = vsel %vm395_vm7, 0.0, %v683_v30  ;;  %v442_v51 = vperm.slane %v434_v34, %v4866_v1  ;;  %v4901_v53 = vrot.slane %v430_v29, 4  ;;  %v763_v33 = vrot.slane %v690_v38, 4 }
 0x23c   :  { %v698_v54 = vperm.slane %v692_v43, %v4853_v40  ;;  %v688_v55 = vsel %vm395_vm7, 0.0, %v687_v37  ;;  %v729_v56 = vrot.slane %v702_v44, 4  ;;  %v753_v58 = vsel %vm395_vm7, %v752_v39, %v684_v48 }
 0x23d   :  { %v4908_v59 = vperm.slane %v432_v50, %v4866_v1  ;;  %v747_v61 = vsel %vm395_vm7, %v685_v23, %v666_v18  ;;  %v443_v62 = vrot.slane %v4896_v49, 4  ;;  %v4912_v63 = vrot.slane %v442_v51, 4  ;;  %v379_v23 = vpop.permute.xlu1 %378 }
 0x23e   :  { %v632_v42 = vpop.permute.xlu2 %631  ;;  %v4916_v2 = vperm.slane %v753_v58, %v4853_v40  ;;  %v446_v3 = vsel %vm395_vm7, 0.0, %v4901_v53  ;;  %v717_v4 = vrot.slane %v698_v54, 4  ;;  %v453_v5 = vrot.slane %v4834_v32, 4  ;;  %v385_v9 = vpop.permute.xlu0 %384 }
 0x23f   :  { %v703_v45 = vrot.slane %v632_v42, 4  ;;  %v706_v46 = vsel %vm395_vm7, %v632_v42, %v705_v35  ;;  %v764_v6 = vsel %vm395_vm7, %v763_v33, %v688_v55  ;;  %v758_v7 = vsel %vm395_vm7, %v689_v28, %v678_v24 }
 0x240   :  { %v714_v47 = vperm.slane %v706_v46, %v4853_v40  ;;  %v4924_v10 = vperm.slane %v747_v61, %v4853_v40  ;;  %v769_v17 = vrot.slane %v4916_v2, 4  ;;  %v444_v18 = vsel %vm395_vm7, 0.0, %v443_v62 }
 0x241   :  { %v704_v52 = vsel %vm395_vm7, %v703_v45, %v620_v11  ;;  %v4927_v11 = vperm.slane %v764_v6, %v4853_v40  ;;  %v447_v19 = vrot.slane %v4908_v59, 4  ;;  %v450_v21 = vsel %vm395_vm7, 0.0, %v4912_v63 }
 0x242   :  { %v710_v57 = vperm.slane %v704_v52, %v4853_v40  ;;  %v727_v60 = vrot.slane %v714_v47, 4  ;;  %v730_v0 = vsel %vm395_vm7, %v714_v47, %v729_v56  ;;  %v512_v22 = vrot.slane %v446_v3, 4 }
 0x243   :  { %v738_v16 = vperm.slane %v730_v0, %v4866_v1  ;;  %v451_v24 = vrot.slane %v385_v9, 4  ;;  %v4938_v25 = vperm.slane %v758_v7, %v4853_v40  ;;  %v770_v26 = vsel %vm395_vm7, %v769_v17, %v4924_v10 }
 0x244   :  { %v715_v8 = vrot.slane %v710_v57, 4  ;;  %v718_v12 = vsel %vm395_vm7, %v710_v57, %v717_v4  ;;  %v728_v14 = vsel %vm395_vm7, %v727_v60, %v702_v44  ;;  %v781_v27 = vrot.slane %v4927_v11, 4 }
 0x245   :  { %v726_v29 = vperm.slane %v718_v12, %v4866_v1  ;;  %v4945_v15 = vperm.slane %v728_v14, %v4866_v1  ;;  %v454_v30 = vsel %vm395_vm7, %v385_v9, %v453_v5  ;;  %v776_v31 = vperm.slane %v770_v26, %v4866_v1 }
 0x246   :  { %v391_v28 = vpop.permute.xlu2 %390  ;;  %v465_v20 = vrot.slane %v379_v23, 4  ;;  %v716_v34 = vsel %vm395_vm7, %v715_v8, %v698_v54  ;;  %v4950_v35 = vrot.slane %v738_v16, 4  ;;  %v782_v36 = vsel %vm395_vm7, %v781_v27, %v4938_v25 }
 0x247   :  { %v523_v37 = vrot.slane %v450_v21, 4  ;;  %v788_v38 = vperm.slane %v782_v36, %v4866_v1  ;;  %v463_v39 = vrot.slane %v391_v28, 4  ;;  %v795_v41 = vrot.slane %v776_v31, 4 }
 0x248   :  { %v452_v42 = vsel %vm395_vm7, %v451_v24, %v4834_v32  ;;  %v462_v43 = vperm.slane %v454_v30, %v4853_v40  ;;  %v466_v44 = vsel %vm395_vm7, %v391_v28, %v465_v20  ;;  %v513_v45 = vsel %vm395_vm7, %v512_v22, %v444_v18 }
 0x249   :  { %v4961_v46 = vperm.slane %v716_v34, %v4866_v1  ;;  %v4963_v47 = vrot.slane %v726_v29, 4  ;;  %v743_v48 = vrot.slane %v4945_v15, 4  ;;  %v793_v50 = vrot.slane %v788_v38, 4 }
 0x24a   :  { %v448_v51 = vsel %vm395_vm7, 0.0, %v447_v19  ;;  %v746_v52 = vsel %vm395_vm7, 0.0, %v4950_v35  ;;  %v796_v32 = vsel %vm395_vm7, %v788_v38, %v795_v41  ;;  %v464_v54 = vsel %vm395_vm7, %v463_v39, %v379_v23 }
 0x24b   :  { %v794_v33 = vsel %vm395_vm7, %v793_v50, %v776_v31  ;;  %v474_v55 = vperm.slane %v466_v44, %v4853_v40  ;;  %v4974_v56 = vperm.slane %v513_v45, %v4853_v40  ;;  %v458_v57 = vperm.slane %v452_v42, %v4853_v40 }
 0x24c   :  { %v489_v58 = vrot.slane %v462_v43, 4  ;;  %v771_v60 = vrot.slane %v4924_v10, 4  ;;  %4190 = vmatpush.xpose.msk.msra.mxu3 %vm1095_vm8, %v794_v33  ;;  %v739_v61 = vrot.slane %v4961_v46, 4  ;;  %v742_v62 = vsel %vm395_vm7, 0.0, %v4963_v47 }
 0x24d   :  { %v744_v0 = vsel %vm395_vm7, 0.0, %v743_v48  ;;  %v524_v3 = vsel %vm395_vm7, %v523_v37, %v448_v51  ;;  %v817_v4 = vrot.slane %v746_v52, 4  ;;  %v470_v5 = vperm.slane %v464_v54, %v4853_v40 }
 0x24e   :  { %v507_v6 = vsel %vm395_vm7, %v4901_v53, %v4896_v49  ;;  %v518_v7 = vsel %vm395_vm7, %v4912_v63, %v4908_v59  ;;  %v783_v8 = vrot.slane %v4938_v25, 4  ;;  %v490_v9 = vsel %vm395_vm7, %v474_v55, %v489_v58 }
 0x24f   :  { %v528_v10 = vperm.slane %v524_v3, %v4853_v40  ;;  %v529_v12 = vrot.slane %v4974_v56, 4  ;;  %v477_v14 = vrot.slane %v458_v57, 4  ;;  %v487_v16 = vrot.slane %v474_v55, 4 }
 0x250   :  { %4192 = vmatpush.xpose.msk.msrb.mxu3 %vm1095_vm8, %v796_v32  ;;  %v806_v17 = vrot.slane %v742_v62, 4  ;;  %v511_v18 = vperm.slane %v507_v6, %v4853_v40  ;;  %v522_v19 = vperm.slane %v518_v7, %v4853_v40  ;;  %v740_v53 = vsel %vm395_vm7, 0.0, %v739_v61 }
 0x251   :  { %v541_v49 = vrot.slane %v528_v10, 4  ;;  %v818_v59 = vsel %vm395_vm7, %v817_v4, %v744_v0  ;;  %v475_v63 = vrot.slane %v470_v5, 4  ;;  %v498_v21 = vperm.slane %v490_v9, %v4866_v1 }
 0x252   :  { %v530_v22 = vsel %vm395_vm7, %v529_v12, %v511_v18  ;;  %v772_v24 = vsel %vm395_vm7, %v4916_v2, %v771_v60  ;;  %v784_v25 = vsel %vm395_vm7, %v4927_v11, %v783_v8  ;;  %v478_v26 = vsel %vm395_vm7, %v470_v5, %v477_v14 }
 0x253   :  { %v542_v23 = vsel %vm395_vm7, %v541_v49, %v522_v19  ;;  %v488_v27 = vsel %vm395_vm7, %v487_v16, %v462_v43  ;;  %v792_v29 = vperm.slane %v784_v25, %v4866_v1  ;;  %v780_v30 = vperm.slane %v772_v24, %v4866_v1 }
 0x254   :  { %v548_v28 = vperm.slane %v542_v23, %v4866_v1  ;;  %v5013_v31 = vperm.slane %v818_v59, %v4853_v40  ;;  %v536_v20 = vperm.slane %v530_v22, %v4866_v1  ;;  %v486_v36 = vperm.slane %v478_v26, %v4866_v1 }
 0x255   :  { %v797_v2 = vrot.slane %v792_v29, 4  ;;  %v494_v11 = vperm.slane %v488_v27, %v4866_v1  ;;  %v505_v37 = vrot.slane %v498_v21, 4  ;;  %v807_v38 = vsel %vm395_vm7, %v806_v17, %v740_v53 }
 0x256   :  { %v553_v34 = vrot.slane %v548_v28, 4  ;;  %v476_v39 = vsel %vm395_vm7, %v475_v63, %v458_v57  ;;  %v812_v42 = vsel %vm395_vm7, %v4950_v35, %v4945_v15  ;;  %v543_v43 = vrot.slane %v522_v19, 4 }
 0x257   :  { %v798_v44 = vsel %vm395_vm7, %v797_v2, %v780_v30  ;;  %v811_v45 = vperm.slane %v807_v38, %v4853_v40  ;;  %v835_v48 = vrot.slane %v5013_v31, 4  ;;  %v482_v50 = vperm.slane %v476_v39, %v4866_v1 }
 0x258   :  { %v554_v41 = vsel %vm395_vm7, %v553_v34, %v536_v20  ;;  %v501_v51 = vrot.slane %v486_v36, 4  ;;  %v503_v52 = vrot.slane %v494_v11, 4  ;;  %v506_v32 = vsel %vm395_vm7, 0.0, %v505_v37 }
 0x259   :  { %4191 = vmatmul.msk.f32.vlgmr.msra.gmra.mxu3 %vm1095_vm8, %v554_v41  ;;  %v816_v33 = vperm.slane %v812_v42, %v4853_v40  ;;  %v555_v15 = vrot.slane %v536_v20, 4  ;;  %v799_v35 = vrot.slane %v780_v30, 4  ;;  %v544_v54 = vsel %vm395_vm7, %v528_v10, %v543_v43 }
 0x25a   :  { %4194 = vmatpush.xpose.msk.msra.mxu3 %vm1095_vm8, %v798_v44  ;;  %v801_v55 = vsel %vm395_vm7, %v4963_v47, %v4961_v46  ;;  %v577_v57 = vrot.slane %v506_v32, 4  ;;  %v823_v58 = vrot.slane %v811_v45, 4  ;;  %v499_v61 = vrot.slane %v482_v50, 4 }
 0x25b   :  { %v836_v60 = vsel %vm395_vm7, %v835_v48, %v816_v33  ;;  %v502_v62 = vsel %vm395_vm7, 0.0, %v501_v51  ;;  %v504_v0 = vsel %vm395_vm7, 0.0, %v503_v52  ;;  %v531_v3 = vrot.slane %v511_v18, 4 }
 0x25c   :  { %v556_v4 = vsel %vm395_vm7, %v548_v28, %v555_v15  ;;  %v552_v5 = vperm.slane %v544_v54, %v4866_v1  ;;  %v805_v6 = vperm.slane %v801_v55, %v4853_v40  ;;  %v800_v46 = vsel %vm395_vm7, %v792_v29, %v799_v35 }
 0x25d   :  { %v842_v47 = vperm.slane %v836_v60, %v4866_v1  ;;  %v566_v7 = vrot.slane %v502_v62, 4  ;;  %v578_v8 = vsel %vm395_vm7, %v577_v57, %v504_v0  ;;  %v500_v10 = vsel %vm395_vm7, 0.0, %v499_v61  ;;  %v202_v62 = vld [vmem:[#allocation5] sm:$0xff] }
 0x25e   :  { %v824_v9 = vsel %vm395_vm7, %v823_v58, %v805_v6  ;;  %v532_v12 = vsel %vm395_vm7, %v4974_v56, %v531_v3  ;;  %v557_v14 = vrot.slane %v552_v5, 4  ;;  %v582_v16 = vperm.slane %v578_v8, %v4853_v40 }
 0x25f   :  { %v830_v17 = vperm.slane %v824_v9, %v4866_v1  ;;  %v847_v18 = vrot.slane %v842_v47, 4  ;;  %v540_v19 = vperm.slane %v532_v12, %v4866_v1  ;;  %v567_v49 = vsel %vm395_vm7, %v566_v7, %v500_v10 }
 0x260   :  { %v572_v53 = vsel %vm395_vm7, %v505_v37, %v494_v11  ;;  %v571_v56 = vperm.slane %v567_v49, %v4853_v40  ;;  %v595_v21 = vrot.slane %v582_v16, 4  ;;  %v837_v22 = vrot.slane %v816_v33, 4 }
 0x261   :  { %4193 = vmatmul.msk.f32.vlgmr.msrb.gmra.mxu3 %vm1095_vm8, %v556_v4  ;;  %v558_v59 = vsel %vm395_vm7, %v557_v14, %v540_v19  ;;  %v848_v63 = vsel %vm395_vm7, %v847_v18, %v830_v17  ;;  %v576_v23 = vperm.slane %v572_v53, %v4853_v40  ;;  %v559_v24 = vrot.slane %v540_v19, 4 }
 0x262   :  { %4196 = vmatpush.xpose.msk.msrb.mxu3 %vm1095_vm8, %v800_v46  ;;  %v561_v25 = vsel %vm395_vm7, %v501_v51, %v482_v50  ;;  %v849_v26 = vrot.slane %v830_v17, 4  ;;  %v583_v27 = vrot.slane %v571_v56, 4  ;;  %v825_v29 = vrot.slane %v805_v6, 4 }
 0x263   :  { %v596_v28 = vsel %vm395_vm7, %v595_v21, %v576_v23  ;;  %v838_v30 = vsel %vm395_vm7, %v5013_v31, %v837_v22  ;;  %v565_v20 = vperm.slane %v561_v25, %v4853_v40  ;;  %v560_v34 = vsel %vm395_vm7, %v552_v5, %v559_v24 }
 0x264   :  { %v602_v2 = vperm.slane %v596_v28, %v4866_v1  ;;  %v850_v36 = vsel %vm395_vm7, %v842_v47, %v849_v26  ;;  %v846_v37 = vperm.slane %v838_v30, %v4866_v1  ;;  %v826_v38 = vsel %vm395_vm7, %v811_v45, %v825_v29  ;;  %v5100_v26 = vpop.f32.mrf.mxu2 }
 0x265   :  { %v584_v11 = vsel %vm395_vm7, %v583_v27, %v565_v20  ;;  %v834_v41 = vperm.slane %v826_v38, %v4866_v1  ;;  %v597_v44 = vrot.slane %v576_v23, 4  ;;  %v585_v52 = vrot.slane %v565_v20, 4 }
 0x266   :  { %v590_v31 = vperm.slane %v584_v11, %v4866_v1  ;;  %v607_v39 = vrot.slane %v602_v2, 4  ;;  %v851_v42 = vrot.slane %v846_v37, 4 }
 0x267   :  { %v853_v51 = vrot.slane %v834_v41, 4  ;;  %v598_v45 = vsel %vm395_vm7, %v582_v16, %v597_v44  ;;  %v586_v35 = vsel %vm395_vm7, %v571_v56, %v585_v52 }
 0x268   :  { %v608_v43 = vsel %vm395_vm7, %v607_v39, %v590_v31  ;;  %v852_v48 = vsel %vm395_vm7, %v851_v42, %v834_v41  ;;  %v609_v50 = vrot.slane %v590_v31, 4  ;;  %v606_v33 = vperm.slane %v598_v45, %v4866_v1 }
 0x269   :  { %4195 = vmatmul.msk.f32.vlgmr.msra.gmra.mxu3 %vm1095_vm8, %v558_v59  ;;  %v854_v15 = vsel %vm395_vm7, %v846_v37, %v853_v51  ;;  %v594_v54 = vperm.slane %v586_v35, %v4866_v1 }
 0x26a   :  { %4198 = vmatpush.xpose.msk.msra.mxu3 %vm1095_vm8, %v848_v63  ;;  %v610_v32 = vsel %vm395_vm7, %v602_v2, %v609_v50  ;;  %v611_v55 = vrot.slane %v606_v33, 4 }
 0x26b   :  { %v613_v58 = vrot.slane %v594_v54, 4 }
 0x26c   :  { %v612_v57 = vsel %vm395_vm7, %v611_v55, %v594_v54  ;;  %v5103_v20 = vpop.f32.mrf.mxu2 }
 0x26d   :  { %v614_v60 = vsel %vm395_vm7, %v606_v33, %v613_v58 }
 0x271   :  { %4197 = vmatmul.msk.f32.vlgmr.msrb.gmra.mxu3 %vm1095_vm8, %v560_v34  ;;  %v4269_v34 = vpack.i.bf16 %v5103_v20, %v5100_v26 }
 0x272   :  { %4200 = vmatpush.xpose.msk.msrb.mxu3 %vm1095_vm8, %v850_v36 }
 0x279   :  { %4199 = vmatmul.msk.f32.vlgmr.msra.gmra.mxu3 %vm1095_vm8, %v608_v43 }
 0x27a   :  { %4202 = vmatpush.xpose.msk.msra.mxu3 %vm1095_vm8, %v852_v48 }
 0x281   :  { %4201 = vmatmul.msk.f32.vlgmr.msrb.gmra.mxu3 %vm1095_vm8, %v610_v32 }
 0x282   :  { %4204 = vmatpush.xpose.msk.msrb.mxu3 %vm1095_vm8, %v854_v15 }
 0x289   :  { %4203 = vmatmul.msk.f32.vlgmr.msra.gmra.mxu3 %vm1095_vm8, %v612_v57 }
 0x291   :  { %4205 = vmatmul.msk.f32.vlgmr.msrb.gmra.mxu3 %vm1095_vm8, %v614_v60 }
 0x2dc   :  { %v1119_v61 = vpop.f32.mrf.mxu3 }
 0x2dd   :  { %v1304_v0 = vmul.f32 0.35355338, %v1119_v61 }
 0x2df   :  { %v1312_v3 = vadd.f32 %v1304_v0, %v202_v62 }
 0x2e1   :  { %v1320_v4 = vsel %vm1095_vm8, %v1312_v3, -inf }
 0x2e2   :  { %1321 = vmax.xlane.f32.xlu1 %v1320_v4 }
 0x2e4   :  { %v1145_v5 = vpop.f32.mrf.mxu3 }
 0x2e5   :  { %v1305_v6 = vmul.f32 0.35355338, %v1145_v5 }
 0x2e7   :  { %v1313_v46 = vadd.f32 %v1305_v6, %v202_v62 }
 0x2e9   :  { %v1323_v47 = vsel %vm1095_vm8, %v1313_v46, -inf }
 0x2ea   :  { %1324 = vmax.xlane.f32.xlu0 %v1323_v47 }
 0x2ec   :  { %v1171_v7 = vpop.f32.mrf.mxu3 }
 0x2ed   :  { %v1306_v8 = vmul.f32 0.35355338, %v1171_v7 }
 0x2ef   :  { %v1314_v9 = vadd.f32 %v1306_v8, %v202_v62 }
 0x2f1   :  { %v1326_v10 = vsel %vm1095_vm8, %v1314_v9, -inf }
 0x2f2   :  { %1327 = vmax.xlane.f32.xlu2 %v1326_v10 }
 0x2f4   :  { %v1197_v12 = vpop.f32.mrf.mxu3 }
 0x2f5   :  { %v1307_v14 = vmul.f32 0.35355338, %v1197_v12 }
 0x2f7   :  { %v1315_v16 = vadd.f32 %v1307_v14, %v202_v62 }
 0x2f9   :  { %v1329_v17 = vsel %vm1095_vm8, %v1315_v16, -inf }
 0x2fa   :  { %1330 = vmax.xlane.f32.xlu1 %v1329_v17  ;;  %v877_v17 = vrot.slane %v5100_v26, 4 }
 0x2fc   :  { %v1223_v18 = vpop.f32.mrf.mxu3 }
 0x2fd   :  { %v1308_v19 = vmul.f32 0.35355338, %v1223_v18  ;;  %v933_v18 = vrot.slane %v5103_v20, 4 }
 0x2ff   :  { %v1316_v49 = vadd.f32 %v1308_v19, %v202_v62 }
 0x301   :  { %v1332_v53 = vsel %vm1095_vm8, %v1316_v49, -inf }
 0x302   :  { %1333 = vmax.xlane.f32.xlu0 %v1332_v53 }
 0x304   :  { %v1249_v59 = vpop.f32.mrf.mxu3 }
 0x305   :  { %v1309_v63 = vmul.f32 0.35355338, %v1249_v59 }
 0x307   :  { %v1317_v56 = vadd.f32 %v1309_v63, %v202_v62 }
 0x309   :  { %v1335_v21 = vsel %vm1095_vm8, %v1317_v56, -inf }
 0x30a   :  { %1336 = vmax.xlane.f32.xlu2 %v1335_v21 }
 0x30c   :  { %v1275_v22 = vpop.f32.mrf.mxu3 }
 0x30d   :  { %v1310_v23 = vmul.f32 0.35355338, %v1275_v22 }
 0x30f   :  { %v1318_v24 = vadd.f32 %v1310_v23, %v202_v62 }
 0x311   :  { %v1338_v25 = vsel %vm1095_vm8, %v1318_v24, -inf }
 0x312   :  { %1339 = vmax.xlane.f32.xlu1 %v1338_v25 }
 0x314   :  { %v1301_v27 = vpop.f32.mrf.mxu3 }
 0x315   :  { %v1311_v28 = vmul.f32 0.35355338, %v1301_v27 }
 0x317   :  { %v1319_v29 = vadd.f32 %v1311_v28, %v202_v62 }
 0x319   :  { %v1341_v30 = vsel %vm1095_vm8, %v1319_v29, -inf }
 0x31a   :  { %1342 = vmax.xlane.f32.xlu0 %v1341_v30 }
 0x322   :  { %4270 = vrot.lane.b32.xlu2 %v4269_v34, %s4672_s19 }
 0x32b   :  { %4275 = vrot.lane.b32.xlu1 %v4269_v34, %s4673_s1 }
 0x32e   :  { %4280 = vrot.lane.b32.xlu0 %v4269_v34, %s4671_s30 }
 0x355   :  { %v1322_v2 = vpop.xlane.xlu1 %1321 }
 0x356   :  { %v1344_v36 = vsub.f32 %v1312_v3, %v1322_v2 }
 0x358   :  { %v1352_v11 = vmul.f32 1.442695, %v1344_v36 }
 0x35a   :  { %4320 = vpow2.f32 %v1352_v11 }
 0x35d   :  { %v1325_v37 = vpop.xlane.xlu0 %1324 }
 0x35e   :  { %v1345_v38 = vsub.f32 %v1313_v46, %v1325_v37 }
 0x360   :  { %v5110_v31 = vpop.eup %4320  ;;  %v1354_v39 = vmul.f32 1.442695, %v1345_v38 }
 0x361   :  { %v1368_v41 = vsel %vm1095_vm8, %v5110_v31, 0.0 }
 0x362   :  { %4322 = vpow2.f32 %v1354_v39  ;;  %1369 = vadd.xlane.f32.xlu2 %v1368_v41 }
 0x365   :  { %v1328_v42 = vpop.xlane.xlu2 %1327 }
 0x366   :  { %v1346_v43 = vsub.f32 %v1314_v9, %v1328_v42 }
 0x368   :  { %v5114_v44 = vpop.eup %4322  ;;  %v1356_v48 = vmul.f32 1.442695, %v1346_v43 }
 0x369   :  { %v1371_v50 = vsel %vm1095_vm8, %v5114_v44, 0.0 }
 0x36a   :  { %4324 = vpow2.f32 %v1356_v48  ;;  %1372 = vadd.xlane.f32.xlu0 %v1371_v50 }
 0x36d   :  { %v1331_v51 = vpop.xlane.xlu1 %1330 }
 0x36e   :  { %v1347_v52 = vsub.f32 %v1315_v16, %v1331_v51 }
 0x370   :  { %v5118_v45 = vpop.eup %4324  ;;  %v1358_v32 = vmul.f32 1.442695, %v1347_v52 }
 0x371   :  { %v1374_v33 = vsel %vm1095_vm8, %v5118_v45, 0.0 }
 0x372   :  { %4326 = vpow2.f32 %v1358_v32  ;;  %1375 = vadd.xlane.f32.xlu1 %v1374_v33 }
 0x375   :  { %v1334_v15 = vpop.xlane.xlu0 %1333 }
 0x376   :  { %v1348_v35 = vsub.f32 %v1316_v49, %v1334_v15 }
 0x378   :  { %v5122_v54 = vpop.eup %4326  ;;  %v1360_v55 = vmul.f32 1.442695, %v1348_v35 }
 0x379   :  { %v1377_v57 = vsel %vm1095_vm8, %v5122_v54, 0.0 }
 0x37a   :  { %4328 = vpow2.f32 %v1360_v55  ;;  %1378 = vadd.xlane.f32.xlu2 %v1377_v57 }
 0x37d   :  { %v1337_v58 = vpop.xlane.xlu2 %1336 }
 0x37e   :  { %v1349_v60 = vsub.f32 %v1317_v56, %v1337_v58 }
 0x380   :  { %v5126_v61 = vpop.eup %4328  ;;  %v1362_v62 = vmul.f32 1.442695, %v1349_v60 }
 0x381   :  { %v1380_v0 = vsel %vm1095_vm8, %v5126_v61, 0.0 }
 0x382   :  { %4330 = vpow2.f32 %v1362_v62  ;;  %1381 = vadd.xlane.f32.xlu0 %v1380_v0 }
 0x385   :  { %v1340_v3 = vpop.xlane.xlu1 %1339  ;;  %v4271_v16 = vpop.permute.xlu2 %4270 }
 0x386   :  { %v1350_v4 = vsub.f32 %v1318_v24, %v1340_v3  ;;  %v4273_v49 = vunpack.i.h.bf16 %v4271_v16  ;;  %v4272_v53 = vunpack.i.l.bf16 %v4271_v16 }
 0x388   :  { %v5130_v5 = vpop.eup %4330  ;;  %v1364_v6 = vmul.f32 1.442695, %v1350_v4  ;;  %v945_v30 = vrot.slane %v4273_v49, 4  ;;  %v889_v34 = vrot.slane %v4272_v53, 4 }
 0x389   :  { %v1383_v46 = vsel %vm1095_vm8, %v5130_v5, 0.0 }
 0x38a   :  { %4332 = vpow2.f32 %v1364_v6  ;;  %1384 = vadd.xlane.f32.xlu1 %v1383_v46 }
 0x38d   :  { %v1343_v47 = vpop.xlane.xlu0 %1342 }
 0x38e   :  { %v1351_v7 = vsub.f32 %v1319_v29, %v1343_v47 }
 0x390   :  { %v5134_v8 = vpop.eup %4332  ;;  %v1366_v9 = vmul.f32 1.442695, %v1351_v7 }
 0x391   :  { %v1386_v10 = vsel %vm1095_vm8, %v5134_v8, 0.0 }
 0x392   :  { %4334 = vpow2.f32 %v1366_v9  ;;  %1387 = vadd.xlane.f32.xlu2 %v1386_v10 }
 0x398   :  { %v5138_v12 = vpop.eup %4334 }
 0x399   :  { %v1389_v14 = vsel %vm1095_vm8, %v5138_v12, 0.0 }
 0x39a   :  { %1390 = vadd.xlane.f32.xlu0 %v1389_v14 }
 0x39d   :  { %v4276_v19 = vpop.permute.xlu1 %4275 }
 0x39e   :  { %v4278_v59 = vunpack.i.h.bf16 %v4276_v19  ;;  %v4277_v63 = vunpack.i.l.bf16 %v4276_v19 }
 0x3a0   :  { %v931_v56 = vrot.slane %v4278_v59, 4  ;;  %v934_v21 = vsel %vm395_vm7, %v4278_v59, %v933_v18  ;;  %v875_v22 = vrot.slane %v4277_v63, 4  ;;  %v878_v23 = vsel %vm395_vm7, %v4277_v63, %v877_v17  ;;  %v4281_v24 = vpop.permute.xlu0 %4280 }
 0x3a1   :  { %v942_v25 = vperm.slane %v934_v21, %v4853_v40  ;;  %v886_v27 = vperm.slane %v878_v23, %v4853_v40  ;;  %v4283_v28 = vunpack.i.h.bf16 %v4281_v24  ;;  %v4282_v29 = vunpack.i.l.bf16 %v4281_v24 }
 0x3a2   :  { %v932_v2 = vsel %vm395_vm7, %v931_v56, %v5103_v20  ;;  %v876_v36 = vsel %vm395_vm7, %v875_v22, %v5100_v26 }
 0x3a3   :  { %v938_v11 = vperm.slane %v932_v2, %v4853_v40  ;;  %v969_v37 = vrot.slane %v942_v25, 4  ;;  %v882_v38 = vperm.slane %v876_v36, %v4853_v40  ;;  %v913_v39 = vrot.slane %v886_v27, 4 }
 0x3a4   :  { %v943_v41 = vrot.slane %v4283_v28, 4  ;;  %v946_v42 = vsel %vm395_vm7, %v4283_v28, %v945_v30  ;;  %v887_v43 = vrot.slane %v4282_v29, 4  ;;  %v890_v48 = vsel %vm395_vm7, %v4282_v29, %v889_v34 }
 0x3a5   :  { %v957_v50 = vrot.slane %v938_v11, 4  ;;  %v954_v51 = vperm.slane %v946_v42, %v4853_v40  ;;  %v898_v20 = vperm.slane %v890_v48, %v4853_v40  ;;  %v901_v52 = vrot.slane %v882_v38, 4 }
 0x3a6   :  { %v944_v26 = vsel %vm395_vm7, %v943_v41, %v4273_v49  ;;  %v888_v32 = vsel %vm395_vm7, %v887_v43, %v4272_v53 }
 0x3a7   :  { %v950_v33 = vperm.slane %v944_v26, %v4853_v40  ;;  %v967_v15 = vrot.slane %v954_v51, 4  ;;  %v970_v35 = vsel %vm395_vm7, %v954_v51, %v969_v37  ;;  %v894_v55 = vperm.slane %v888_v32, %v4853_v40 }
 0x3a8   :  { %v978_v57 = vperm.slane %v970_v35, %v4866_v1  ;;  %v911_v58 = vrot.slane %v898_v20, 4  ;;  %v914_v60 = vsel %vm395_vm7, %v898_v20, %v913_v39 }
 0x3a9   :  { %v955_v62 = vrot.slane %v950_v33, 4  ;;  %v958_v0 = vsel %vm395_vm7, %v950_v33, %v957_v50  ;;  %v968_v3 = vsel %vm395_vm7, %v967_v15, %v942_v25  ;;  %v899_v4 = vrot.slane %v894_v55, 4 }
 0x3aa   :  { %v966_v6 = vperm.slane %v958_v0, %v4866_v1  ;;  %v974_v46 = vperm.slane %v968_v3, %v4866_v1  ;;  %v985_v47 = vrot.slane %v978_v57, 4  ;;  %v902_v7 = vsel %vm395_vm7, %v894_v55, %v901_v52 }
 0x3ab   :  { %v956_v9 = vsel %vm395_vm7, %v955_v62, %v938_v11  ;;  %v900_v10 = vsel %vm395_vm7, %v899_v4, %v882_v38  ;;  %v910_v14 = vperm.slane %v902_v7, %v4866_v1  ;;  %v912_v16 = vsel %vm395_vm7, %v911_v58, %v886_v27 }
 0x3ac   :  { %v962_v17 = vperm.slane %v956_v9, %v4866_v1  ;;  %v981_v18 = vrot.slane %v966_v6, 4  ;;  %v983_v19 = vrot.slane %v974_v46, 4  ;;  %v986_v49 = vsel %vm395_vm7, 0.0, %v985_v47 }
 0x3ad   :  { %v1052_v53 = vsel %vm395_vm7, %v985_v47, %v974_v46  ;;  %v1057_v59 = vrot.slane %v986_v49, 4  ;;  %v906_v63 = vperm.slane %v900_v10, %v4866_v1  ;;  %v918_v56 = vperm.slane %v912_v16, %v4866_v1 }
 0x3ae   :  { %v982_v21 = vsel %vm395_vm7, 0.0, %v981_v18  ;;  %v922_v22 = vperm.slane %v914_v60, %v4866_v1  ;;  %v925_v23 = vrot.slane %v910_v14, 4  ;;  %v979_v24 = vrot.slane %v962_v17, 4 }
 0x3af   :  { %v1046_v25 = vrot.slane %v982_v21, 4  ;;  %v927_v27 = vrot.slane %v918_v56, 4  ;;  %v923_v28 = vrot.slane %v906_v63, 4  ;;  %v984_v29 = vsel %vm395_vm7, 0.0, %v983_v19 }
 0x3b0   :  { %v929_v30 = vrot.slane %v922_v22, 4  ;;  %v926_v34 = vsel %vm395_vm7, 0.0, %v925_v23  ;;  %v987_v2 = vsel %vm395_vm7, %v925_v23, %v906_v63  ;;  %v980_v36 = vsel %vm395_vm7, 0.0, %v979_v24 }
 0x3b1   :  { %v924_v11 = vsel %vm395_vm7, 0.0, %v923_v28  ;;  %v928_v37 = vsel %vm395_vm7, 0.0, %v927_v27  ;;  %v991_v38 = vperm.slane %v987_v2, %v4853_v40  ;;  %v992_v39 = vrot.slane %v926_v34, 4 }
 0x3b2   :  { %v930_v41 = vsel %vm395_vm7, 0.0, %v929_v30  ;;  %v998_v42 = vsel %vm395_vm7, %v929_v30, %v918_v56  ;;  %v1041_v43 = vsel %vm395_vm7, %v981_v18, %v962_v17  ;;  %v1047_v48 = vsel %vm395_vm7, %v1046_v25, %v980_v36 }
 0x3b3   :  { %v1003_v50 = vrot.slane %v930_v41, 4  ;;  %v993_v51 = vsel %vm395_vm7, %v992_v39, %v924_v11  ;;  %v1002_v20 = vperm.slane %v998_v42, %v4853_v40  ;;  %v1011_v52 = vrot.slane %v991_v38, 4 }
 0x3b4   :  { %v997_v26 = vperm.slane %v993_v51, %v4853_v40  ;;  %v1045_v32 = vperm.slane %v1041_v43, %v4853_v40  ;;  %v1051_v33 = vperm.slane %v1047_v48, %v4853_v40  ;;  %v1056_v15 = vperm.slane %v1052_v53, %v4853_v40 }
 0x3b5   :  { %v1004_v35 = vsel %vm395_vm7, %v1003_v50, %v928_v37  ;;  %v1023_v55 = vrot.slane %v1002_v20, 4  ;;  %v1058_v57 = vsel %vm395_vm7, %v1057_v59, %v984_v29 }
 0x3b6   :  { %v1008_v58 = vperm.slane %v1004_v35, %v4853_v40  ;;  %v1009_v60 = vrot.slane %v997_v26, 4  ;;  %v1012_v62 = vsel %vm395_vm7, %v997_v26, %v1011_v52  ;;  %v1062_v0 = vperm.slane %v1058_v57, %v4853_v40 }
 0x3b7   :  { %v1020_v3 = vperm.slane %v1012_v62, %v4866_v1  ;;  %v1065_v4 = vrot.slane %v1045_v32, 4  ;;  %v1077_v6 = vrot.slane %v1056_v15, 4  ;;  %v1063_v46 = vrot.slane %v1051_v33, 4 }
 0x3b8   :  { %v1021_v47 = vrot.slane %v1008_v58, 4  ;;  %v1024_v7 = vsel %vm395_vm7, %v1008_v58, %v1023_v55  ;;  %v1010_v9 = vsel %vm395_vm7, %v1009_v60, %v991_v38  ;;  %v1075_v10 = vrot.slane %v1062_v0, 4 }
 0x3b9   :  { %v1032_v14 = vperm.slane %v1024_v7, %v4866_v1  ;;  %v1066_v16 = vsel %vm395_vm7, %v1051_v33, %v1065_v4  ;;  %v1078_v17 = vsel %vm395_vm7, %v1062_v0, %v1077_v6  ;;  %v1016_v18 = vperm.slane %v1010_v9, %v4866_v1 }
 0x3ba   :  { %v1074_v19 = vperm.slane %v1066_v16, %v4866_v1  ;;  %v1086_v49 = vperm.slane %v1078_v17, %v4866_v1  ;;  %v1022_v53 = vsel %vm395_vm7, %v1021_v47, %v1002_v20  ;;  %v1039_v59 = vrot.slane %v1020_v3, 4 }
 0x3bb   :  { %v1037_v63 = vrot.slane %v1032_v14, 4  ;;  %v1028_v56 = vperm.slane %v1022_v53, %v4866_v1  ;;  %v1064_v21 = vsel %vm395_vm7, %v1063_v46, %v1045_v32  ;;  %v1076_v22 = vsel %vm395_vm7, %v1075_v10, %v1056_v15 }
 0x3bc   :  { %v1091_v23 = vrot.slane %v1086_v49, 4  ;;  %v1040_v24 = vsel %vm395_vm7, %v1032_v14, %v1039_v59  ;;  %v1070_v25 = vperm.slane %v1064_v21, %v4866_v1  ;;  %v1082_v27 = vperm.slane %v1076_v22, %v4866_v1 }
 0x3bd   :  { %v1038_v28 = vsel %vm395_vm7, %v1037_v63, %v1020_v3  ;;  %v1033_v29 = vrot.slane %v1028_v56, 4  ;;  %1599 = vmatpush.msrb.mxu1 %v1040_v24  ;;  %v1093_v30 = vrot.slane %v1074_v19, 4  ;;  %v1035_v34 = vrot.slane %v1016_v18, 4 }
 0x3be   :  { %1576 = vmatpush.msrb.mxu0 %v1038_v28  ;;  %v1092_v2 = vsel %vm395_vm7, %v1091_v23, %v1074_v19  ;;  %v1087_v36 = vrot.slane %v1082_v27, 4  ;;  %v1089_v15 = vrot.slane %v1070_v25, 4 }
 0x3bf   :  { %v1034_v11 = vsel %vm395_vm7, %v1033_v29, %v1016_v18  ;;  %v1094_v37 = vsel %vm395_vm7, %v1086_v49, %v1093_v30  ;;  %v1036_v38 = vsel %vm395_vm7, %v1028_v56, %v1035_v34 }
 0x3c0   :  { %1668 = vmatpush.msra.mxu0 %v1092_v2  ;;  %1530 = vmatpush.msra.mxu3 %v1034_v11  ;;  %v1088_v39 = vsel %vm395_vm7, %v1087_v36, %v1070_v25  ;;  %v1090_v6 = vsel %vm395_vm7, %v1082_v27, %v1089_v15 }
 0x3c1   :  { %1691 = vmatpush.msra.mxu1 %v1094_v37  ;;  %1622 = vmatpush.msrb.mxu2 %v1088_v39 }
 0x3c2   :  { %1553 = vmatpush.msrb.mxu3 %v1036_v38 }
 0x3d5   :  { %v1370_v41 = vpop.xlane.xlu2 %1369 }
 0x3d6   :  { %4336 = vrcp.f32 %v1370_v41  ;;  %v1403_v51 = vand.u32 2147483648, %v1370_v41  ;;  %v1401_v52 = vand.u32 2147483647, %v1370_v41  ;;  %vm1397_vm10 = vweird.f32 %v1370_v41 }
 0x3d8   :  { %v1404_v33 = vor.u32 1.1754944e-38, %v1403_v51  ;;  %vm1402_vm12 = vcmp.eq.f32.partialorder %v1401_v52, 8.507059e+37 }
 0x3dc   :  { %v4337_v42 = vpop.eup %4336 }
 0x3dd   :  { %v1393_v43 = vmul.f32 %v4337_v42, %v1370_v41  ;;  %v1373_v48 = vpop.xlane.xlu0 %1372  ;;  %vm1398_vm9 = vweird.f32 %v4337_v42 }
 0x3de   :  { %4338 = vrcp.f32 %v1373_v48  ;;  %vm1399_vm11 = vmor %vm1397_vm10, %vm1398_vm9  ;;  %v1418_v0 = vand.u32 2147483648, %v1373_v48  ;;  %v1416_v4 = vand.u32 2147483647, %v1373_v48  ;;  %vm1412_vm14 = vweird.f32 %v1373_v48 }
 0x3df   :  { %v1394_v50 = vsub.f32 1.0, %v1393_v43 }
 0x3e0   :  { %v1419_v7 = vor.u32 1.1754944e-38, %v1418_v0  ;;  %vm1417_vm0 = vcmp.eq.f32.partialorder %v1416_v4, 8.507059e+37 }
 0x3e1   :  { %v1395_v20 = vmul.f32 %v4337_v42, %v1394_v50 }
 0x3e3   :  { %v1396_v26 = vadd.f32 %v4337_v42, %v1395_v20 }
 0x3e4   :  { %v4339_v32 = vpop.eup %4338 }
 0x3e5   :  { %v1400_v35 = vsel %vm1399_vm11, %v4337_v42, %v1396_v26  ;;  %v1408_v55 = vmul.f32 %v4339_v32, %v1373_v48  ;;  %v1376_v57 = vpop.xlane.xlu1 %1375  ;;  %vm1413_vm13 = vweird.f32 %v4339_v32 }
 0x3e6   :  { %v1405_v58 = vsel %vm1402_vm12, %v1404_v33, %v1400_v35  ;;  %4340 = vrcp.f32 %v1376_v57  ;;  %vm1414_vm15 = vmor %vm1412_vm14, %vm1413_vm13  ;;  %v1433_v19 = vand.u32 2147483648, %v1376_v57  ;;  %v1431_v49 = vand.u32 2147483647, %v1376_v57 }
 0x3e7   :  { %v1409_v60 = vsub.f32 1.0, %v1408_v55  ;;  %v1406_v62 = vmul.f32 %v5110_v31, %v1405_v58  ;;  %vm1427_vm2 = vweird.f32 %v1376_v57 }
 0x3e8   :  { %v1434_v63 = vor.u32 1.1754944e-38, %v1433_v19  ;;  %vm1432_vm4 = vcmp.eq.f32.partialorder %v1431_v49, 8.507059e+37 }
 0x3e9   :  { %v1410_v3 = vmul.f32 %v4339_v32, %v1409_v60  ;;  %4206 = vmatmul.msk.f32.vlgmr.msra.gmra.mxu3 %vm1095_vm8, %v1406_v62 }
 0x3ea   :  { %1645 = vmatpush.msra.mxu3 %v1090_v6 }
 0x3eb   :  { %v1411_v46 = vadd.f32 %v4339_v32, %v1410_v3 }
 0x3ec   :  { %v4341_v47 = vpop.eup %4340 }
 0x3ed   :  { %v1415_v9 = vsel %vm1414_vm15, %v4339_v32, %v1411_v46  ;;  %v1423_v10 = vmul.f32 %v4341_v47, %v1376_v57  ;;  %v1379_v14 = vpop.xlane.xlu2 %1378  ;;  %vm1428_vm1 = vweird.f32 %v4341_v47 }
 0x3ee   :  { %v1420_v16 = vsel %vm1417_vm0, %v1419_v7, %v1415_v9  ;;  %4342 = vrcp.f32 %v1379_v14  ;;  %vm1429_vm3 = vmor %vm1427_vm2, %vm1428_vm1  ;;  %v1448_v27 = vand.u32 2147483648, %v1379_v14  ;;  %v1446_v28 = vand.u32 2147483647, %v1379_v14 }
 0x3ef   :  { %v1424_v31 = vsub.f32 1.0, %v1423_v10  ;;  %v1421_v17 = vmul.f32 %v5114_v44, %v1420_v16  ;;  %vm1442_vm6 = vweird.f32 %v1379_v14 }
 0x3f0   :  { %v1449_v34 = vor.u32 1.1754944e-38, %v1448_v27  ;;  %vm1447_vm10 = vcmp.eq.f32.partialorder %v1446_v28, 8.507059e+37 }
 0x3f1   :  { %v1425_v18 = vmul.f32 %v4341_v47, %v1424_v31  ;;  %4207 = vmatmul.msk.f32.vlgmr.msrb.gmra.mxu3 %vm1095_vm8, %v1421_v17 }
 0x3f3   :  { %v1426_v53 = vadd.f32 %v4341_v47, %v1425_v18 }
 0x3f4   :  { %v4343_v59 = vpop.eup %4342 }
 0x3f5   :  { %v1438_v56 = vmul.f32 %v4343_v59, %v1379_v14  ;;  %v1382_v21 = vpop.xlane.xlu0 %1381  ;;  %v1430_v22 = vsel %vm1429_vm3, %v4341_v47, %v1426_v53  ;;  %vm1443_vm5 = vweird.f32 %v4343_v59 }
 0x3f6   :  { %4344 = vrcp.f32 %v1382_v21  ;;  %v1435_v24 = vsel %vm1432_vm4, %v1434_v63, %v1430_v22  ;;  %vm1444_vm9 = vmor %vm1442_vm6, %vm1443_vm5  ;;  %v1463_v41 = vand.u32 2147483648, %v1382_v21  ;;  %v1461_v42 = vand.u32 2147483647, %v1382_v21 }
 0x3f7   :  { %v1439_v23 = vsub.f32 1.0, %v1438_v56  ;;  %v1436_v44 = vmul.f32 %v5118_v45, %v1435_v24  ;;  %vm1457_vm12 = vweird.f32 %v1382_v21 }
 0x3f8   :  { %v1464_v50 = vor.u32 1.1754944e-38, %v1463_v41  ;;  %vm1462_vm14 = vcmp.eq.f32.partialorder %v1461_v42, 8.507059e+37 }
 0x3f9   :  { %v1440_v25 = vmul.f32 %v4343_v59, %v1439_v23  ;;  %4208 = vmatmul.msk.f32.vlgmr.msrb.gmra.mxu0 %vm1095_vm8, %v1436_v44 }
 0x3fb   :  { %v1441_v29 = vadd.f32 %v4343_v59, %v1440_v25 }
 0x3fc   :  { %v4345_v30 = vpop.eup %4344 }
 0x3fd   :  { %v1453_v2 = vmul.f32 %v4345_v30, %v1382_v21  ;;  %v1385_v36 = vpop.xlane.xlu1 %1384  ;;  %v1445_v11 = vsel %vm1444_vm9, %v4343_v59, %v1441_v29  ;;  %vm1458_vm11 = vweird.f32 %v4345_v30 }
 0x3fe   :  { %4346 = vrcp.f32 %v1385_v36  ;;  %v1450_v38 = vsel %vm1447_vm10, %v1449_v34, %v1445_v11  ;;  %vm1459_vm13 = vmor %vm1457_vm12, %vm1458_vm11  ;;  %v1478_v33 = vand.u32 2147483648, %v1385_v36  ;;  %v1476_v35 = vand.u32 2147483647, %v1385_v36 }
 0x3ff   :  { %v1454_v37 = vsub.f32 1.0, %v1453_v2  ;;  %v1451_v45 = vmul.f32 %v5122_v54, %v1450_v38  ;;  %vm1472_vm0 = vweird.f32 %v1385_v36 }
 0x400   :  { %v1479_v58 = vor.u32 1.1754944e-38, %v1478_v33  ;;  %vm1477_vm2 = vcmp.eq.f32.partialorder %v1476_v35, 8.507059e+37 }
 0x401   :  { %v1455_v39 = vmul.f32 %v4345_v30, %v1454_v37  ;;  %4209 = vmatmul.msk.f32.vlgmr.msrb.gmra.mxu1 %vm1095_vm8, %v1451_v45 }
 0x403   :  { %v1456_v43 = vadd.f32 %v4345_v30, %v1455_v39 }
 0x404   :  { %v4347_v48 = vpop.eup %4346 }
 0x405   :  { %v1468_v51 = vmul.f32 %v4347_v48, %v1385_v36  ;;  %v1388_v20 = vpop.xlane.xlu2 %1387  ;;  %v1460_v52 = vsel %vm1459_vm13, %v4345_v30, %v1456_v43  ;;  %vm1473_vm15 = vweird.f32 %v4347_v48  ;;  %vm1942_vm13 = vcmask 130048  }
 0x406   :  { %4348 = vrcp.f32 %v1388_v20  ;;  %v1465_v32 = vsel %vm1462_vm14, %v1464_v50, %v1460_v52  ;;  %vm1474_vm1 = vmor %vm1472_vm0, %vm1473_vm15  ;;  %v1491_v47 = vand.u32 2147483647, %v1388_v20  ;;  %vm1487_vm4 = vweird.f32 %v1388_v20 }
 0x407   :  { %v1469_v26 = vsub.f32 1.0, %v1468_v51  ;;  %v1466_v54 = vmul.f32 %v5126_v61, %v1465_v32  ;;  %v1493_v61 = vand.u32 2147483648, %v1388_v20  ;;  %vm1945_vm14 = vcmask 195584  }
 0x408   :  { %vm1492_vm6 = vcmp.eq.f32.partialorder %v1491_v47, 8.507059e+37  ;;  %vm1956_vm15 = vcmask 261120  }
 0x409   :  { %v1470_v15 = vmul.f32 %v4347_v48, %v1469_v26  ;;  %4210 = vmatmul.msk.f32.vlgmr.msrb.gmra.mxu2 %vm1095_vm8, %v1466_v54  ;;  %v1494_v10 = vor.u32 1.1754944e-38, %v1493_v61 }
 0x40b   :  { %v1471_v55 = vadd.f32 %v4347_v48, %v1470_v15 }
 0x40c   :  { %v4349_v57 = vpop.eup %4348 }
 0x40d   :  { %v1475_v60 = vsel %vm1474_vm1, %v4347_v48, %v1471_v55  ;;  %v1483_v62 = vmul.f32 %v4349_v57, %v1388_v20  ;;  %v1391_v0 = vpop.xlane.xlu0 %1390  ;;  %vm1488_vm3 = vweird.f32 %v4349_v57 }
 0x40e   :  { %v1480_v3 = vsel %vm1477_vm2, %v1479_v58, %v1475_v60  ;;  %4350 = vrcp.f32 %v1391_v0  ;;  %vm1489_vm5 = vmor %vm1487_vm4, %vm1488_vm3  ;;  %v1508_v19 = vand.u32 2147483648, %v1391_v0  ;;  %v1506_v49 = vand.u32 2147483647, %v1391_v0 }
 0x40f   :  { %v1484_v4 = vsub.f32 1.0, %v1483_v62  ;;  %v1481_v6 = vmul.f32 %v5130_v5, %v1480_v3  ;;  %vm1502_vm10 = vweird.f32 %v1391_v0 }
 0x410   :  { %v1509_v59 = vor.u32 1.1754944e-38, %v1508_v19  ;;  %vm1507_vm12 = vcmp.eq.f32.partialorder %v1506_v49, 8.507059e+37 }
 0x411   :  { %v1485_v46 = vmul.f32 %v4349_v57, %v1484_v4  ;;  %4211 = vmatmul.msk.f32.vlgmr.msra.gmra.mxu3 %vm1095_vm8, %v1481_v6 }
 0x413   :  { %v1486_v7 = vadd.f32 %v4349_v57, %v1485_v46 }
 0x414   :  { %v4351_v9 = vpop.eup %4350 }
 0x415   :  { %v1490_v14 = vsel %vm1489_vm5, %v4349_v57, %v1486_v7  ;;  %v1498_v16 = vmul.f32 %v4351_v9, %v1391_v0  ;;  %vm1503_vm9 = vweird.f32 %v4351_v9 }
 0x416   :  { %v1495_v31 = vsel %vm1492_vm6, %v1494_v10, %v1490_v14  ;;  %vm1504_vm11 = vmor %vm1502_vm10, %vm1503_vm9 }
 0x417   :  { %v1499_v17 = vsub.f32 1.0, %v1498_v16  ;;  %v1496_v18 = vmul.f32 %v5134_v8, %v1495_v31 }
 0x419   :  { %v1500_v5 = vmul.f32 %v4351_v9, %v1499_v17  ;;  %4212 = vmatmul.msk.f32.vlgmr.msra.gmra.mxu0 %vm1095_vm8, %v1496_v18 }
 0x41b   :  { %v1501_v53 = vadd.f32 %v4351_v9, %v1500_v5 }
 0x41d   :  { %v1505_v63 = vsel %vm1504_vm11, %v4351_v9, %v1501_v53 }
 0x41e   :  { %v1510_v56 = vsel %vm1507_vm12, %v1509_v59, %v1505_v63 }
 0x41f   :  { %v1511_v21 = vmul.f32 %v5138_v12, %v1510_v56 }
 0x421   :  { %4213 = vmatmul.msk.f32.vlgmr.msra.gmra.mxu1 %vm1095_vm8, %v1511_v21 }
 0x46c   :  { %v1532_v22 = vpop.f32.mrf.mxu3 }
 0x46d   :  { %v1698_v8 = vrot.slane %v1532_v22, 4 }
 0x474   :  { %v1555_v25 = vpop.f32.mrf.mxu3 }
 0x475   :  { %v1710_v29 = vrot.slane %v1555_v25, 4 }
 0x476   :  { %v1578_v23 = vpop.f32.mrf.mxu0 }
 0x477   :  { %v1696_v24 = vrot.slane %v1578_v23, 4  ;;  %v1699_v44 = vsel %vm395_vm7, %v1578_v23, %v1698_v8 }
 0x478   :  { %v1707_v28 = vperm.slane %v1699_v44, %v4853_v40 }
 0x479   :  { %v1697_v27 = vsel %vm395_vm7, %v1696_v24, %v1532_v22 }
 0x47a   :  { %v1703_v30 = vperm.slane %v1697_v27, %v4853_v40  ;;  %v1734_v36 = vrot.slane %v1707_v28, 4 }
 0x47c   :  { %v1722_v38 = vrot.slane %v1703_v30, 4 }
 0x47e   :  { %v1601_v34 = vpop.f32.mrf.mxu1 }
 0x47f   :  { %v1708_v2 = vrot.slane %v1601_v34, 4  ;;  %v1711_v12 = vsel %vm395_vm7, %v1601_v34, %v1710_v29 }
 0x480   :  { %v1719_v11 = vperm.slane %v1711_v12, %v4853_v40 }
 0x481   :  { %v1709_v37 = vsel %vm395_vm7, %v1708_v2, %v1555_v25 }
 0x482   :  { %v1715_v45 = vperm.slane %v1709_v37, %v4853_v40  ;;  %v1732_v39 = vrot.slane %v1719_v11, 4  ;;  %v1735_v41 = vsel %vm395_vm7, %v1719_v11, %v1734_v36 }
 0x483   :  { %v1743_v42 = vperm.slane %v1735_v41, %v4866_v1 }
 0x484   :  { %v1720_v43 = vrot.slane %v1715_v45, 4  ;;  %v1723_v48 = vsel %vm395_vm7, %v1715_v45, %v1722_v38  ;;  %v1733_v50 = vsel %vm395_vm7, %v1732_v39, %v1707_v28 }
 0x485   :  { %v1731_v51 = vperm.slane %v1723_v48, %v4866_v1  ;;  %v1739_v20 = vperm.slane %v1733_v50, %v4866_v1  ;;  %v1750_v52 = vrot.slane %v1743_v42, 4 }
 0x486   :  { %v1721_v26 = vsel %vm395_vm7, %v1720_v43, %v1703_v30 }
 0x487   :  { %v1727_v32 = vperm.slane %v1721_v26, %v4866_v1  ;;  %v1746_v33 = vrot.slane %v1731_v51, 4  ;;  %v1748_v54 = vrot.slane %v1739_v20, 4  ;;  %v1751_v15 = vsel %vm395_vm7, 0.0, %v1750_v52 }
 0x488   :  { %v1819_v35 = vsel %vm395_vm7, %v1750_v52, %v1739_v20  ;;  %v1824_v55 = vrot.slane %v1751_v15, 4 }
 0x489   :  { %v1747_v57 = vsel %vm395_vm7, 0.0, %v1746_v33  ;;  %v1749_v58 = vsel %vm395_vm7, 0.0, %v1748_v54  ;;  %v1823_v60 = vperm.slane %v1819_v35, %v4853_v40  ;;  %v1744_v62 = vrot.slane %v1727_v32, 4 }
 0x48a   :  { %v1813_v0 = vrot.slane %v1747_v57, 4  ;;  %v1808_v3 = vsel %vm395_vm7, %v1746_v33, %v1727_v32  ;;  %v1825_v4 = vsel %vm395_vm7, %v1824_v55, %v1749_v58 }
 0x48b   :  { %v1745_v6 = vsel %vm395_vm7, 0.0, %v1744_v62  ;;  %v1812_v61 = vperm.slane %v1808_v3, %v4853_v40  ;;  %v1829_v46 = vperm.slane %v1825_v4, %v4853_v40  ;;  %v1844_v47 = vrot.slane %v1823_v60, 4 }
 0x48c   :  { %v1814_v7 = vsel %vm395_vm7, %v1813_v0, %v1745_v6  ;;  %v1624_v22 = vpop.f32.mrf.mxu2 }
 0x48d   :  { %v1818_v9 = vperm.slane %v1814_v7, %v4853_v40  ;;  %v1832_v10 = vrot.slane %v1812_v61, 4  ;;  %v1845_v14 = vsel %vm395_vm7, %v1829_v46, %v1844_v47  ;;  %v1842_v31 = vrot.slane %v1829_v46, 4 }
 0x48e   :  { %v1853_v16 = vperm.slane %v1845_v14, %v4866_v1  ;;  %v1754_v27 = vrot.slane %v1624_v22, 4 }
 0x48f   :  { %v1833_v17 = vsel %vm395_vm7, %v1818_v9, %v1832_v10  ;;  %v1830_v18 = vrot.slane %v1818_v9, 4  ;;  %v1843_v49 = vsel %vm395_vm7, %v1842_v31, %v1823_v60 }
 0x490   :  { %v1841_v19 = vperm.slane %v1833_v17, %v4866_v1  ;;  %v1858_v5 = vrot.slane %v1853_v16, 4  ;;  %v1849_v59 = vperm.slane %v1843_v49, %v4866_v1 }
 0x491   :  { %v1831_v53 = vsel %vm395_vm7, %v1830_v18, %v1812_v61 }
 0x492   :  { %v1859_v63 = vsel %vm395_vm7, %v1858_v5, %v1841_v19  ;;  %v1860_v56 = vrot.slane %v1841_v19, 4  ;;  %v1837_v21 = vperm.slane %v1831_v53, %v4866_v1  ;;  %v1854_v23 = vrot.slane %v1849_v59, 4 }
 0x493   :  { %1926 = vrot.lane.b32.xlu2 %v1859_v63, %s4660_s28 }
 0x494   :  { %v1861_v8 = vsel %vm395_vm7, %v1853_v16, %v1860_v56  ;;  %v1856_v24 = vrot.slane %v1837_v21, 4  ;;  %v5283_v25 = vsel %vm395_vm7, %v1854_v23, %v1837_v21  ;;  %v1647_v34 = vpop.f32.mrf.mxu3 }
 0x495   :  { %1934 = vrot.lane.b32.xlu0 %v1861_v8, %s4658_s21  ;;  %v1766_v36 = vrot.slane %v1647_v34, 4 }
 0x496   :  { %v1670_v44 = vpop.f32.mrf.mxu0  ;;  %v1857_v29 = vsel %vm395_vm7, %v1849_v59, %v1856_v24 }
 0x497   :  { %v1752_v28 = vrot.slane %v1670_v44, 4  ;;  %1918 = vrot.lane.b32.xlu1 %v1857_v29, %s4664_s23  ;;  %v1755_v30 = vsel %vm395_vm7, %v1670_v44, %v1754_v27 }
 0x498   :  { %v1763_v12 = vperm.slane %v1755_v30, %v4853_v40 }
 0x499   :  { %v1753_v2 = vsel %vm395_vm7, %v1752_v28, %v1624_v22 }
 0x49a   :  { %v1759_v11 = vperm.slane %v1753_v2, %v4853_v40  ;;  %v1790_v39 = vrot.slane %v1763_v12, 4  ;;  %v1951_v2 = vld [vmem:[#allocation10 + $0x18] sm:$0xff] }
 0x49b   :  { %1975 = vmatpush.msra.mxu2 %v1951_v2 }
 0x49c   :  { %v1778_v43 = vrot.slane %v1759_v11, 4 }
 0x49e   :  { %v1693_v37 = vpop.f32.mrf.mxu1 }
 0x49f   :  { %v1764_v38 = vrot.slane %v1693_v37, 4  ;;  %v1767_v45 = vsel %vm395_vm7, %v1693_v37, %v1766_v36  ;;  %v1949_v36 = vld [vmem:[#allocation10 + $0x8] sm:$0xff] }
 0x4a0   :  { %v1775_v41 = vperm.slane %v1767_v45, %v4853_v40 }
 0x4a1   :  { %v1765_v42 = vsel %vm395_vm7, %v1764_v38, %v1647_v34 }
 0x4a2   :  { %v1771_v48 = vperm.slane %v1765_v42, %v4853_v40  ;;  %v1788_v50 = vrot.slane %v1775_v41, 4  ;;  %v1791_v51 = vsel %vm395_vm7, %v1775_v41, %v1790_v39 }
 0x4a3   :  { %v1799_v20 = vperm.slane %v1791_v51, %v4866_v1 }
 0x4a4   :  { %v1776_v52 = vrot.slane %v1771_v48, 4  ;;  %v1779_v26 = vsel %vm395_vm7, %v1771_v48, %v1778_v43  ;;  %v1789_v32 = vsel %vm395_vm7, %v1788_v50, %v1763_v12  ;;  %v1950_v12 = vld [vmem:[#allocation10 + $0x10] sm:$0xff] }
 0x4a5   :  { %v1787_v33 = vperm.slane %v1779_v26, %v4866_v1  ;;  %v1795_v54 = vperm.slane %v1789_v32, %v4866_v1  ;;  %v1806_v15 = vrot.slane %v1799_v20, 4  ;;  %1976 = vmatpush.msra.mxu2 %v1950_v12 }
 0x4a6   :  { %v1777_v35 = vsel %vm395_vm7, %v1776_v52, %v1759_v11  ;;  %v1948_v11 = vld [vmem:[#allocation10] sm:$0xff] }
 0x4a7   :  { %v1783_v55 = vperm.slane %v1777_v35, %v4866_v1  ;;  %v1802_v57 = vrot.slane %v1787_v33, 4  ;;  %v1804_v58 = vrot.slane %v1795_v54, 4  ;;  %v1807_v60 = vsel %vm395_vm7, 0.0, %v1806_v15  ;;  %1977 = vmatpush.msra.mxu2 %v1949_v36  ;;  %v4400_v33 = vld [vmem:[#allocation2] sm:$0xff]  ;;  %v4303_v36 = vld [vmem:[#allocation11] ss:$0 sm:$0xff] }
 0x4a8   :  { %v1873_v62 = vsel %vm395_vm7, %v1806_v15, %v1795_v54  ;;  %v1878_v0 = vrot.slane %v1807_v60, 4 }
 0x4a9   :  { %v1803_v3 = vsel %vm395_vm7, 0.0, %v1802_v57  ;;  %v1805_v4 = vsel %vm395_vm7, 0.0, %v1804_v58  ;;  %v1877_v6 = vperm.slane %v1873_v62, %v4853_v40  ;;  %v1800_v61 = vrot.slane %v1783_v55, 4  ;;  %1978 = vmatpush.msra.mxu2 %v1948_v11 }
 0x4aa   :  { %v1867_v46 = vrot.slane %v1803_v3, 4  ;;  %v1862_v47 = vsel %vm395_vm7, %v1802_v57, %v1783_v55  ;;  %v1879_v7 = vsel %vm395_vm7, %v1878_v0, %v1805_v4  ;;  %v4401_v55 = vld [vmem:[#allocation2 + $0x8] sm:$0xff]  ;;  %v2057_v4 = vld [vmem:[#allocation13 + $0x78] sm:$0xff] }
 0x4ab   :  { %v1801_v9 = vsel %vm395_vm7, 0.0, %v1800_v61  ;;  %v1866_v10 = vperm.slane %v1862_v47, %v4853_v40  ;;  %v1883_v14 = vperm.slane %v1879_v7, %v4853_v40  ;;  %v1898_v16 = vrot.slane %v1877_v6, 4  ;;  %2062 = vmatpush.msrb.mxu3 %v2057_v4 }
 0x4ac   :  { %v1868_v31 = vsel %vm395_vm7, %v1867_v46, %v1801_v9 }
 0x4ad   :  { %v1872_v17 = vperm.slane %v1868_v31, %v4853_v40  ;;  %v1886_v18 = vrot.slane %v1866_v10, 4  ;;  %v1899_v19 = vsel %vm395_vm7, %v1883_v14, %v1898_v16  ;;  %v1896_v5 = vrot.slane %v1883_v14, 4  ;;  %v2054_v14 = vld [vmem:[#allocation13 + $0x60] sm:$0xff]  ;;  %v2053_v16 = vld [vmem:[#allocation13 + $0x58] sm:$0xff]  ;;  %v2052_v31 = vld [vmem:[#allocation13 + $0x50] sm:$0xff] }
 0x4ae   :  { %v1907_v49 = vperm.slane %v1899_v19, %v4866_v1  ;;  %v2049_v19 = vld [vmem:[#allocation13 + $0x38] sm:$0xff] }
 0x4af   :  { %v1887_v53 = vsel %vm395_vm7, %v1872_v17, %v1886_v18  ;;  %v1884_v59 = vrot.slane %v1872_v17, 4  ;;  %v1897_v63 = vsel %vm395_vm7, %v1896_v5, %v1877_v6  ;;  %v2056_v6 = vld [vmem:[#allocation13 + $0x70] sm:$0xff]  ;;  %v2051_v17 = vld [vmem:[#allocation13 + $0x48] sm:$0xff]  ;;  %v2050_v18 = vld [vmem:[#allocation13 + $0x40] sm:$0xff] }
 0x4b0   :  { %v1895_v56 = vperm.slane %v1887_v53, %v4866_v1  ;;  %v1912_v21 = vrot.slane %v1907_v49, 4  ;;  %v1903_v22 = vperm.slane %v1897_v63, %v4866_v1  ;;  %2063 = vmatpush.msrb.mxu3 %v2056_v6  ;;  %v2048_v5 = vld [vmem:[#allocation13 + $0x30] sm:$0xff]  ;;  %v2046_v53 = vld [vmem:[#allocation13 + $0x20] sm:$0xff] }
 0x4b1   :  { %v1885_v23 = vsel %vm395_vm7, %v1884_v59, %v1866_v10  ;;  %v2055_v10 = vld [vmem:[#allocation13 + $0x68] sm:$0xff]  ;;  %v2045_v59 = vld [vmem:[#allocation13 + $0x18] sm:$0xff]  ;;  %v2044_v63 = vld [vmem:[#allocation13 + $0x10] sm:$0xff] }
 0x4b2   :  { %v1913_v8 = vsel %vm395_vm7, %v1912_v21, %v1895_v56  ;;  %v1914_v24 = vrot.slane %v1895_v56, 4  ;;  %v1891_v44 = vperm.slane %v1885_v23, %v4866_v1  ;;  %v1908_v27 = vrot.slane %v1903_v22, 4  ;;  %2064 = vmatpush.msrb.mxu3 %v2055_v10  ;;  %v2043_v56 = vld [vmem:[#allocation13 + $0x8] sm:$0xff]  ;;  %v2042_v23 = vld [vmem:[#allocation13] sm:$0xff] }
 0x4b3   :  { %1928 = vrot.lane.b32.xlu0 %v1913_v8, %s4660_s28  ;;  %v4304_v10 = vld [vmem:[%s5906_s10] ss:$0 sm:$0xff] }
 0x4b4   :  { %v1915_v28 = vsel %vm395_vm7, %v1907_v49, %v1914_v24  ;;  %v1910_v29 = vrot.slane %v1891_v44, 4  ;;  %v1909_v30 = vsel %vm395_vm7, %v1908_v27, %v1891_v44  ;;  %2065 = vmatpush.msrb.mxu3 %v2054_v14  ;;  %v2047_v49 = vld [vmem:[#allocation13 + $0x28] sm:$0xff] }
 0x4b5   :  { %1936 = vrot.lane.b32.xlu2 %v1915_v28, %s4658_s21 }
 0x4b6   :  { %v1911_v34 = vsel %vm395_vm7, %v1903_v22, %v1910_v29  ;;  %2066 = vmatpush.msrb.mxu3 %v2053_v16 }
 0x4b7   :  { %1920 = vrot.lane.b32.xlu1 %v1911_v34, %s4664_s23  ;;  %v4302_v34 = vld [vmem:[%s5903_s7] ss:$0 sm:$0xff] }
 0x4b8   :  { %2067 = vmatpush.msrb.mxu3 %v2052_v31 }
 0x4ba   :  { %2068 = vmatpush.msrb.mxu3 %v2051_v17 }
 0x4bc   :  { %2069 = vmatpush.msrb.mxu3 %v2050_v18 }
 0x4be   :  { %2070 = vmatpush.msrb.mxu3 %v2049_v19  ;;  %v4305_v19 = vld [vmem:[%s5908_s12] ss:$0 sm:$0xff] }
 0x4c0   :  { %2071 = vmatpush.msrb.mxu3 %v2048_v5 }
 0x4c2   :  { %2072 = vmatpush.msrb.mxu3 %v2047_v49 }
 0x4c4   :  { %2073 = vmatpush.msrb.mxu3 %v2046_v53 }
 0x4c6   :  { %2074 = vmatpush.msrb.mxu3 %v2045_v59 }
 0x4c8   :  { %2075 = vmatpush.msrb.mxu3 %v2044_v63 }
 0x4ca   :  { %2076 = vmatpush.msrb.mxu3 %v2043_v56 }
 0x4cc   :  { %2077 = vmatpush.msrb.mxu3 %v2042_v23 }
 0x4ed   :  { %v1927_v38 = vpop.permute.xlu2 %1926 }
 0x507   :  { %v1935_v39 = vpop.permute.xlu0 %1934 }
 0x509   :  { %v1919_v37 = vpop.permute.xlu1 %1918 }
 0x50a   :  { %v1940_v45 = vsel %vm1095_vm8, %v5283_v25, %v1919_v37  ;;  %v4301_v25 = vld [vmem:[%s5902_s6] ss:$0 sm:$0xff] }
 0x50b   :  { %v1943_v41 = vsel %vm1942_vm13, %v1940_v45, %v1927_v38  ;;  %v2102_v38 = vld [vmem:[#allocation14 + $0x78] sm:$0xff]  ;;  %v2101_v45 = vld [vmem:[#allocation14 + $0x70] sm:$0xff] }
 0x50c   :  { %v1946_v42 = vsel %vm1945_vm14, %v1943_v41, %v1935_v39  ;;  %2107 = vmatpush.msrb.mxu0 %v2102_v38  ;;  %v2100_v39 = vld [vmem:[#allocation14 + $0x68] sm:$0xff] }
 0x50d   :  { %4214 = vmatmul.msk.f32.vlgmr.msra.gmra.mxu2 %vm1956_vm15, %v1946_v42  ;;  %v2230_v38 = vld [vmem:[#allocation8 + $0x2c8] sm:$0xff] }
 0x50e   :  { %2108 = vmatpush.msrb.mxu0 %v2101_v45  ;;  %v2225_v45 = vld [vmem:[#allocation8 + $0x2a0] sm:$0xff] }
 0x50f   :  { %v1937_v51 = vpop.permute.xlu2 %1936 }
 0x510   :  { %2109 = vmatpush.msrb.mxu0 %v2100_v39  ;;  %v2226_v39 = vld [vmem:[#allocation8 + $0x2a8] sm:$0xff] }
 0x525   :  { %v1929_v48 = vpop.permute.xlu0 %1928 }
 0x529   :  { %v1921_v43 = vpop.permute.xlu1 %1920 }
 0x52a   :  { %v1941_v50 = vsel %vm1095_vm8, %v1909_v30, %v1921_v43  ;;  %v2099_v43 = vld [vmem:[#allocation14 + $0x60] sm:$0xff] }
 0x52b   :  { %v1944_v20 = vsel %vm1942_vm13, %v1941_v50, %v1929_v48  ;;  %v2098_v50 = vld [vmem:[#allocation14 + $0x58] sm:$0xff]  ;;  %2110 = vmatpush.msrb.mxu0 %v2099_v43  ;;  %v2223_v43 = vld [vmem:[#allocation8 + $0x290] sm:$0xff] }
 0x52c   :  { %v1947_v52 = vsel %vm1945_vm14, %v1944_v20, %v1937_v51  ;;  %v2097_v51 = vld [vmem:[#allocation14 + $0x50] sm:$0xff]  ;;  %v2096_v20 = vld [vmem:[#allocation14 + $0x48] sm:$0xff] }
 0x52d   :  { %4215 = vmatmul.msk.f32.gmra.mxu2 %vm1956_vm15, %v1947_v52  ;;  %2111 = vmatpush.msrb.mxu0 %v2098_v50  ;;  %v2095_v52 = vld [vmem:[#allocation14 + $0x40] sm:$0xff]  ;;  %v2219_v50 = vld [vmem:[#allocation8 + $0x270] sm:$0xff] }
 0x52f   :  { %2112 = vmatpush.msrb.mxu0 %v2097_v51  ;;  %v2220_v51 = vld [vmem:[#allocation8 + $0x278] sm:$0xff] }
 0x531   :  { %2113 = vmatpush.msrb.mxu0 %v2096_v20  ;;  %v2221_v20 = vld [vmem:[#allocation8 + $0x280] sm:$0xff] }
 0x533   :  { %2114 = vmatpush.msrb.mxu0 %v2095_v52  ;;  %v2216_v52 = vld [vmem:[#allocation8 + $0x258] sm:$0xff] }
 0x590   :  { %v1980_v26 = vpop.f32.mrf.mxu2 }
 0x591   :  { %v1981_v32 = vadd.f32 %v4301_v25, %v1980_v26  ;;  %v2094_v26 = vld [vmem:[#allocation14 + $0x38] sm:$0xff] }
 0x592   :  { %2115 = vmatpush.msrb.mxu0 %v2094_v26  ;;  %v2218_v26 = vld [vmem:[#allocation8 + $0x268] sm:$0xff] }
 0x593   :  { %v5342_v54 = vadd.f32 %v4400_v33, %v1981_v32  ;;  %v2093_v33 = vld [vmem:[#allocation14 + $0x30] sm:$0xff] }
 0x594   :  { %2116 = vmatpush.msrb.mxu0 %v2093_v33  ;;  %v2214_v33 = vld [vmem:[#allocation8 + $0x248] sm:$0xff] }
 0x595   :  { %1990 = vadd.xlane.f32.xlu1 %v5342_v54 }
 0x5b0   :  { %v1983_v15 = vpop.f32.mrf.mxu2 }
 0x5b1   :  { %v1984_v35 = vadd.f32 %v4301_v25, %v1983_v15 }
 0x5b3   :  { %v5345_v57 = vadd.f32 %v4401_v55, %v1984_v35  ;;  %v2092_v35 = vld [vmem:[#allocation14 + $0x28] sm:$0xff] }
 0x5b4   :  { %2117 = vmatpush.msrb.mxu0 %v2092_v35  ;;  %v2210_v35 = vld [vmem:[#allocation8 + $0x228] sm:$0xff] }
 0x5b5   :  { %1992 = vadd.xlane.f32.xlu0 %v5345_v57 }
 0x608   :  { %v1991_v58 = vpop.xlane.xlu1 %1990 }
 0x609   :  { %v1994_v60 = vmul.f32 0.03125, %v1991_v58  ;;  %v2091_v58 = vld [vmem:[#allocation14 + $0x20] sm:$0xff] }
 0x60a   :  { %2118 = vmatpush.msrb.mxu0 %v2091_v58  ;;  %v2212_v58 = vld [vmem:[#allocation8 + $0x238] sm:$0xff] }
 0x60b   :  { %v1996_v62 = vsub.f32 %v5342_v54, %v1994_v60 }
 0x60d   :  { %v1998_v0 = vmul.f32 %v4814_v13, %v1996_v62  ;;  %v2090_v62 = vld [vmem:[#allocation14 + $0x18] sm:$0xff] }
 0x60e   :  { %2119 = vmatpush.msrb.mxu0 %v2090_v62  ;;  %v2208_v62 = vld [vmem:[#allocation8 + $0x218] sm:$0xff] }
 0x60f   :  { %v2000_v3 = vmul.f32 %v1998_v0, %v1998_v0 }
 0x611   :  { %2002 = vadd.xlane.f32.xlu2 %v2000_v3 }
 0x628   :  { %v1993_v61 = vpop.xlane.xlu0 %1992 }
 0x629   :  { %v1995_v46 = vmul.f32 0.03125, %v1993_v61 }
 0x62b   :  { %v1997_v47 = vsub.f32 %v5345_v57, %v1995_v46  ;;  %v2089_v46 = vld [vmem:[#allocation14 + $0x10] sm:$0xff] }
 0x62c   :  { %2120 = vmatpush.msrb.mxu0 %v2089_v46  ;;  %v2202_v46 = vld [vmem:[#allocation8 + $0x1e8] sm:$0xff] }
 0x62d   :  { %v5352_v7 = vmul.f32 %v4814_v13, %v1997_v47  ;;  %v2088_v47 = vld [vmem:[#allocation14 + $0x8] sm:$0xff] }
 0x62e   :  { %2121 = vmatpush.msrb.mxu0 %v2088_v47  ;;  %v2203_v47 = vld [vmem:[#allocation8 + $0x1f0] sm:$0xff] }
 0x62f   :  { %v2001_v9 = vmul.f32 %v5352_v7, %v5352_v7 }
 0x631   :  { %2004 = vadd.xlane.f32.xlu1 %v2001_v9  ;;  %v2087_v9 = vld [vmem:[#allocation14] sm:$0xff] }
 0x632   :  { %2122 = vmatpush.msrb.mxu0 %v2087_v9  ;;  %v2198_v9 = vld [vmem:[#allocation8 + $0x1c8] sm:$0xff] }
 0x684   :  { %v2003_v21 = vpop.xlane.xlu2 %2002 }
 0x685   :  { %v2006_v22 = vmul.f32 0.03125, %v2003_v21 }
 0x687   :  { %v2008_v8 = vadd.f32 1e-05, %v2006_v22 }
 0x689   :  { %4352 = vrsqrt.f32 %v2008_v8  ;;  %vm2016_vm1 = vweird.f32 %v2008_v8 }
 0x68f   :  { %v4353_v24 = vpop.eup %4352 }
 0x690   :  { %v2011_v44 = vmul.f32 %v4353_v24, %v2008_v8  ;;  %vm2017_vm0 = vweird.f32 %v4353_v24 }
 0x691   :  { %vm2018_vm2 = vmor %vm2016_vm1, %vm2017_vm0 }
 0x692   :  { %v2012_v27 = vmul.f32 %v4353_v24, %v2011_v44  ;;  %v2235_v44 = vld [vmem:[#allocation8 + $0x2f0] sm:$0xff] }
 0x693   :  { %2260 = vmatpush.msrb.mxu2 %v2235_v44 }
 0x694   :  { %v2013_v28 = vmul.f32 0.5, %v2012_v27  ;;  %v2236_v27 = vld [vmem:[#allocation8 + $0x2f8] sm:$0xff] }
 0x695   :  { %2283 = vmatpush.msra.mxu3 %v2236_v27 }
 0x696   :  { %v2014_v29 = vsub.f32 1.5, %v2013_v28  ;;  %v2231_v28 = vld [vmem:[#allocation8 + $0x2d0] sm:$0xff] }
 0x698   :  { %v2015_v30 = vmul.f32 %v4353_v24, %v2014_v29  ;;  %v2233_v29 = vld [vmem:[#allocation8 + $0x2e0] sm:$0xff] }
 0x699   :  { %2284 = vmatpush.msra.mxu3 %v2233_v29 }
 0x69a   :  { %v2019_v2 = vsel %vm2018_vm2, %v4353_v24, %v2015_v30  ;;  %v2234_v24 = vld [vmem:[#allocation8 + $0x2e8] sm:$0xff] }
 0x69b   :  { %v2030_v12 = vmul.f32 %v2019_v2, %v1998_v0  ;;  %2237 = vmatpush.msrb.mxu1 %v2234_v24  ;;  %2285 = vmatpush.msra.mxu3 %v2230_v38 }
 0x69d   :  { %v2035_v11 = vmul.f32 %v4302_v34, %v2030_v12  ;;  %2238 = vmatpush.msrb.mxu1 %v2231_v28 }
 0x69f   :  { %v2040_v37 = vadd.f32 %v4303_v36, %v2035_v11  ;;  %v2228_v11 = vld [vmem:[#allocation8 + $0x2b8] sm:$0xff] }
 0x6a0   :  { %2239 = vmatpush.msrb.mxu1 %v2228_v11 }
 0x6a1   :  { %2078 = vmatmul.f32.vlgmr.msrb.gmra.mxu3 %v2040_v37  ;;  %v2229_v37 = vld [vmem:[#allocation8 + $0x2c0] sm:$0xff] }
 0x6a2   :  { %2240 = vmatpush.msrb.mxu1 %v2225_v45 }
 0x6a4   :  { %v2005_v41 = vpop.xlane.xlu1 %2004 }
 0x6a5   :  { %v2007_v42 = vmul.f32 0.03125, %v2005_v41  ;;  %v2227_v41 = vld [vmem:[#allocation8 + $0x2b0] sm:$0xff] }
 0x6a6   :  { %2286 = vmatpush.msra.mxu3 %v2227_v41 }
 0x6a7   :  { %v2009_v48 = vadd.f32 1e-05, %v2007_v42  ;;  %v2222_v42 = vld [vmem:[#allocation8 + $0x288] sm:$0xff] }
 0x6a8   :  { %2241 = vmatpush.msrb.mxu1 %v2222_v42 }
 0x6a9   :  { %4354 = vrsqrt.f32 %v2009_v48  ;;  %vm2026_vm4 = vweird.f32 %v2009_v48 }
 0x6aa   :  { %2242 = vmatpush.msrb.mxu1 %v2219_v50 }
 0x6ac   :  { %2243 = vmatpush.msrb.mxu1 %v2216_v52 }
 0x6af   :  { %v4355_v25 = vpop.eup %4354 }
 0x6b0   :  { %v2021_v32 = vmul.f32 %v4355_v25, %v2009_v48  ;;  %vm2027_vm3 = vweird.f32 %v4355_v25  ;;  %v2224_v48 = vld [vmem:[#allocation8 + $0x298] sm:$0xff] }
 0x6b1   :  { %vm2028_vm5 = vmor %vm2026_vm4, %vm2027_vm3  ;;  %2287 = vmatpush.msra.mxu3 %v2224_v48 }
 0x6b2   :  { %v2022_v15 = vmul.f32 %v4355_v25, %v2021_v32  ;;  %v2213_v32 = vld [vmem:[#allocation8 + $0x240] sm:$0xff] }
 0x6b3   :  { %2288 = vmatpush.msra.mxu3 %v2221_v20  ;;  %2244 = vmatpush.msrb.mxu1 %v2213_v32 }
 0x6b4   :  { %v2023_v55 = vmul.f32 0.5, %v2022_v15  ;;  %v2215_v15 = vld [vmem:[#allocation8 + $0x250] sm:$0xff] }
 0x6b5   :  { %2289 = vmatpush.msra.mxu3 %v2218_v26  ;;  %2245 = vmatpush.msrb.mxu1 %v2210_v35 }
 0x6b6   :  { %v2024_v60 = vsub.f32 1.5, %v2023_v55  ;;  %v2211_v55 = vld [vmem:[#allocation8 + $0x230] sm:$0xff] }
 0x6b7   :  { %2290 = vmatpush.msra.mxu3 %v2215_v15 }
 0x6b8   :  { %v2025_v0 = vmul.f32 %v4355_v25, %v2024_v60  ;;  %v2207_v60 = vld [vmem:[#allocation8 + $0x210] sm:$0xff] }
 0x6b9   :  { %2291 = vmatpush.msra.mxu3 %v2212_v58  ;;  %2246 = vmatpush.msrb.mxu1 %v2207_v60 }
 0x6ba   :  { %v2029_v3 = vsel %vm2028_vm5, %v4355_v25, %v2025_v0  ;;  %v2217_v25 = vld [vmem:[#allocation8 + $0x260] sm:$0xff] }
 0x6bb   :  { %v2031_v4 = vmul.f32 %v2029_v3, %v5352_v7  ;;  %v2209_v0 = vld [vmem:[#allocation8 + $0x220] sm:$0xff]  ;;  %v2204_v3 = vld [vmem:[#allocation8 + $0x1f8] sm:$0xff] }
 0x6bc   :  { %2292 = vmatpush.msra.mxu3 %v2209_v0  ;;  %2247 = vmatpush.msrb.mxu1 %v2204_v3 }
 0x6bd   :  { %v2036_v6 = vmul.f32 %v4302_v34, %v2031_v4  ;;  %v2205_v4 = vld [vmem:[#allocation8 + $0x200] sm:$0xff] }
 0x6bf   :  { %v2041_v61 = vadd.f32 %v4303_v36, %v2036_v6  ;;  %v2206_v6 = vld [vmem:[#allocation8 + $0x208] sm:$0xff] }
 0x6c0   :  { %2293 = vmatpush.msra.mxu3 %v2206_v6 }
 0x6c1   :  { %2081 = vmatmul.f32.gmra.mxu3 %v2041_v61  ;;  %v2201_v61 = vld [vmem:[#allocation8 + $0x1e0] sm:$0xff] }
 0x6c2   :  { %2248 = vmatpush.msrb.mxu1 %v2201_v61  ;;  %2294 = vmatpush.msra.mxu3 %v2203_v47 }
 0x6c4   :  { %2249 = vmatpush.msrb.mxu1 %v2198_v9 }
 0x724   :  { %v2079_v14 = vpop.f32.mrf.mxu3 }
 0x725   :  { %v2080_v16 = vadd.f32 %v4304_v10, %v2079_v14  ;;  %v2200_v14 = vld [vmem:[#allocation8 + $0x1d8] sm:$0xff] }
 0x726   :  { %2295 = vmatpush.msra.mxu3 %v2200_v14 }
 0x727   :  { %v2085_v31 = vmax.f32 %v2080_v16, 0.0  ;;  %v2195_v16 = vld [vmem:[#allocation8 + $0x1b0] sm:$0xff] }
 0x728   :  { %2250 = vmatpush.msrb.mxu1 %v2195_v16 }
 0x729   :  { %2123 = vmatmul.f32.vlgmr.msrb.gmra.mxu0 %v2085_v31  ;;  %v2196_v31 = vld [vmem:[#allocation8 + $0x1b8] sm:$0xff] }
 0x744   :  { %v2082_v17 = vpop.f32.mrf.mxu3 }
 0x745   :  { %v2083_v18 = vadd.f32 %v4304_v10, %v2082_v17  ;;  %v2199_v10 = vld [vmem:[#allocation8 + $0x1d0] sm:$0xff]  ;;  %v2197_v17 = vld [vmem:[#allocation8 + $0x1c0] sm:$0xff] }
 0x746   :  { %2296 = vmatpush.msra.mxu3 %v2197_v17 }
 0x747   :  { %v2086_v7 = vmax.f32 %v2083_v18, 0.0  ;;  %v2192_v18 = vld [vmem:[#allocation8 + $0x198] sm:$0xff] }
 0x748   :  { %2251 = vmatpush.msrb.mxu1 %v2192_v18 }
 0x749   :  { %2126 = vmatmul.f32.gmra.mxu0 %v2086_v7  ;;  %v2193_v7 = vld [vmem:[#allocation8 + $0x1a0] sm:$0xff] }
 0x7a6   :  { %v2124_v5 = vpop.f32.mrf.mxu0 }
 0x7a7   :  { %v2125_v49 = vadd.f32 %v4305_v19, %v2124_v5  ;;  %v2194_v5 = vld [vmem:[#allocation8 + $0x1a8] sm:$0xff] }
 0x7a8   :  { %2297 = vmatpush.msra.mxu3 %v2194_v5 }
 0x7a9   :  { %v5367_v53 = vadd.f32 %v2125_v49, %v5342_v54 }
 0x7ab   :  { %2136 = vadd.xlane.f32.xlu0 %v5367_v53 }
 0x7c6   :  { %v2127_v59 = vpop.f32.mrf.mxu0 }
 0x7c7   :  { %v2128_v63 = vadd.f32 %v4305_v19, %v2127_v59  ;;  %v2189_v59 = vld [vmem:[#allocation8 + $0x180] sm:$0xff] }
 0x7c8   :  { %2252 = vmatpush.msrb.mxu1 %v2189_v59 }
 0x7c9   :  { %v5371_v56 = vadd.f32 %v2128_v63, %v5345_v57  ;;  %v2232_v57 = vld [vmem:[#allocation8 + $0x2d8] sm:$0xff]  ;;  %v2190_v63 = vld [vmem:[#allocation8 + $0x188] sm:$0xff] }
 0x7ca   :  { %2261 = vmatpush.msrb.mxu2 %v2232_v57  ;;  %v4306_v57 = vld [vmem:[#allocation7 + $0x1] ss:$0 sm:$0xff] }
 0x7cb   :  { %2138 = vadd.xlane.f32.xlu2 %v5371_v56 }
 0x7cc   :  { %2262 = vmatpush.msrb.mxu2 %v2229_v37 }
 0x7ce   :  { %2263 = vmatpush.msrb.mxu2 %v2226_v39 }
 0x7d0   :  { %2264 = vmatpush.msrb.mxu2 %v2223_v43 }
 0x7d2   :  { %2265 = vmatpush.msrb.mxu2 %v2220_v51 }
 0x7d4   :  { %2266 = vmatpush.msrb.mxu2 %v2217_v25 }
 0x7d6   :  { %2267 = vmatpush.msrb.mxu2 %v2214_v33 }
 0x7d8   :  { %2268 = vmatpush.msrb.mxu2 %v2211_v55 }
 0x7da   :  { %2269 = vmatpush.msrb.mxu2 %v2208_v62 }
 0x7dc   :  { %2270 = vmatpush.msrb.mxu2 %v2205_v4 }
 0x7de   :  { %2271 = vmatpush.msrb.mxu2 %v2202_v46 }
 0x7e0   :  { %2272 = vmatpush.msrb.mxu2 %v2199_v10 }
 0x7e2   :  { %2273 = vmatpush.msrb.mxu2 %v2196_v31 }
 0x7e4   :  { %2274 = vmatpush.msrb.mxu2 %v2193_v7 }
 0x7e6   :  { %2275 = vmatpush.msrb.mxu2 %v2190_v63 }
 0x81e   :  { %v2137_v21 = vpop.xlane.xlu0 %2136 }
 0x81f   :  { %v2140_v22 = vmul.f32 0.03125, %v2137_v21  ;;  %v2191_v21 = vld [vmem:[#allocation8 + $0x190] sm:$0xff] }
 0x820   :  { %2298 = vmatpush.msra.mxu3 %v2191_v21 }
 0x821   :  { %v2142_v23 = vsub.f32 %v5367_v53, %v2140_v22 }
 0x823   :  { %v5376_v8 = vmul.f32 %v4814_v13, %v2142_v23 }
 0x825   :  { %v2146_v54 = vmul.f32 %v5376_v8, %v5376_v8 }
 0x827   :  { %2148 = vadd.xlane.f32.xlu1 %v2146_v54 }
 0x83e   :  { %v2139_v30 = vpop.xlane.xlu2 %2138 }
 0x83f   :  { %v2141_v34 = vmul.f32 0.03125, %v2139_v30 }
 0x841   :  { %v2143_v2 = vsub.f32 %v5371_v56, %v2141_v34  ;;  %v4307_v34 = vld [vmem:[%s5899_s3 + $0x1] ss:$0 sm:$0xff] }
 0x843   :  { %v5382_v12 = vmul.f32 %v4814_v13, %v2143_v2 }
 0x845   :  { %v2147_v36 = vmul.f32 %v5382_v12, %v5382_v12 }
 0x847   :  { %2150 = vadd.xlane.f32.xlu0 %v2147_v36 }
 0x89a   :  { %v2149_v19 = vpop.xlane.xlu1 %2148 }
 0x89b   :  { %v2152_v49 = vmul.f32 0.03125, %v2149_v19 }
 0x89d   :  { %v2154_v22 = vadd.f32 1e-05, %v2152_v49 }
 0x89f   :  { %4356 = vrsqrt.f32 %v2154_v22  ;;  %vm2162_vm9 = vweird.f32 %v2154_v22 }
 0x8a5   :  { %v4357_v23 = vpop.eup %4356 }
 0x8a6   :  { %v2157_v54 = vmul.f32 %v4357_v23, %v2154_v22  ;;  %vm2163_vm6 = vweird.f32 %v4357_v23 }
 0x8a7   :  { %vm2164_vm10 = vmor %vm2162_vm9, %vm2163_vm6 }
 0x8a8   :  { %v2158_v24 = vmul.f32 %v4357_v23, %v2157_v54 }
 0x8aa   :  { %v2159_v44 = vmul.f32 0.5, %v2158_v24 }
 0x8ac   :  { %v2160_v27 = vsub.f32 1.5, %v2159_v44 }
 0x8ae   :  { %v2161_v28 = vmul.f32 %v4357_v23, %v2160_v27 }
 0x8b0   :  { %v2165_v29 = vsel %vm2164_vm10, %v4357_v23, %v2161_v28 }
 0x8b1   :  { %v2176_v30 = vmul.f32 %v2165_v29, %v5376_v8 }
 0x8b3   :  { %v2181_v2 = vmul.f32 %v4306_v57, %v2176_v30 }
 0x8b5   :  { %v2186_v36 = vadd.f32 %v4307_v34, %v2181_v2 }
 0x8b7   :  { %2253 = vmatmul.f32.vlgmr.msrb.gmra.mxu1 %v2186_v36  ;;  %2276 = vmatmul.f32.vlgmr.msrb.gmra.mxu2 %v2186_v36 }
 0x8b8   :  { %2299 = vmatmul.f32.vlgmr.msra.gmra.mxu3 %v2186_v36 }
 0x8ba   :  { %v2151_v11 = vpop.xlane.xlu0 %2150 }
 0x8bb   :  { %v2153_v37 = vmul.f32 0.03125, %v2151_v11 }
 0x8bd   :  { %v2155_v38 = vadd.f32 1e-05, %v2153_v37 }
 0x8bf   :  { %4358 = vrsqrt.f32 %v2155_v38  ;;  %vm2172_vm12 = vweird.f32 %v2155_v38 }
 0x8c5   :  { %v4359_v45 = vpop.eup %4358 }
 0x8c6   :  { %v2167_v39 = vmul.f32 %v4359_v45, %v2155_v38  ;;  %vm2173_vm11 = vweird.f32 %v4359_v45 }
 0x8c7   :  { %vm2174_vm0 = vmor %vm2172_vm12, %vm2173_vm11 }
 0x8c8   :  { %v2168_v41 = vmul.f32 %v4359_v45, %v2167_v39 }
 0x8ca   :  { %v2169_v42 = vmul.f32 0.5, %v2168_v41 }
 0x8cc   :  { %v2170_v43 = vsub.f32 1.5, %v2169_v42 }
 0x8ce   :  { %v2171_v8 = vmul.f32 %v4359_v45, %v2170_v43 }
 0x8d0   :  { %v2175_v48 = vsel %vm2174_vm0, %v4359_v45, %v2171_v8 }
 0x8d1   :  { %v2177_v50 = vmul.f32 %v2175_v48, %v5382_v12 }
 0x8d3   :  { %v2182_v51 = vmul.f32 %v4306_v57, %v2177_v50 }
 0x8d5   :  { %v2187_v20 = vadd.f32 %v4307_v34, %v2182_v51 }
 0x8d7   :  { %2256 = vmatmul.f32.gmra.mxu1 %v2187_v20  ;;  %2279 = vmatmul.f32.gmra.mxu2 %v2187_v20 }
 0x8d8   :  { %2302 = vmatmul.f32.gmra.mxu3 %v2187_v20 }
 0x934   :  { %v2254_v52 = vpop.f32.mrf.mxu1 }
 0x935   :  { %2320 = vrot.lane.b32.xlu1 %v2254_v52, %s4671_s30  ;;  %2308 = vrot.lane.b32.xlu0 %v2254_v52, %s4672_s19  ;;  %v2328_v15 = vrot.slane %v2254_v52, 4 }
 0x936   :  { %2314 = vrot.lane.b32.xlu2 %v2254_v52, %s4673_s1 }
 0x93a   :  { %v2277_v25 = vpop.f32.mrf.mxu2 }
 0x93b   :  { %v2568_v61 = vrot.slane %v2277_v25, 4 }
 0x93d   :  { %2548 = vrot.lane.b32.xlu1 %v2277_v25, %s4672_s19  ;;  %2560 = vrot.lane.b32.xlu0 %v2277_v25, %s4671_s30 }
 0x93e   :  { %2554 = vrot.lane.b32.xlu2 %v2277_v25, %s4673_s1 }
 0x954   :  { %v5405_v26 = vpop.f32.mrf.mxu1 }
 0x95a   :  { %v5397_v12 = vpop.f32.mrf.mxu2 }
 0x95b   :  { %2562 = vrot.lane.b32.xlu1 %v5397_v12, %s4671_s30  ;;  %2556 = vrot.lane.b32.xlu0 %v5397_v12, %s4673_s1 }
 0x95c   :  { %2550 = vrot.lane.b32.xlu2 %v5397_v12, %s4672_s19 }
 0x963   :  { %2322 = vrot.lane.b32.xlu1 %v5405_v26, %s4671_s30  ;;  %2316 = vrot.lane.b32.xlu0 %v5405_v26, %s4673_s1 }
 0x964   :  { %2310 = vrot.lane.b32.xlu2 %v5405_v26, %s4672_s19 }
 0x990   :  { %v2315_v32 = vpop.permute.xlu2 %2314 }
 0x991   :  { %v2326_v33 = vrot.slane %v2315_v32, 4  ;;  %v2329_v55 = vsel %vm395_vm7, %v2315_v32, %v2328_v15 }
 0x992   :  { %v2337_v62 = vperm.slane %v2329_v55, %v4853_v40 }
 0x993   :  { %v2327_v35 = vsel %vm395_vm7, %v2326_v33, %v2254_v52 }
 0x994   :  { %v2333_v60 = vperm.slane %v2327_v35, %v4853_v40  ;;  %v2364_v14 = vrot.slane %v2337_v62, 4 }
 0x996   :  { %v2352_v10 = vrot.slane %v2333_v60, 4 }
 0x998   :  { %v2555_v58 = vpop.permute.xlu2 %2554 }
 0x999   :  { %v2566_v46 = vrot.slane %v2555_v58, 4  ;;  %v2569_v17 = vsel %vm395_vm7, %v2555_v58, %v2568_v61 }
 0x99a   :  { %v2577_v21 = vperm.slane %v2569_v17, %v4853_v40 }
 0x99b   :  { %v2567_v49 = vsel %vm395_vm7, %v2566_v46, %v2277_v25 }
 0x99c   :  { %v2573_v29 = vperm.slane %v2567_v49, %v4853_v40  ;;  %v2604_v41 = vrot.slane %v2577_v21, 4 }
 0x99e   :  { %v2592_v20 = vrot.slane %v2573_v29, 4 }
 0x9a7   :  { %v2321_v0 = vpop.permute.xlu1 %2320  ;;  %v2309_v3 = vpop.permute.xlu0 %2308 }
 0x9a8   :  { %v2338_v4 = vrot.slane %v2321_v0, 4  ;;  %v2340_v6 = vrot.slane %v2309_v3, 4 }
 0x9aa   :  { %v2339_v47 = vsel %vm395_vm7, %v2338_v4, %v2309_v3  ;;  %v2341_v9 = vsel %vm395_vm7, %v2321_v0, %v2340_v6 }
 0x9ab   :  { %v2345_v16 = vperm.slane %v2339_v47, %v4853_v40  ;;  %v2349_v31 = vperm.slane %v2341_v9, %v4853_v40 }
 0x9ad   :  { %v2350_v18 = vrot.slane %v2345_v16, 4  ;;  %v2353_v7 = vsel %vm395_vm7, %v2345_v16, %v2352_v10  ;;  %v2362_v19 = vrot.slane %v2349_v31, 4  ;;  %v2365_v5 = vsel %vm395_vm7, %v2349_v31, %v2364_v14 }
 0x9ae   :  { %v2361_v59 = vperm.slane %v2353_v7, %v4866_v1  ;;  %v2373_v63 = vperm.slane %v2365_v5, %v4866_v1 }
 0x9af   :  { %v2351_v22 = vsel %vm395_vm7, %v2350_v18, %v2333_v60  ;;  %v2363_v23 = vsel %vm395_vm7, %v2362_v19, %v2337_v62  ;;  %v2549_v54 = vpop.permute.xlu1 %2548  ;;  %v2561_v24 = vpop.permute.xlu0 %2560 }
 0x9b0   :  { %v2357_v44 = vperm.slane %v2351_v22, %v4866_v1  ;;  %v2369_v27 = vperm.slane %v2363_v23, %v4866_v1  ;;  %v2376_v28 = vrot.slane %v2361_v59, 4  ;;  %v2380_v57 = vrot.slane %v2373_v63, 4 }
 0x9b1   :  { %v2580_v30 = vrot.slane %v2549_v54, 4  ;;  %v2578_v34 = vrot.slane %v2561_v24, 4 }
 0x9b2   :  { %v2374_v2 = vrot.slane %v2357_v44, 4  ;;  %v2377_v36 = vsel %vm395_vm7, 0.0, %v2376_v28  ;;  %v2378_v11 = vrot.slane %v2369_v27, 4  ;;  %v2381_v37 = vsel %vm395_vm7, 0.0, %v2380_v57 }
 0x9b3   :  { %v2443_v38 = vrot.slane %v2377_v36, 4  ;;  %v2449_v45 = vsel %vm395_vm7, %v2380_v57, %v2369_v27  ;;  %v2454_v39 = vrot.slane %v2381_v37, 4  ;;  %v2579_v48 = vsel %vm395_vm7, %v2578_v34, %v2549_v54 }
 0x9b4   :  { %v2375_v42 = vsel %vm395_vm7, 0.0, %v2374_v2  ;;  %v2379_v43 = vsel %vm395_vm7, 0.0, %v2378_v11  ;;  %v2581_v50 = vsel %vm395_vm7, %v2561_v24, %v2580_v30  ;;  %v2453_v52 = vperm.slane %v2449_v45, %v4853_v40 }
 0x9b5   :  { %v2444_v8 = vsel %vm395_vm7, %v2443_v38, %v2375_v42  ;;  %v2455_v51 = vsel %vm395_vm7, %v2454_v39, %v2379_v43  ;;  %v2585_v25 = vperm.slane %v2579_v48, %v4853_v40  ;;  %v2589_v32 = vperm.slane %v2581_v50, %v4853_v40 }
 0x9b6   :  { %v2448_v33 = vperm.slane %v2444_v8, %v4853_v40  ;;  %v2459_v15 = vperm.slane %v2455_v51, %v4853_v40  ;;  %v2438_v62 = vsel %vm395_vm7, %v2376_v28, %v2357_v44  ;;  %v2474_v61 = vrot.slane %v2453_v52, 4 }
 0x9b7   :  { %v2590_v35 = vrot.slane %v2585_v25, 4  ;;  %v2593_v55 = vsel %vm395_vm7, %v2585_v25, %v2592_v20  ;;  %v2602_v58 = vrot.slane %v2589_v32, 4  ;;  %v2605_v60 = vsel %vm395_vm7, %v2589_v32, %v2604_v41  ;;  %v2551_v32 = vpop.permute.xlu2 %2550 }
 0x9b8   :  { %v2601_v0 = vperm.slane %v2593_v55, %v4866_v1  ;;  %v2613_v3 = vperm.slane %v2605_v60, %v4866_v1  ;;  %v2442_v14 = vperm.slane %v2438_v62, %v4853_v40  ;;  %v2460_v16 = vrot.slane %v2448_v33, 4 }
 0x9b9   :  { %v2591_v4 = vsel %vm395_vm7, %v2590_v35, %v2573_v29  ;;  %v2603_v6 = vsel %vm395_vm7, %v2602_v58, %v2577_v21  ;;  %v2472_v31 = vrot.slane %v2459_v15, 4  ;;  %v2475_v54 = vsel %vm395_vm7, %v2459_v15, %v2474_v61 }
 0x9ba   :  { %v2597_v46 = vperm.slane %v2591_v4, %v4866_v1  ;;  %v2609_v47 = vperm.slane %v2603_v6, %v4866_v1  ;;  %v2616_v9 = vrot.slane %v2601_v0, 4  ;;  %v2620_v10 = vrot.slane %v2613_v3, 4 }
 0x9bb   :  { %v2461_v30 = vsel %vm395_vm7, %v2460_v16, %v2442_v14  ;;  %v2462_v2 = vrot.slane %v2442_v14, 4  ;;  %v5472_v36 = vperm.slane %v2475_v54, %v4866_v1  ;;  %v2473_v11 = vsel %vm395_vm7, %v2472_v31, %v2453_v52 }
 0x9bc   :  { %v2614_v17 = vrot.slane %v2597_v46, 4  ;;  %v2617_v18 = vsel %vm395_vm7, 0.0, %v2616_v9  ;;  %v2618_v7 = vrot.slane %v2609_v47, 4  ;;  %v2621_v19 = vsel %vm395_vm7, 0.0, %v2620_v10 }
 0x9bd   :  { %v2678_v5 = vsel %vm395_vm7, %v2616_v9, %v2597_v46  ;;  %v2683_v49 = vrot.slane %v2617_v18, 4  ;;  %v2689_v59 = vsel %vm395_vm7, %v2620_v10, %v2609_v47  ;;  %v2694_v63 = vrot.slane %v2621_v19, 4 }
 0x9be   :  { %v2615_v21 = vsel %vm395_vm7, 0.0, %v2614_v17  ;;  %v2619_v22 = vsel %vm395_vm7, 0.0, %v2618_v7  ;;  %v2693_v23 = vperm.slane %v2689_v59, %v4853_v40  ;;  %v2682_v44 = vperm.slane %v2678_v5, %v4853_v40 }
 0x9bf   :  { %v2695_v24 = vsel %vm395_vm7, %v2694_v63, %v2619_v22  ;;  %v2684_v27 = vsel %vm395_vm7, %v2683_v49, %v2615_v21  ;;  %v2467_v39 = vperm.slane %v2461_v30, %v4866_v1  ;;  %v2479_v43 = vperm.slane %v2473_v11, %v4866_v1 }
 0x9c0   :  { %v2699_v28 = vperm.slane %v2695_v24, %v4853_v40  ;;  %v2714_v57 = vrot.slane %v2693_v23, 4  ;;  %v2688_v29 = vperm.slane %v2684_v27, %v4853_v40  ;;  %v2702_v34 = vrot.slane %v2682_v44, 4  ;;  %v2311_v24 = vpop.permute.xlu2 %2310 }
 0x9c1   :  { %v2463_v25 = vsel %vm395_vm7, %v2448_v33, %v2462_v2  ;;  %v2488_v15 = vrot.slane %v5472_v36, 4  ;;  %v2486_v55 = vrot.slane %v2467_v39, 4  ;;  %v2484_v0 = vrot.slane %v2479_v43, 4 }
 0x9c2   :  { %v2715_v37 = vsel %vm395_vm7, %v2699_v28, %v2714_v57  ;;  %v2700_v38 = vrot.slane %v2688_v29, 4  ;;  %v2712_v45 = vrot.slane %v2699_v28, 4  ;;  %v2703_v41 = vsel %vm395_vm7, %v2688_v29, %v2702_v34 }
 0x9c3   :  { %v2723_v42 = vperm.slane %v2715_v37, %v4866_v1  ;;  %v2711_v8 = vperm.slane %v2703_v41, %v4866_v1  ;;  %v2471_v3 = vperm.slane %v2463_v25, %v4866_v1  ;;  %v2636_v61 = vrot.slane %v2551_v32, 4 }
 0x9c4   :  { %v2701_v48 = vsel %vm395_vm7, %v2700_v38, %v2682_v44  ;;  %v2713_v50 = vsel %vm395_vm7, %v2712_v45, %v2693_v23  ;;  %v2624_v47 = vrot.slane %v5397_v12, 4  ;;  %v2485_v9 = vsel %vm395_vm7, %v2484_v0, %v2467_v39 }
 0x9c5   :  { %v2728_v51 = vrot.slane %v2723_v42, 4  ;;  %v2707_v20 = vperm.slane %v2701_v48, %v4866_v1  ;;  %v2719_v52 = vperm.slane %v2713_v50, %v4866_v1  ;;  %v2730_v35 = vrot.slane %v2711_v8, 4 }
 0x9c6   :  { %v2489_v33 = vsel %vm395_vm7, %v2488_v15, %v2471_v3  ;;  %v2487_v10 = vsel %vm395_vm7, %v2479_v43, %v2486_v55  ;;  %v2490_v63 = vrot.slane %v2471_v3, 4  ;;  %v2396_v34 = vrot.slane %v2311_v24, 4 }
 0x9c7   :  { %v2729_v58 = vsel %vm395_vm7, %v2728_v51, %v2711_v8  ;;  %v2724_v60 = vrot.slane %v2719_v52, 4  ;;  %v2726_v62 = vrot.slane %v2707_v20, 4  ;;  %v2731_v46 = vsel %vm395_vm7, %v2723_v42, %v2730_v35 }
 0x9c8   :  { %4221 = vmatpush.xpose.msk.msra.mxu2 %vm1095_vm8, %v2729_v58  ;;  %v2491_v37 = vsel %vm395_vm7, %v5472_v36, %v2490_v63 }
 0x9c9   :  { %v2725_v4 = vsel %vm395_vm7, %v2724_v60, %v2707_v20  ;;  %v2727_v6 = vsel %vm395_vm7, %v2719_v52, %v2726_v62 }
 0x9ca   :  { %4217 = vmatpush.xpose.msk.msra.mxu0 %vm1095_vm8, %v2725_v4  ;;  %4219 = vmatpush.xpose.msk.msra.mxu1 %vm1095_vm8, %v2727_v6 }
 0x9cb   :  { %4222 = vmatmul.msk.f32.vlgmr.msra.gmra.mxu2 %vm1095_vm8, %v2489_v33 }
 0x9cd   :  { %v2563_v14 = vpop.permute.xlu1 %2562  ;;  %v2557_v16 = vpop.permute.xlu0 %2556  ;;  %4218 = vmatmul.msk.f32.vlgmr.msra.gmra.mxu0 %vm1095_vm8, %v2485_v9  ;;  %4220 = vmatmul.msk.f32.vlgmr.msra.gmra.mxu1 %vm1095_vm8, %v2487_v10 }
 0x9ce   :  { %4223 = vmatpush.xpose.msk.msrb.mxu0 %vm1095_vm8, %v2731_v46  ;;  %v2634_v31 = vrot.slane %v2563_v14, 4  ;;  %v2637_v17 = vsel %vm395_vm7, %v2563_v14, %v2636_v61  ;;  %v2622_v18 = vrot.slane %v2557_v16, 4  ;;  %v2625_v7 = vsel %vm395_vm7, %v2557_v16, %v2624_v47 }
 0x9cf   :  { %v2645_v19 = vperm.slane %v2637_v17, %v4853_v40  ;;  %v2633_v5 = vperm.slane %v2625_v7, %v4853_v40 }
 0x9d0   :  { %v2635_v49 = vsel %vm395_vm7, %v2634_v31, %v2551_v32  ;;  %v2623_v59 = vsel %vm395_vm7, %v2622_v18, %v5397_v12  ;;  %v2384_v12 = vrot.slane %v5405_v26, 4 }
 0x9d1   :  { %v2641_v21 = vperm.slane %v2635_v49, %v4853_v40  ;;  %v2658_v22 = vrot.slane %v2645_v19, 4  ;;  %v2629_v23 = vperm.slane %v2623_v59, %v4853_v40  ;;  %v2660_v54 = vrot.slane %v2633_v5, 4 }
 0x9d3   :  { %v2646_v44 = vrot.slane %v2641_v21, 4  ;;  %v2648_v27 = vrot.slane %v2629_v23, 4  ;;  %v2659_v28 = vsel %vm395_vm7, %v2658_v22, %v2633_v5  ;;  %v2661_v57 = vsel %vm395_vm7, %v2645_v19, %v2660_v54 }
 0x9d4   :  { %v2665_v29 = vperm.slane %v2659_v28, %v4866_v1  ;;  %v2669_v30 = vperm.slane %v2661_v57, %v4866_v1 }
 0x9d5   :  { %v2647_v2 = vsel %vm395_vm7, %v2646_v44, %v2629_v23  ;;  %v2649_v11 = vsel %vm395_vm7, %v2641_v21, %v2648_v27  ;;  %v2323_v38 = vpop.permute.xlu1 %2322  ;;  %v2317_v45 = vpop.permute.xlu0 %2316  ;;  %4224 = vmatmul.msk.f32.vlgmr.msrb.gmra.mxu0 %vm1095_vm8, %v2491_v37 }
 0x9d6   :  { %v2653_v39 = vperm.slane %v2647_v2, %v4866_v1  ;;  %v2657_v41 = vperm.slane %v2649_v11, %v4866_v1  ;;  %v2674_v42 = vrot.slane %v2665_v29, 4  ;;  %v2676_v43 = vrot.slane %v2669_v30, 4 }
 0x9d7   :  { %v2394_v8 = vrot.slane %v2323_v38, 4  ;;  %v2397_v48 = vsel %vm395_vm7, %v2323_v38, %v2396_v34  ;;  %v2382_v50 = vrot.slane %v2317_v45, 4  ;;  %v2385_v51 = vsel %vm395_vm7, %v2317_v45, %v2384_v12 }
 0x9d8   :  { %v2670_v20 = vrot.slane %v2653_v39, 4  ;;  %v2672_v52 = vrot.slane %v2657_v41, 4  ;;  %v2675_v36 = vsel %vm395_vm7, 0.0, %v2674_v42  ;;  %v2677_v25 = vsel %vm395_vm7, 0.0, %v2676_v43 }
 0x9d9   :  { %v2743_v32 = vsel %vm395_vm7, %v2676_v43, %v2665_v29  ;;  %v2748_v15 = vrot.slane %v2677_v25, 4  ;;  %v2395_v35 = vsel %vm395_vm7, %v2394_v8, %v2311_v24  ;;  %v2405_v55 = vperm.slane %v2397_v48, %v4853_v40 }
 0x9da   :  { %v2671_v58 = vsel %vm395_vm7, 0.0, %v2670_v20  ;;  %v2673_v60 = vsel %vm395_vm7, 0.0, %v2672_v52  ;;  %v2732_v62 = vsel %vm395_vm7, %v2672_v52, %v2653_v39  ;;  %v2747_v0 = vperm.slane %v2743_v32, %v4853_v40 }
 0x9db   :  { %v2737_v3 = vrot.slane %v2673_v60, 4  ;;  %v2749_v4 = vsel %vm395_vm7, %v2748_v15, %v2675_v36  ;;  %v2401_v6 = vperm.slane %v2395_v35, %v4853_v40  ;;  %v2418_v61 = vrot.slane %v2405_v55, 4 }
 0x9dc   :  { %v2753_v33 = vperm.slane %v2749_v4, %v4853_v40  ;;  %v2768_v46 = vrot.slane %v2747_v0, 4  ;;  %v2383_v47 = vsel %vm395_vm7, %v2382_v50, %v5405_v26  ;;  %v2393_v9 = vperm.slane %v2385_v51, %v4853_v40 }
 0x9dd   :  { %v2406_v10 = vrot.slane %v2401_v6, 4  ;;  %v2389_v14 = vperm.slane %v2383_v47, %v4853_v40  ;;  %v2736_v16 = vperm.slane %v2732_v62, %v4853_v40  ;;  %v2738_v31 = vsel %vm395_vm7, %v2737_v3, %v2671_v58 }
 0x9de   :  { %v2766_v17 = vrot.slane %v2753_v33, 4  ;;  %v2419_v18 = vsel %vm395_vm7, %v2418_v61, %v2393_v9  ;;  %v2420_v7 = vrot.slane %v2393_v9, 4  ;;  %v2742_v19 = vperm.slane %v2738_v31, %v4853_v40 }
 0x9df   :  { %v2407_v5 = vsel %vm395_vm7, %v2406_v10, %v2389_v14  ;;  %v2408_v49 = vrot.slane %v2389_v14, 4  ;;  %v2425_v26 = vperm.slane %v2419_v18, %v4866_v1  ;;  %v2756_v59 = vrot.slane %v2736_v16, 4 }
 0x9e0   :  { %v2413_v63 = vperm.slane %v2407_v5, %v4866_v1  ;;  %v2421_v21 = vsel %vm395_vm7, %v2405_v55, %v2420_v7  ;;  %v2769_v22 = vsel %vm395_vm7, %v2753_v33, %v2768_v46  ;;  %v2754_v23 = vrot.slane %v2742_v19, 4 }
 0x9e1   :  { %v2409_v54 = vsel %vm395_vm7, %v2401_v6, %v2408_v49  ;;  %v2429_v24 = vperm.slane %v2421_v21, %v4866_v1  ;;  %v2434_v44 = vrot.slane %v2425_v26, 4  ;;  %v2757_v27 = vsel %vm395_vm7, %v2742_v19, %v2756_v59 }
 0x9e2   :  { %v2417_v28 = vperm.slane %v2409_v54, %v4866_v1  ;;  %v2430_v57 = vrot.slane %v2413_v63, 4  ;;  %v2765_v29 = vperm.slane %v2757_v27, %v4866_v1  ;;  %v2777_v30 = vperm.slane %v2769_v22, %v4866_v1  ;;  %v4402_v54 = vld [vmem:[#allocation5] sm:$0xff] }
 0x9e3   :  { %v2435_v12 = vsel %vm395_vm7, 0.0, %v2434_v44  ;;  %v2436_v34 = vrot.slane %v2429_v24, 4  ;;  %v2755_v2 = vsel %vm395_vm7, %v2754_v23, %v2736_v16  ;;  %v2767_v11 = vsel %vm395_vm7, %v2766_v17, %v2747_v0 }
 0x9e4   :  { %v2431_v37 = vsel %vm395_vm7, 0.0, %v2430_v57  ;;  %v2432_v38 = vrot.slane %v2417_v28, 4  ;;  %v2782_v45 = vrot.slane %v2777_v30, 4  ;;  %v2761_v39 = vperm.slane %v2755_v2, %v4866_v1 }
 0x9e5   :  { %v2437_v41 = vsel %vm395_vm7, 0.0, %v2436_v34  ;;  %v2503_v42 = vsel %vm395_vm7, %v2436_v34, %v2425_v26  ;;  %v2773_v43 = vperm.slane %v2767_v11, %v4866_v1  ;;  %v2784_v8 = vrot.slane %v2765_v29, 4 }
 0x9e6   :  { %v2433_v48 = vsel %vm395_vm7, 0.0, %v2432_v38  ;;  %v2492_v50 = vsel %vm395_vm7, %v2432_v38, %v2413_v63  ;;  %v2507_v51 = vperm.slane %v2503_v42, %v4853_v40  ;;  %v2508_v20 = vrot.slane %v2437_v41, 4 }
 0x9e7   :  { %v2497_v52 = vrot.slane %v2433_v48, 4  ;;  %v2783_v36 = vsel %vm395_vm7, %v2782_v45, %v2765_v29  ;;  %v2778_v25 = vrot.slane %v2773_v43, 4  ;;  %v2785_v32 = vsel %vm395_vm7, %v2777_v30, %v2784_v8 }
 0x9e8   :  { %v2509_v15 = vsel %vm395_vm7, %v2508_v20, %v2435_v12  ;;  %v2528_v35 = vrot.slane %v2507_v51, 4  ;;  %4229 = vmatpush.xpose.msk.msra.mxu0 %vm1095_vm8, %v2783_v36  ;;  %v2780_v55 = vrot.slane %v2761_v39, 4  ;;  %v2496_v58 = vperm.slane %v2492_v50, %v4853_v40 }
 0x9e9   :  { %v2513_v60 = vperm.slane %v2509_v15, %v4853_v40  ;;  %v2779_v62 = vsel %vm395_vm7, %v2778_v25, %v2761_v39  ;;  %v2498_v0 = vsel %vm395_vm7, %v2497_v52, %v2431_v37 }
 0x9ea   :  { %4225 = vmatpush.xpose.msk.msrb.mxu1 %vm1095_vm8, %v2779_v62  ;;  %v2781_v3 = vsel %vm395_vm7, %v2773_v43, %v2780_v55  ;;  %v2502_v4 = vperm.slane %v2498_v0, %v4853_v40  ;;  %v2516_v6 = vrot.slane %v2496_v58, 4  ;;  %v5605_v55 = vpop.f32.mrf.mxu3 }
 0x9eb   :  { %v2526_v61 = vrot.slane %v2513_v60, 4  ;;  %4227 = vmatpush.xpose.msk.msrb.mxu2 %vm1095_vm8, %v2781_v3  ;;  %v2529_v33 = vsel %vm395_vm7, %v2513_v60, %v2528_v35 }
 0x9ec   :  { %v2517_v46 = vsel %vm395_vm7, %v2502_v4, %v2516_v6  ;;  %v2537_v47 = vperm.slane %v2529_v33, %v4866_v1  ;;  %v2514_v9 = vrot.slane %v2502_v4, 4 }
 0x9ed   :  { %v2525_v10 = vperm.slane %v2517_v46, %v4866_v1  ;;  %v2527_v14 = vsel %vm395_vm7, %v2526_v61, %v2507_v51 }
 0x9ee   :  { %4231 = vmatpush.xpose.msk.msra.mxu1 %vm1095_vm8, %v2785_v32  ;;  %v2542_v16 = vrot.slane %v2537_v47, 4  ;;  %v2515_v31 = vsel %vm395_vm7, %v2514_v9, %v2496_v58  ;;  %v2533_v17 = vperm.slane %v2527_v14, %v4866_v1 }
 0x9ef   :  { %v2521_v18 = vperm.slane %v2515_v31, %v4866_v1  ;;  %v2544_v59 = vrot.slane %v2525_v10, 4 }
 0x9f0   :  { %v2543_v7 = vsel %vm395_vm7, %v2542_v16, %v2525_v10  ;;  %v2538_v19 = vrot.slane %v2533_v17, 4 }
 0x9f1   :  { %4230 = vmatmul.msk.f32.vlgmr.msra.gmra.mxu0 %vm1095_vm8, %v2543_v7  ;;  %v2540_v5 = vrot.slane %v2521_v18, 4  ;;  %v2545_v63 = vsel %vm395_vm7, %v2537_v47, %v2544_v59 }
 0x9f2   :  { %v2539_v49 = vsel %vm395_vm7, %v2538_v19, %v2521_v18  ;;  %v5607_v58 = vpop.f32.mrf.mxu3 }
 0x9f3   :  { %4226 = vmatmul.msk.f32.vlgmr.msrb.gmra.mxu1 %vm1095_vm8, %v2539_v49  ;;  %v2541_v26 = vsel %vm395_vm7, %v2533_v17, %v2540_v5  ;;  %v4289_v60 = vpack.i.bf16 %v5607_v58, %v5605_v55 }
 0x9f4   :  { %4228 = vmatmul.msk.f32.vlgmr.msrb.gmra.mxu2 %vm1095_vm8, %v2541_v26 }
 0x9fb   :  { %4232 = vmatmul.msk.f32.vlgmr.msra.gmra.mxu1 %vm1095_vm8, %v2545_v63 }
 0xa4a   :  { %v3049_v21 = vpop.f32.mrf.mxu0  ;;  %v3075_v23 = vpop.f32.mrf.mxu1 }
 0xa4b   :  { %v3234_v22 = vmul.f32 0.35355338, %v3049_v21  ;;  %v3235_v27 = vmul.f32 0.35355338, %v3075_v23 }
 0xa4d   :  { %v3242_v24 = vadd.f32 %v4402_v54, %v3234_v22  ;;  %v3243_v2 = vadd.f32 %v4402_v54, %v3235_v27 }
 0xa4e   :  { %v3101_v44 = vpop.f32.mrf.mxu2 }
 0xa4f   :  { %v3236_v28 = vmul.f32 0.35355338, %v3101_v44  ;;  %v3250_v57 = vsel %vm1095_vm8, %v3242_v24, -inf  ;;  %v3253_v37 = vsel %vm1095_vm8, %v3243_v2, -inf }
 0xa50   :  { %3251 = vmax.xlane.f32.xlu2 %v3250_v57 }
 0xa51   :  { %v3244_v29 = vadd.f32 %v4402_v54, %v3236_v28 }
 0xa52   :  { %v3127_v30 = vpop.f32.mrf.mxu0 }
 0xa53   :  { %v3237_v12 = vmul.f32 0.35355338, %v3127_v30  ;;  %v3256_v34 = vsel %vm1095_vm8, %v3244_v29, -inf }
 0xa54   :  { %3257 = vmax.xlane.f32.xlu1 %v3256_v34 }
 0xa55   :  { %v3245_v11 = vadd.f32 %v4402_v54, %v3237_v12 }
 0xa57   :  { %v3259_v38 = vsel %vm1095_vm8, %v3245_v11, -inf }
 0xa58   :  { %3254 = vmax.xlane.f32.xlu2 %v3253_v37  ;;  %3260 = vmax.xlane.f32.xlu0 %v3259_v38 }
 0xa6e   :  { %v3205_v45 = vpop.f32.mrf.mxu0 }
 0xa6f   :  { %v3240_v39 = vmul.f32 0.35355338, %v3205_v45 }
 0xa70   :  { %v3153_v41 = vpop.f32.mrf.mxu1 }
 0xa71   :  { %v3238_v42 = vmul.f32 0.35355338, %v3153_v41  ;;  %v3248_v43 = vadd.f32 %v4402_v54, %v3240_v39 }
 0xa73   :  { %v3268_v8 = vsel %vm1095_vm8, %v3248_v43, -inf  ;;  %v3246_v48 = vadd.f32 %v4402_v54, %v3238_v42 }
 0xa74   :  { %3269 = vmax.xlane.f32.xlu2 %v3268_v8  ;;  %v2808_v8 = vrot.slane %v5605_v55, 4 }
 0xa75   :  { %v3262_v50 = vsel %vm1095_vm8, %v3246_v48, -inf }
 0xa76   :  { %3263 = vmax.xlane.f32.xlu0 %v3262_v50  ;;  %v2864_v50 = vrot.slane %v5607_v58, 4 }
 0xa77   :  { %v3179_v51 = vpop.f32.mrf.mxu2 }
 0xa78   :  { %v3239_v20 = vmul.f32 0.35355338, %v3179_v51  ;;  %v3231_v52 = vpop.f32.mrf.mxu1 }
 0xa79   :  { %v3241_v36 = vmul.f32 0.35355338, %v3231_v52 }
 0xa7a   :  { %v3247_v25 = vadd.f32 %v4402_v54, %v3239_v20 }
 0xa7b   :  { %v3249_v32 = vadd.f32 %v4402_v54, %v3241_v36 }
 0xa7c   :  { %v3265_v15 = vsel %vm1095_vm8, %v3247_v25, -inf }
 0xa7d   :  { %v3271_v35 = vsel %vm1095_vm8, %v3249_v32, -inf }
 0xa7e   :  { %3266 = vmax.xlane.f32.xlu0 %v3265_v15  ;;  %3272 = vmax.xlane.f32.xlu1 %v3271_v35 }
 0xa8c   :  { %4290 = vrot.lane.b32.xlu2 %v4289_v60, %s4673_s1 }
 0xa92   :  { %4295 = vrot.lane.b32.xlu0 %v4289_v60, %s4671_s30  ;;  %s4676_s30 = smov [#allocation17]  }
 0xa97   :  { %4285 = vrot.lane.b32.xlu1 %v4289_v60, %s4672_s19  ;;  %s4170_s19 = sshll.u32 %s4676_s30, 4  ;;  %s4171_s19 = int_to_ptr.vmem [resolvable:$true] %s4170_s19 }
 0xac3   :  { %v3252_v62 = vpop.xlane.xlu2 %3251 }
 0xac4   :  { %v3274_v0 = vsub.f32 %v3242_v24, %v3252_v62 }
 0xac6   :  { %v3282_v3 = vmul.f32 1.442695, %v3274_v0 }
 0xac7   :  { %v3258_v4 = vpop.xlane.xlu1 %3257 }
 0xac8   :  { %4360 = vpow2.f32 %v3282_v3  ;;  %v3276_v6 = vsub.f32 %v3244_v29, %v3258_v4 }
 0xaca   :  { %v3286_v61 = vmul.f32 1.442695, %v3276_v6 }
 0xacb   :  { %v3261_v33 = vpop.xlane.xlu0 %3260  ;;  %v3255_v46 = vpop.xlane.xlu2 %3254 }
 0xacc   :  { %4362 = vpow2.f32 %v3286_v61  ;;  %v3277_v47 = vsub.f32 %v3245_v11, %v3261_v33  ;;  %v3275_v14 = vsub.f32 %v3243_v2, %v3255_v46 }
 0xace   :  { %v5614_v9 = vpop.eup %4360  ;;  %v3288_v10 = vmul.f32 1.442695, %v3277_v47  ;;  %v3284_v17 = vmul.f32 1.442695, %v3275_v14 }
 0xacf   :  { %v3298_v16 = vsel %vm1095_vm8, %v5614_v9, 0.0 }
 0xad0   :  { %3299 = vadd.xlane.f32.xlu0 %v3298_v16  ;;  %4364 = vpow2.f32 %v3288_v10 }
 0xad1   :  { %4366 = vpow2.f32 %v3284_v17 }
 0xad2   :  { %v5618_v31 = vpop.eup %4362 }
 0xad3   :  { %v3304_v18 = vsel %vm1095_vm8, %v5618_v31, 0.0 }
 0xad4   :  { %3305 = vadd.xlane.f32.xlu1 %v3304_v18 }
 0xad6   :  { %v5622_v7 = vpop.eup %4364 }
 0xad7   :  { %v3307_v19 = vsel %vm1095_vm8, %v5622_v7, 0.0  ;;  %v5626_v5 = vpop.eup %4366 }
 0xad8   :  { %3308 = vadd.xlane.f32.xlu2 %v3307_v19  ;;  %v3301_v49 = vsel %vm1095_vm8, %v5626_v5, 0.0 }
 0xae0   :  { %3302 = vadd.xlane.f32.xlu2 %v3301_v49 }
 0xae7   :  { %v3270_v26 = vpop.xlane.xlu2 %3269 }
 0xae8   :  { %v3280_v59 = vsub.f32 %v3248_v43, %v3270_v26 }
 0xae9   :  { %v3264_v63 = vpop.xlane.xlu0 %3263 }
 0xaea   :  { %v3294_v21 = vmul.f32 1.442695, %v3280_v59  ;;  %v3278_v22 = vsub.f32 %v3246_v48, %v3264_v63 }
 0xaec   :  { %4368 = vpow2.f32 %v3294_v21  ;;  %v3290_v23 = vmul.f32 1.442695, %v3278_v22 }
 0xaee   :  { %4370 = vpow2.f32 %v3290_v23 }
 0xaef   :  { %v4291_v2 = vpop.permute.xlu2 %4290 }
 0xaf0   :  { %v4293_v37 = vunpack.i.h.bf16 %v4291_v2  ;;  %v4292_v38 = vunpack.i.l.bf16 %v4291_v2 }
 0xaf1   :  { %v3273_v54 = vpop.xlane.xlu1 %3272  ;;  %v3267_v24 = vpop.xlane.xlu0 %3266 }
 0xaf2   :  { %v5630_v44 = vpop.eup %4368  ;;  %v3281_v27 = vsub.f32 %v3249_v32, %v3273_v54  ;;  %v3279_v28 = vsub.f32 %v3247_v25, %v3267_v24  ;;  %v2862_v42 = vrot.slane %v4293_v37, 4  ;;  %v2806_v43 = vrot.slane %v4292_v38, 4 }
 0xaf3   :  { %v3316_v29 = vsel %vm1095_vm8, %v5630_v44, 0.0  ;;  %v2809_v51 = vsel %vm395_vm7, %v4292_v38, %v2808_v8  ;;  %v2865_v32 = vsel %vm395_vm7, %v4293_v37, %v2864_v50 }
 0xaf4   :  { %v5632_v57 = vpop.eup %4370  ;;  %3317 = vadd.xlane.f32.xlu2 %v3316_v29  ;;  %v3296_v30 = vmul.f32 1.442695, %v3281_v27  ;;  %v3292_v12 = vmul.f32 1.442695, %v3279_v28  ;;  %v2863_v20 = vsel %vm395_vm7, %v2862_v42, %v5607_v58  ;;  %v2807_v52 = vsel %vm395_vm7, %v2806_v43, %v5605_v55 }
 0xaf5   :  { %v3310_v34 = vsel %vm1095_vm8, %v5632_v57, 0.0  ;;  %v2869_v15 = vperm.slane %v2863_v20, %v4853_v40  ;;  %v2813_v35 = vperm.slane %v2807_v52, %v4853_v40  ;;  %v2817_v60 = vperm.slane %v2809_v51, %v4853_v40 }
 0xaf6   :  { %3311 = vadd.xlane.f32.xlu0 %v3310_v34  ;;  %4372 = vpow2.f32 %v3296_v30  ;;  %v2873_v58 = vperm.slane %v2865_v32, %v4853_v40 }
 0xaf7   :  { %4374 = vpow2.f32 %v3292_v12  ;;  %v2832_v47 = vrot.slane %v2813_v35, 4  ;;  %v2888_v16 = vrot.slane %v2869_v15, 4  ;;  %v2844_v17 = vrot.slane %v2817_v60, 4 }
 0xaf8   :  { %v2900_v21 = vrot.slane %v2873_v58, 4 }
 0xafc   :  { %v5638_v11 = vpop.eup %4372 }
 0xafd   :  { %v5640_v45 = vpop.eup %4374  ;;  %v3319_v39 = vsel %vm1095_vm8, %v5638_v11, 0.0 }
 0xafe   :  { %3320 = vadd.xlane.f32.xlu1 %v3319_v39  ;;  %v3313_v41 = vsel %vm1095_vm8, %v5640_v45, 0.0 }
 0xaff   :  { %3314 = vadd.xlane.f32.xlu0 %v3313_v41 }
 0xb04   :  { %v4296_v48 = vpop.permute.xlu0 %4295 }
 0xb05   :  { %v4298_v36 = vunpack.i.h.bf16 %v4296_v48  ;;  %v4297_v25 = vunpack.i.l.bf16 %v4296_v48 }
 0xb07   :  { %v2874_v0 = vrot.slane %v4298_v36, 4  ;;  %v2818_v3 = vrot.slane %v4297_v25, 4 }
 0xb09   :  { %v4286_v62 = vpop.permute.xlu1 %4285 }
 0xb0a   :  { %v4288_v4 = vunpack.i.h.bf16 %v4286_v62  ;;  %v4287_v6 = vunpack.i.l.bf16 %v4286_v62 }
 0xb0c   :  { %v2876_v61 = vrot.slane %v4288_v4, 4  ;;  %v2819_v55 = vsel %vm395_vm7, %v2818_v3, %v4287_v6  ;;  %v2820_v33 = vrot.slane %v4287_v6, 4  ;;  %v2875_v46 = vsel %vm395_vm7, %v2874_v0, %v4288_v4 }
 0xb0d   :  { %v2825_v10 = vperm.slane %v2819_v55, %v4853_v40  ;;  %v2881_v14 = vperm.slane %v2875_v46, %v4853_v40 }
 0xb0e   :  { %v2821_v18 = vsel %vm395_vm7, %v4297_v25, %v2820_v33  ;;  %v2877_v19 = vsel %vm395_vm7, %v4298_v36, %v2876_v61 }
 0xb0f   :  { %v2829_v49 = vperm.slane %v2821_v18, %v4853_v40  ;;  %v2830_v26 = vrot.slane %v2825_v10, 4  ;;  %v2833_v59 = vsel %vm395_vm7, %v2825_v10, %v2832_v47  ;;  %v2885_v63 = vperm.slane %v2877_v19, %v4853_v40 }
 0xb10   :  { %v2841_v22 = vperm.slane %v2833_v59, %v4866_v1  ;;  %v2886_v23 = vrot.slane %v2881_v14, 4  ;;  %v2889_v54 = vsel %vm395_vm7, %v2881_v14, %v2888_v16 }
 0xb11   :  { %v2831_v24 = vsel %vm395_vm7, %v2830_v26, %v2813_v35  ;;  %v2842_v27 = vrot.slane %v2829_v49, 4  ;;  %v2845_v28 = vsel %vm395_vm7, %v2829_v49, %v2844_v17  ;;  %v2897_v29 = vperm.slane %v2889_v54, %v4866_v1 }
 0xb12   :  { %v2837_v30 = vperm.slane %v2831_v24, %v4866_v1  ;;  %v2853_v12 = vperm.slane %v2845_v28, %v4866_v1  ;;  %v2856_v34 = vrot.slane %v2841_v22, 4  ;;  %v2887_v2 = vsel %vm395_vm7, %v2886_v23, %v2869_v15 }
 0xb13   :  { %v2843_v37 = vsel %vm395_vm7, %v2842_v27, %v2817_v60  ;;  %v2893_v38 = vperm.slane %v2887_v2, %v4866_v1  ;;  %v2898_v39 = vrot.slane %v2885_v63, 4  ;;  %v2901_v41 = vsel %vm395_vm7, %v2885_v63, %v2900_v21 }
 0xb14   :  { %v2849_v42 = vperm.slane %v2843_v37, %v4866_v1  ;;  %v2854_v43 = vrot.slane %v2837_v30, 4  ;;  %v2857_v8 = vsel %vm395_vm7, 0.0, %v2856_v34  ;;  %v2860_v48 = vrot.slane %v2853_v12, 4 }
 0xb15   :  { %v2899_v50 = vsel %vm395_vm7, %v2898_v39, %v2873_v58  ;;  %v2909_v51 = vperm.slane %v2901_v41, %v4866_v1  ;;  %v2910_v20 = vrot.slane %v2893_v38, 4  ;;  %v2912_v52 = vrot.slane %v2897_v29, 4 }
 0xb16   :  { %v2855_v36 = vsel %vm395_vm7, 0.0, %v2854_v43  ;;  %v2858_v25 = vrot.slane %v2849_v42, 4  ;;  %v2861_v32 = vsel %vm395_vm7, 0.0, %v2860_v48  ;;  %v2905_v15 = vperm.slane %v2899_v50, %v4866_v1 }
 0xb17   :  { %v2911_v35 = vsel %vm395_vm7, 0.0, %v2910_v20  ;;  %v2913_v60 = vsel %vm395_vm7, 0.0, %v2912_v52  ;;  %v2916_v62 = vrot.slane %v2909_v51, 4  ;;  %v2923_v0 = vrot.slane %v2857_v8, 4 }
 0xb18   :  { %v2914_v3 = vrot.slane %v2905_v15, 4  ;;  %v2934_v4 = vrot.slane %v2861_v32, 4  ;;  %v2977_v6 = vrot.slane %v2913_v60, 4  ;;  %v2859_v58 = vsel %vm395_vm7, 0.0, %v2858_v25 }
 0xb19   :  { %v2917_v61 = vsel %vm395_vm7, 0.0, %v2916_v62  ;;  %v2918_v55 = vsel %vm395_vm7, %v2856_v34, %v2837_v30  ;;  %v2924_v33 = vsel %vm395_vm7, %v2923_v0, %v2855_v36  ;;  %v2929_v46 = vsel %vm395_vm7, %v2860_v48, %v2849_v42 }
 0xb1a   :  { %v2988_v47 = vrot.slane %v2917_v61, 4  ;;  %v2922_v10 = vperm.slane %v2918_v55, %v4853_v40  ;;  %v2928_v14 = vperm.slane %v2924_v33, %v4853_v40  ;;  %v2933_v16 = vperm.slane %v2929_v46, %v4853_v40 }
 0xb1b   :  { %v2935_v17 = vsel %vm395_vm7, %v2934_v4, %v2859_v58  ;;  %v2915_v18 = vsel %vm395_vm7, 0.0, %v2914_v3  ;;  %v2972_v19 = vsel %vm395_vm7, %v2912_v52, %v2893_v38  ;;  %v2978_v49 = vsel %vm395_vm7, %v2977_v6, %v2911_v35 }
 0xb1c   :  { %v2939_v26 = vperm.slane %v2935_v17, %v4853_v40  ;;  %v2940_v59 = vrot.slane %v2928_v14, 4  ;;  %v2942_v63 = vrot.slane %v2922_v10, 4  ;;  %v2954_v21 = vrot.slane %v2933_v16, 4 }
 0xb1d   :  { %v2976_v22 = vperm.slane %v2972_v19, %v4853_v40  ;;  %v2982_v23 = vperm.slane %v2978_v49, %v4853_v40  ;;  %v2983_v54 = vsel %vm395_vm7, %v2916_v62, %v2905_v15  ;;  %v2989_v24 = vsel %vm395_vm7, %v2988_v47, %v2915_v18 }
 0xb1e   :  { %v2941_v27 = vsel %vm395_vm7, %v2940_v59, %v2922_v10  ;;  %v2952_v28 = vrot.slane %v2939_v26, 4  ;;  %v2943_v29 = vsel %vm395_vm7, %v2928_v14, %v2942_v63  ;;  %v2955_v30 = vsel %vm395_vm7, %v2939_v26, %v2954_v21 }
 0xb1f   :  { %v2947_v12 = vperm.slane %v2941_v27, %v4866_v1  ;;  %v2951_v34 = vperm.slane %v2943_v29, %v4866_v1  ;;  %v2963_v2 = vperm.slane %v2955_v30, %v4866_v1  ;;  %v2987_v37 = vperm.slane %v2983_v54, %v4853_v40 }
 0xb20   :  { %v2953_v38 = vsel %vm395_vm7, %v2952_v28, %v2933_v16  ;;  %v2993_v39 = vperm.slane %v2989_v24, %v4853_v40  ;;  %v2994_v41 = vrot.slane %v2982_v23, 4  ;;  %v2996_v42 = vrot.slane %v2976_v22, 4 }
 0xb21   :  { %v2959_v43 = vperm.slane %v2953_v38, %v4866_v1  ;;  %v2966_v8 = vrot.slane %v2947_v12, 4  ;;  %v2968_v48 = vrot.slane %v2963_v2, 4  ;;  %v3008_v50 = vrot.slane %v2987_v37, 4 }
 0xb22   :  { %v2995_v51 = vsel %vm395_vm7, %v2994_v41, %v2976_v22  ;;  %v3006_v20 = vrot.slane %v2993_v39, 4  ;;  %v2997_v52 = vsel %vm395_vm7, %v2982_v23, %v2996_v42  ;;  %v2970_v15 = vrot.slane %v2951_v34, 4 }
 0xb23   :  { %v2967_v36 = vsel %vm395_vm7, %v2959_v43, %v2966_v8  ;;  %v2969_v25 = vsel %vm395_vm7, %v2968_v48, %v2951_v34  ;;  %v3001_v32 = vperm.slane %v2995_v51, %v4866_v1  ;;  %v3009_v60 = vsel %vm395_vm7, %v2993_v39, %v3008_v50 }
 0xb24   :  { %3483 = vmatpush.msrb.mxu0 %v2967_v36  ;;  %3506 = vmatpush.msrb.mxu1 %v2969_v25  ;;  %v3007_v35 = vsel %vm395_vm7, %v3006_v20, %v2987_v37  ;;  %v2964_v62 = vrot.slane %v2959_v43, 4  ;;  %v3017_v4 = vperm.slane %v3009_v60, %v4866_v1  ;;  %v3005_v6 = vperm.slane %v2997_v52, %v4866_v1 }
 0xb25   :  { %v3013_v0 = vperm.slane %v3007_v35, %v4866_v1  ;;  %v3020_v3 = vrot.slane %v3001_v32, 4  ;;  %v2971_v46 = vsel %vm395_vm7, %v2963_v2, %v2970_v15 }
 0xb26   :  { %v2965_v58 = vsel %vm395_vm7, %v2964_v62, %v2947_v12  ;;  %v3022_v55 = vrot.slane %v3017_v4, 4  ;;  %v3024_v28 = vrot.slane %v3005_v6, 4 }
 0xb27   :  { %v3021_v61 = vsel %vm395_vm7, %v3013_v0, %v3020_v3  ;;  %3460 = vmatpush.msra.mxu2 %v2965_v58  ;;  %v3018_v33 = vrot.slane %v3013_v0, 4 }
 0xb28   :  { %3575 = vmatpush.msra.mxu0 %v3021_v61  ;;  %v3023_v47 = vsel %vm395_vm7, %v3022_v55, %v3005_v6  ;;  %v3025_v50 = vsel %vm395_vm7, %v3017_v4, %v3024_v28 }
 0xb29   :  { %3529 = vmatpush.msrb.mxu2 %v2971_v46  ;;  %v3019_v10 = vsel %vm395_vm7, %v3018_v33, %v3001_v32  ;;  %3598 = vmatpush.msra.mxu1 %v3023_v47 }
 0xb2a   :  { %3552 = vmatpush.msrb.mxu3 %v3019_v10 }
 0xb43   :  { %v3300_v14 = vpop.xlane.xlu0 %3299 }
 0xb44   :  { %4376 = vrcp.f32 %v3300_v14  ;;  %v3331_v59 = vand.u32 2147483647, %v3300_v14  ;;  %v3333_v63 = vand.u32 2147483648, %v3300_v14  ;;  %vm3327_vm2 = vweird.f32 %v3300_v14 }
 0xb46   :  { %vm3332_vm4 = vcmp.eq.f32.partialorder %v3331_v59, 8.507059e+37  ;;  %v3334_v24 = vor.u32 1.1754944e-38, %v3333_v63 }
 0xb47   :  { %v3306_v16 = vpop.xlane.xlu1 %3305 }
 0xb48   :  { %4378 = vrcp.f32 %v3306_v16  ;;  %v3363_v27 = vand.u32 2147483648, %v3306_v16  ;;  %v3361_v34 = vand.u32 2147483647, %v3306_v16  ;;  %vm3357_vm6 = vweird.f32 %v3306_v16 }
 0xb4a   :  { %v4377_v17 = vpop.eup %4376  ;;  %v3364_v41 = vor.u32 1.1754944e-38, %v3363_v27  ;;  %vm3362_vm10 = vcmp.eq.f32.partialorder %v3361_v34, 8.507059e+37 }
 0xb4b   :  { %v3323_v18 = vmul.f32 %v4377_v17, %v3300_v14  ;;  %v3309_v19 = vpop.xlane.xlu2 %3308  ;;  %vm3328_vm1 = vweird.f32 %v4377_v17 }
 0xb4c   :  { %4380 = vrcp.f32 %v3309_v19  ;;  %vm3329_vm3 = vmor %vm3327_vm2, %vm3328_vm1  ;;  %v3378_v48 = vand.u32 2147483648, %v3309_v19  ;;  %v3376_v52 = vand.u32 2147483647, %v3309_v19  ;;  %vm3372_vm12 = vweird.f32 %v3309_v19 }
 0xb4d   :  { %v3324_v49 = vsub.f32 1.0, %v3323_v18 }
 0xb4e   :  { %v4379_v26 = vpop.eup %4378  ;;  %v3379_v15 = vor.u32 1.1754944e-38, %v3378_v48  ;;  %vm3377_vm1 = vcmp.eq.f32.partialorder %v3376_v52, 8.507059e+37 }
 0xb4f   :  { %v3325_v21 = vmul.f32 %v4377_v17, %v3324_v49  ;;  %v3353_v22 = vmul.f32 %v4379_v26, %v3306_v16  ;;  %vm3358_vm5 = vweird.f32 %v4379_v26 }
 0xb50   :  { %vm3359_vm9 = vmor %vm3357_vm6, %vm3358_vm5 }
 0xb51   :  { %v3326_v23 = vadd.f32 %v4377_v17, %v3325_v21  ;;  %v3354_v54 = vsub.f32 1.0, %v3353_v22 }
 0xb52   :  { %v4381_v29 = vpop.eup %4380 }
 0xb53   :  { %v3330_v30 = vsel %vm3329_vm3, %v4377_v17, %v3326_v23  ;;  %v3355_v12 = vmul.f32 %v4379_v26, %v3354_v54  ;;  %v3368_v37 = vmul.f32 %v4381_v29, %v3309_v19  ;;  %v3303_v38 = vpop.xlane.xlu2 %3302  ;;  %vm3373_vm11 = vweird.f32 %v4381_v29 }
 0xb54   :  { %v3335_v2 = vsel %vm3332_vm4, %v3334_v24, %v3330_v30  ;;  %4382 = vrcp.f32 %v3303_v38  ;;  %vm3374_vm0 = vmor %vm3372_vm12, %vm3373_vm11  ;;  %v3348_v3 = vand.u32 2147483648, %v3303_v38  ;;  %v3346_v6 = vand.u32 2147483647, %v3303_v38 }
 0xb55   :  { %v3356_v39 = vadd.f32 %v4379_v26, %v3355_v12  ;;  %v3369_v42 = vsub.f32 1.0, %v3368_v37  ;;  %v3336_v43 = vmul.f32 %v5614_v9, %v3335_v2  ;;  %vm3342_vm3 = vweird.f32 %v3303_v38 }
 0xb56   :  { %v3349_v58 = vor.u32 1.1754944e-38, %v3348_v3  ;;  %vm3347_vm5 = vcmp.eq.f32.partialorder %v3346_v6, 8.507059e+37 }
 0xb57   :  { %v3360_v8 = vsel %vm3359_vm9, %v4379_v26, %v3356_v39  ;;  %v3370_v20 = vmul.f32 %v4381_v29, %v3369_v42  ;;  %4233 = vmatmul.msk.f32.vlgmr.msra.gmra.mxu2 %vm1095_vm8, %v3336_v43 }
 0xb58   :  { %v3365_v51 = vsel %vm3362_vm10, %v3364_v41, %v3360_v8  ;;  %3621 = vmatpush.msra.mxu2 %v3025_v50 }
 0xb59   :  { %v3366_v36 = vmul.f32 %v5618_v31, %v3365_v51  ;;  %v3371_v25 = vadd.f32 %v4381_v29, %v3370_v20 }
 0xb5a   :  { %v4383_v32 = vpop.eup %4382 }
 0xb5b   :  { %4235 = vmatmul.msk.f32.vlgmr.msrb.gmra.mxu1 %vm1095_vm8, %v3366_v36  ;;  %v3375_v9 = vsel %vm3374_vm0, %v4381_v29, %v3371_v25  ;;  %v3338_v35 = vmul.f32 %v4383_v32, %v3303_v38  ;;  %vm3343_vm2 = vweird.f32 %v4383_v32 }
 0xb5c   :  { %v3380_v60 = vsel %vm3377_vm1, %v3379_v15, %v3375_v9  ;;  %vm3344_vm4 = vmor %vm3342_vm3, %vm3343_vm2 }
 0xb5d   :  { %v3339_v62 = vsub.f32 1.0, %v3338_v35  ;;  %v3381_v0 = vmul.f32 %v5622_v7, %v3380_v60 }
 0xb5f   :  { %v3340_v4 = vmul.f32 %v4383_v32, %v3339_v62  ;;  %4236 = vmatmul.msk.f32.vlgmr.msrb.gmra.mxu2 %vm1095_vm8, %v3381_v0 }
 0xb61   :  { %v3341_v31 = vadd.f32 %v4383_v32, %v3340_v4 }
 0xb63   :  { %v3345_v61 = vsel %vm3344_vm4, %v4383_v32, %v3341_v31 }
 0xb64   :  { %v3350_v55 = vsel %vm3347_vm5, %v3349_v58, %v3345_v61 }
 0xb65   :  { %v3351_v46 = vmul.f32 %v5626_v5, %v3350_v55 }
 0xb67   :  { %v3318_v33 = vpop.xlane.xlu2 %3317  ;;  %4234 = vmatmul.msk.f32.vlgmr.msrb.gmra.mxu0 %vm1095_vm8, %v3351_v46 }
 0xb68   :  { %4384 = vrcp.f32 %v3318_v33  ;;  %v3421_v18 = vand.u32 2147483647, %v3318_v33  ;;  %v3423_v19 = vand.u32 2147483648, %v3318_v33  ;;  %vm3417_vm9 = vweird.f32 %v3318_v33 }
 0xb69   :  { %v3312_v47 = vpop.xlane.xlu0 %3311 }
 0xb6a   :  { %4386 = vrcp.f32 %v3312_v47  ;;  %v3393_v5 = vand.u32 2147483648, %v3312_v47  ;;  %v3391_v23 = vand.u32 2147483647, %v3312_v47  ;;  %v3424_v54 = vor.u32 1.1754944e-38, %v3423_v19 }
 0xb6b   :  { %vm3422_vm12 = vcmp.eq.f32.partialorder %v3421_v18, 8.507059e+37  ;;  %vm3387_vm0 = vweird.f32 %v3312_v47 }
 0xb6c   :  { %v3394_v29 = vor.u32 1.1754944e-38, %v3393_v5  ;;  %vm3392_vm2 = vcmp.eq.f32.partialorder %v3391_v23, 8.507059e+37 }
 0xb6e   :  { %v4385_v7 = vpop.eup %4384 }
 0xb6f   :  { %v3413_v10 = vmul.f32 %v4385_v7, %v3318_v33  ;;  %vm3418_vm6 = vweird.f32 %v4385_v7 }
 0xb70   :  { %v4387_v14 = vpop.eup %4386  ;;  %vm3419_vm11 = vmor %vm3417_vm9, %vm3418_vm6 }
 0xb71   :  { %v3414_v16 = vsub.f32 1.0, %v3413_v10  ;;  %v3383_v17 = vmul.f32 %v4387_v14, %v3312_v47  ;;  %v3321_v49 = vpop.xlane.xlu1 %3320  ;;  %vm3388_vm10 = vweird.f32 %v4387_v14 }
 0xb72   :  { %4388 = vrcp.f32 %v3321_v49  ;;  %v3315_v63 = vpop.xlane.xlu0 %3314  ;;  %vm3389_vm1 = vmor %vm3387_vm0, %vm3388_vm10  ;;  %v3438_v43 = vand.u32 2147483648, %v3321_v49  ;;  %v3436_v50 = vand.u32 2147483647, %v3321_v49  ;;  %vm3432_vm5 = vweird.f32 %v3321_v49 }
 0xb73   :  { %v3415_v26 = vmul.f32 %v4385_v7, %v3414_v16  ;;  %v3384_v59 = vsub.f32 1.0, %v3383_v17  ;;  %4390 = vrcp.f32 %v3315_v63  ;;  %v3408_v51 = vand.u32 2147483648, %v3315_v63 }
 0xb74   :  { %v3439_v36 = vor.u32 1.1754944e-38, %v3438_v43  ;;  %vm3402_vm9 = vweird.f32 %v3315_v63  ;;  %vm3437_vm10 = vcmp.eq.f32.partialorder %v3436_v50, 8.507059e+37 }
 0xb75   :  { %v3416_v21 = vadd.f32 %v4385_v7, %v3415_v26  ;;  %v3385_v22 = vmul.f32 %v4387_v14, %v3384_v59 }
 0xb77   :  { %v3420_v24 = vsel %vm3419_vm11, %v4385_v7, %v3416_v21  ;;  %v3386_v27 = vadd.f32 %v4387_v14, %v3385_v22 }
 0xb78   :  { %v3425_v28 = vsel %vm3422_vm12, %v3424_v54, %v3420_v24  ;;  %v4389_v30 = vpop.eup %4388 }
 0xb79   :  { %v3390_v12 = vsel %vm3389_vm1, %v4387_v14, %v3386_v27  ;;  %v3426_v34 = vmul.f32 %v5630_v44, %v3425_v28  ;;  %v4391_v2 = vpop.eup %4390  ;;  %v3428_v38 = vmul.f32 %v4389_v30, %v3321_v49  ;;  %vm3433_vm3 = vweird.f32 %v4389_v30 }
 0xb7a   :  { %v3395_v37 = vsel %vm3392_vm2, %v3394_v29, %v3390_v12  ;;  %v3398_v39 = vmul.f32 %v4391_v2, %v3315_v63  ;;  %vm3403_vm4 = vweird.f32 %v4391_v2  ;;  %v3406_v44 = vand.u32 2147483647, %v3315_v63  ;;  %vm3434_vm6 = vmor %vm3432_vm5, %vm3433_vm3 }
 0xb7b   :  { %4239 = vmatmul.msk.f32.vlgmr.msra.gmra.mxu1 %vm1095_vm8, %v3426_v34  ;;  %v3396_v41 = vmul.f32 %v5632_v57, %v3395_v37  ;;  %v3429_v42 = vsub.f32 1.0, %v3428_v38  ;;  %vm3404_vm11 = vmor %vm3402_vm9, %vm3403_vm4  ;;  %v3409_v57 = vor.u32 1.1754944e-38, %v3408_v51 }
 0xb7c   :  { %v3399_v8 = vsub.f32 1.0, %v3398_v39  ;;  %vm3407_vm12 = vcmp.eq.f32.partialorder %v3406_v44, 8.507059e+37 }
 0xb7d   :  { %4237 = vmatmul.msk.f32.vlgmr.msrb.gmra.mxu3 %vm1095_vm8, %v3396_v41  ;;  %v3430_v48 = vmul.f32 %v4389_v30, %v3429_v42 }
 0xb7e   :  { %v3400_v20 = vmul.f32 %v4391_v2, %v3399_v8 }
 0xb7f   :  { %v3431_v52 = vadd.f32 %v4389_v30, %v3430_v48 }
 0xb80   :  { %v3401_v25 = vadd.f32 %v4391_v2, %v3400_v20 }
 0xb81   :  { %v3435_v32 = vsel %vm3434_vm6, %v4389_v30, %v3431_v52 }
 0xb82   :  { %v3440_v15 = vsel %vm3437_vm10, %v3439_v36, %v3435_v32  ;;  %v3405_v9 = vsel %vm3404_vm11, %v4391_v2, %v3401_v25 }
 0xb83   :  { %v3410_v35 = vsel %vm3407_vm12, %v3409_v57, %v3405_v9  ;;  %v3441_v60 = vmul.f32 %v5638_v11, %v3440_v15 }
 0xb84   :  { %v3411_v62 = vmul.f32 %v5640_v45, %v3410_v35 }
 0xb85   :  { %4240 = vmatmul.msk.f32.vlgmr.msra.gmra.mxu2 %vm1095_vm8, %v3441_v60 }
 0xb86   :  { %4238 = vmatmul.msk.f32.vlgmr.msra.gmra.mxu0 %vm1095_vm8, %v3411_v62 }
 0xbd8   :  { %v3508_v0 = vpop.f32.mrf.mxu1 }
 0xbd9   :  { %v3626_v4 = vrot.slane %v3508_v0, 4 }
 0xbda   :  { %v3462_v3 = vpop.f32.mrf.mxu2 }
 0xbdb   :  { %v3628_v6 = vrot.slane %v3462_v3, 4  ;;  %v3627_v31 = vsel %vm395_vm7, %v3626_v4, %v3462_v3 }
 0xbdc   :  { %v3633_v61 = vperm.slane %v3627_v31, %v4853_v40 }
 0xbdd   :  { %v3629_v58 = vsel %vm395_vm7, %v3508_v0, %v3628_v6 }
 0xbde   :  { %v3637_v11 = vperm.slane %v3629_v58, %v4853_v40  ;;  %v3652_v7 = vrot.slane %v3633_v61, 4 }
 0xbe0   :  { %v3664_v16 = vrot.slane %v3637_v11, 4 }
 0xbe2   :  { %v3531_v55 = vpop.f32.mrf.mxu2 }
 0xbe3   :  { %v3638_v33 = vrot.slane %v3531_v55, 4 }
 0xbe4   :  { %v3485_v46 = vpop.f32.mrf.mxu0 }
 0xbe5   :  { %v3639_v45 = vsel %vm395_vm7, %v3638_v33, %v3485_v46  ;;  %v3640_v47 = vrot.slane %v3485_v46, 4 }
 0xbe6   :  { %v3645_v10 = vperm.slane %v3639_v45, %v4853_v40 }
 0xbe7   :  { %v3641_v14 = vsel %vm395_vm7, %v3531_v55, %v3640_v47 }
 0xbe8   :  { %v3649_v17 = vperm.slane %v3641_v14, %v4853_v40  ;;  %v3650_v18 = vrot.slane %v3645_v10, 4  ;;  %v3653_v19 = vsel %vm395_vm7, %v3645_v10, %v3652_v7 }
 0xbe9   :  { %v3661_v49 = vperm.slane %v3653_v19, %v4866_v1 }
 0xbea   :  { %v3651_v26 = vsel %vm395_vm7, %v3650_v18, %v3633_v61  ;;  %v3662_v59 = vrot.slane %v3649_v17, 4  ;;  %v3665_v63 = vsel %vm395_vm7, %v3649_v17, %v3664_v16 }
 0xbeb   :  { %v3657_v5 = vperm.slane %v3651_v26, %v4866_v1  ;;  %v3673_v21 = vperm.slane %v3665_v63, %v4866_v1  ;;  %v3676_v22 = vrot.slane %v3661_v49, 4 }
 0xbec   :  { %v3663_v23 = vsel %vm395_vm7, %v3662_v59, %v3637_v11 }
 0xbed   :  { %v3669_v54 = vperm.slane %v3663_v23, %v4866_v1  ;;  %v3674_v24 = vrot.slane %v3657_v5, 4  ;;  %v3677_v27 = vsel %vm395_vm7, 0.0, %v3676_v22  ;;  %v3680_v28 = vrot.slane %v3673_v21, 4 }
 0xbee   :  { %v3738_v29 = vsel %vm395_vm7, %v3676_v22, %v3657_v5  ;;  %v3743_v30 = vrot.slane %v3677_v27, 4 }
 0xbef   :  { %v3675_v12 = vsel %vm395_vm7, 0.0, %v3674_v24  ;;  %v3681_v34 = vsel %vm395_vm7, 0.0, %v3680_v28  ;;  %v3742_v2 = vperm.slane %v3738_v29, %v4853_v40  ;;  %v3678_v37 = vrot.slane %v3669_v54, 4 }
 0xbf0   :  { %v3754_v38 = vrot.slane %v3681_v34, 4  ;;  %v3744_v39 = vsel %vm395_vm7, %v3743_v30, %v3675_v12  ;;  %v3749_v41 = vsel %vm395_vm7, %v3680_v28, %v3669_v54 }
 0xbf1   :  { %v3679_v42 = vsel %vm395_vm7, 0.0, %v3678_v37  ;;  %v3748_v43 = vperm.slane %v3744_v39, %v4853_v40  ;;  %v3753_v8 = vperm.slane %v3749_v41, %v4853_v40  ;;  %v3762_v48 = vrot.slane %v3742_v2, 4 }
 0xbf2   :  { %v3755_v50 = vsel %vm395_vm7, %v3754_v38, %v3679_v42 }
 0xbf3   :  { %v3759_v51 = vperm.slane %v3755_v50, %v4853_v40  ;;  %v3763_v20 = vsel %vm395_vm7, %v3748_v43, %v3762_v48  ;;  %v3774_v44 = vrot.slane %v3753_v8, 4  ;;  %v3760_v52 = vrot.slane %v3748_v43, 4 }
 0xbf4   :  { %v3771_v36 = vperm.slane %v3763_v20, %v4866_v1 }
 0xbf5   :  { %v3775_v25 = vsel %vm395_vm7, %v3759_v51, %v3774_v44  ;;  %v3761_v32 = vsel %vm395_vm7, %v3760_v52, %v3742_v2  ;;  %v3772_v57 = vrot.slane %v3759_v51, 4 }
 0xbf6   :  { %v3783_v15 = vperm.slane %v3775_v25, %v4866_v1  ;;  %v3790_v9 = vrot.slane %v3771_v36, 4  ;;  %v3767_v35 = vperm.slane %v3761_v32, %v4866_v1 }
 0xbf7   :  { %v3773_v60 = vsel %vm395_vm7, %v3772_v57, %v3753_v8 }
 0xbf8   :  { %v3791_v62 = vsel %vm395_vm7, %v3783_v15, %v3790_v9  ;;  %v3788_v0 = vrot.slane %v3783_v15, 4  ;;  %v3779_v3 = vperm.slane %v3773_v60, %v4866_v1  ;;  %v3786_v4 = vrot.slane %v3767_v35, 4  ;;  %v3600_v33 = vpop.f32.mrf.mxu1 }
 0xbf9   :  { %3864 = vrot.lane.b32.xlu0 %v3791_v62, %s4658_s21  ;;  %v3682_v46 = vrot.slane %v3600_v33, 4 }
 0xbfa   :  { %v3789_v6 = vsel %vm395_vm7, %v3788_v0, %v3771_v36  ;;  %v3784_v31 = vrot.slane %v3779_v3, 4  ;;  %v3787_v58 = vsel %vm395_vm7, %v3779_v3, %v3786_v4 }
 0xbfb   :  { %3856 = vrot.lane.b32.xlu2 %v3789_v6, %s4660_s28  ;;  %3848 = vrot.lane.b32.xlu1 %v3787_v58, %s4664_s23 }
 0xbfc   :  { %v5789_v61 = vsel %vm395_vm7, %v3784_v31, %v3767_v35 }
 0xc00   :  { %v3554_v55 = vpop.f32.mrf.mxu3 }
 0xc01   :  { %v3684_v11 = vrot.slane %v3554_v55, 4  ;;  %v3683_v7 = vsel %vm395_vm7, %v3682_v46, %v3554_v55 }
 0xc02   :  { %v3689_v16 = vperm.slane %v3683_v7, %v4853_v40 }
 0xc03   :  { %v3685_v45 = vsel %vm395_vm7, %v3600_v33, %v3684_v11  ;;  %v3577_v47 = vpop.f32.mrf.mxu0 }
 0xc04   :  { %v3693_v10 = vperm.slane %v3685_v45, %v4853_v40  ;;  %v3696_v14 = vrot.slane %v3577_v47, 4  ;;  %v3708_v63 = vrot.slane %v3689_v16, 4 }
 0xc06   :  { %v3720_v49 = vrot.slane %v3693_v10, 4 }
 0xc08   :  { %v3623_v17 = vpop.f32.mrf.mxu2 }
 0xc09   :  { %v3694_v18 = vrot.slane %v3623_v17, 4  ;;  %v3697_v19 = vsel %vm395_vm7, %v3623_v17, %v3696_v14  ;;  %v3879_v14 = vld [vmem:[#allocation10 + $0x30] sm:$0xff] }
 0xc0a   :  { %v3705_v26 = vperm.slane %v3697_v19, %v4853_v40 }
 0xc0b   :  { %v3695_v59 = vsel %vm395_vm7, %v3694_v18, %v3577_v47 }
 0xc0c   :  { %v3701_v5 = vperm.slane %v3695_v59, %v4853_v40  ;;  %v3718_v21 = vrot.slane %v3705_v26, 4  ;;  %v3721_v22 = vsel %vm395_vm7, %v3705_v26, %v3720_v49 }
 0xc0d   :  { %v3729_v23 = vperm.slane %v3721_v22, %v4866_v1 }
 0xc0e   :  { %v3706_v54 = vrot.slane %v3701_v5, 4  ;;  %v3709_v24 = vsel %vm395_vm7, %v3701_v5, %v3708_v63  ;;  %v3719_v27 = vsel %vm395_vm7, %v3718_v21, %v3693_v10  ;;  %v3880_v10 = vld [vmem:[#allocation10 + $0x38] sm:$0xff] }
 0xc0f   :  { %v3717_v28 = vperm.slane %v3709_v24, %v4866_v1  ;;  %v3725_v29 = vperm.slane %v3719_v27, %v4866_v1  ;;  %v3736_v30 = vrot.slane %v3729_v23, 4  ;;  %3904 = vmatpush.msra.mxu3 %v3880_v10 }
 0xc10   :  { %v3707_v12 = vsel %vm395_vm7, %v3706_v54, %v3689_v16  ;;  %v3878_v16 = vld [vmem:[#allocation10 + $0x28] sm:$0xff] }
 0xc11   :  { %v3713_v34 = vperm.slane %v3707_v12, %v4866_v1  ;;  %v3732_v2 = vrot.slane %v3717_v28, 4  ;;  %v3734_v37 = vrot.slane %v3725_v29, 4  ;;  %v3737_v38 = vsel %vm395_vm7, 0.0, %v3736_v30  ;;  %3905 = vmatpush.msra.mxu3 %v3879_v14  ;;  %v4036_v14 = vld [vmem:[#allocation14 + $0xf8] sm:$0xff] }
 0xc12   :  { %v3803_v39 = vsel %vm395_vm7, %v3736_v30, %v3725_v29  ;;  %v3808_v41 = vrot.slane %v3737_v38, 4  ;;  %4042 = vmatpush.msrb.mxu1 %v4036_v14  ;;  %v4125_v14 = vld [vmem:[#allocation16 + $0x20] sm:$0xff] }
 0xc13   :  { %v3733_v42 = vsel %vm395_vm7, 0.0, %v3732_v2  ;;  %v3735_v43 = vsel %vm395_vm7, 0.0, %v3734_v37  ;;  %v3807_v8 = vperm.slane %v3803_v39, %v4853_v40  ;;  %v3730_v48 = vrot.slane %v3713_v34, 4  ;;  %3906 = vmatpush.msra.mxu3 %v3878_v16  ;;  %v4035_v16 = vld [vmem:[#allocation14 + $0xf0] sm:$0xff] }
 0xc14   :  { %v3797_v50 = vrot.slane %v3733_v42, 4  ;;  %v3792_v51 = vsel %vm395_vm7, %v3732_v2, %v3713_v34  ;;  %v3809_v20 = vsel %vm395_vm7, %v3808_v41, %v3735_v43  ;;  %v3989_v41 = vld [vmem:[#allocation13 + $0xf8] sm:$0xff]  ;;  %4043 = vmatpush.msrb.mxu1 %v4035_v16 }
 0xc15   :  { %v3731_v44 = vsel %vm395_vm7, 0.0, %v3730_v48  ;;  %v3796_v52 = vperm.slane %v3792_v51, %v4853_v40  ;;  %v3813_v36 = vperm.slane %v3809_v20, %v4853_v40  ;;  %v3828_v25 = vrot.slane %v3807_v8, 4  ;;  %3995 = vmatpush.msrb.mxu0 %v3989_v41  ;;  %v3986_v51 = vld [vmem:[#allocation13 + $0xe0] sm:$0xff]  ;;  %v3985_v20 = vld [vmem:[#allocation13 + $0xd8] sm:$0xff] }
 0xc16   :  { %v3798_v32 = vsel %vm395_vm7, %v3797_v50, %v3731_v44  ;;  %v3987_v50 = vld [vmem:[#allocation13 + $0xe8] sm:$0xff]  ;;  %v3984_v44 = vld [vmem:[#allocation13 + $0xd0] sm:$0xff]  ;;  %v4124_v16 = vld [vmem:[#allocation16 + $0x18] sm:$0xff] }
 0xc17   :  { %v3802_v57 = vperm.slane %v3798_v32, %v4853_v40  ;;  %v3816_v15 = vrot.slane %v3796_v52, 4  ;;  %v3829_v9 = vsel %vm395_vm7, %v3813_v36, %v3828_v25  ;;  %v3826_v35 = vrot.slane %v3813_v36, 4  ;;  %v3982_v36 = vld [vmem:[#allocation13 + $0xc0] sm:$0xff]  ;;  %v3981_v25 = vld [vmem:[#allocation13 + $0xb8] sm:$0xff]  ;;  %v3980_v32 = vld [vmem:[#allocation13 + $0xb0] sm:$0xff] }
 0xc18   :  { %v3837_v60 = vperm.slane %v3829_v9, %v4866_v1  ;;  %v3977_v9 = vld [vmem:[#allocation13 + $0x98] sm:$0xff] }
 0xc19   :  { %v3817_v62 = vsel %vm395_vm7, %v3802_v57, %v3816_v15  ;;  %v3814_v0 = vrot.slane %v3802_v57, 4  ;;  %v3827_v3 = vsel %vm395_vm7, %v3826_v35, %v3807_v8  ;;  %v3979_v57 = vld [vmem:[#allocation13 + $0xa8] sm:$0xff]  ;;  %v3978_v15 = vld [vmem:[#allocation13 + $0xa0] sm:$0xff]  ;;  %v3976_v35 = vld [vmem:[#allocation13 + $0x90] sm:$0xff] }
 0xc1a   :  { %v3825_v4 = vperm.slane %v3817_v62, %v4866_v1  ;;  %v3842_v6 = vrot.slane %v3837_v60, 4  ;;  %v3833_v31 = vperm.slane %v3827_v3, %v4866_v1  ;;  %v3975_v62 = vld [vmem:[#allocation13 + $0x88] sm:$0xff]  ;;  %v3974_v3 = vld [vmem:[#allocation13 + $0x80] sm:$0xff] }
 0xc1b   :  { %v3815_v58 = vsel %vm395_vm7, %v3814_v0, %v3796_v52  ;;  %v3983_v52 = vld [vmem:[#allocation13 + $0xc8] sm:$0xff] }
 0xc1c   :  { %v3843_v40 = vsel %vm395_vm7, %v3842_v6, %v3825_v4  ;;  %v3844_v55 = vrot.slane %v3825_v4, 4  ;;  %v3821_v33 = vperm.slane %v3815_v58, %v4866_v1  ;;  %v3838_v11 = vrot.slane %v3833_v31, 4  ;;  %v3877_v1 = vld [vmem:[#allocation10 + $0x20] sm:$0xff] }
 0xc1d   :  { %3858 = vrot.lane.b32.xlu0 %v3843_v40, %s4660_s28  ;;  %3907 = vmatpush.msra.mxu3 %v3877_v1  ;;  %v4034_v1 = vld [vmem:[#allocation14 + $0xe8] sm:$0xff] }
 0xc1e   :  { %v3845_v46 = vsel %vm395_vm7, %v3837_v60, %v3844_v55  ;;  %v3840_v45 = vrot.slane %v3821_v33, 4  ;;  %v3839_v47 = vsel %vm395_vm7, %v3838_v11, %v3821_v33  ;;  %v4309_v11 = vld [vmem:[%s5903_s7 + $0x1] ss:$0 sm:$0xff]  ;;  %4044 = vmatpush.msrb.mxu1 %v4034_v1  ;;  %v4123_v1 = vld [vmem:[#allocation16 + $0x10] sm:$0xff] }
 0xc1f   :  { %3866 = vrot.lane.b32.xlu2 %v3845_v46, %s4658_s21 }
 0xc20   :  { %v3841_v7 = vsel %vm395_vm7, %v3833_v31, %v3840_v45 }
 0xc21   :  { %3850 = vrot.lane.b32.xlu1 %v3841_v7, %s4664_s23 }
 0xc55   :  { %v3857_v18 = vpop.permute.xlu2 %3856 }
 0xc6b   :  { %v3865_v49 = vpop.permute.xlu0 %3864 }
 0xc6d   :  { %v3849_v17 = vpop.permute.xlu1 %3848 }
 0xc6e   :  { %v3870_v19 = vsel %vm1095_vm8, %v5789_v61, %v3849_v17  ;;  %v4308_v61 = vld [vmem:[%s5902_s6 + $0x1] ss:$0 sm:$0xff] }
 0xc6f   :  { %v3872_v26 = vsel %vm1942_vm13, %v3870_v19, %v3857_v18  ;;  %v4033_v19 = vld [vmem:[#allocation14 + $0xe0] sm:$0xff] }
 0xc70   :  { %v3874_v59 = vsel %vm1945_vm14, %v3872_v26, %v3865_v49  ;;  %v4032_v26 = vld [vmem:[#allocation14 + $0xd8] sm:$0xff]  ;;  %4045 = vmatpush.msrb.mxu1 %v4033_v19 }
 0xc71   :  { %4242 = vmatmul.msk.f32.vlgmr.msra.gmra.mxu3 %vm1956_vm15, %v3874_v59  ;;  %v4031_v59 = vld [vmem:[#allocation14 + $0xd0] sm:$0xff] }
 0xc72   :  { %4046 = vmatpush.msrb.mxu1 %v4032_v26 }
 0xc74   :  { %4047 = vmatpush.msrb.mxu1 %v4031_v59 }
 0xc79   :  { %v3867_v22 = vpop.permute.xlu2 %3866 }
 0xc8f   :  { %v3859_v5 = vpop.permute.xlu0 %3858 }
 0xc93   :  { %v3851_v63 = vpop.permute.xlu1 %3850 }
 0xc94   :  { %v3871_v21 = vsel %vm1095_vm8, %v3839_v47, %v3851_v63  ;;  %v4310_v47 = vld [vmem:[#allocation11 + $0x1] ss:$0 sm:$0xff]  ;;  %v4030_v63 = vld [vmem:[#allocation14 + $0xc8] sm:$0xff] }
 0xc95   :  { %v3873_v23 = vsel %vm1942_vm13, %v3871_v21, %v3859_v5  ;;  %v4029_v5 = vld [vmem:[#allocation14 + $0xc0] sm:$0xff]  ;;  %4048 = vmatpush.msrb.mxu1 %v4030_v63 }
 0xc96   :  { %v3875_v54 = vsel %vm1945_vm14, %v3873_v23, %v3867_v22  ;;  %v4028_v22 = vld [vmem:[#allocation14 + $0xb8] sm:$0xff] }
 0xc97   :  { %4243 = vmatmul.msk.f32.gmra.mxu3 %vm1956_vm15, %v3875_v54  ;;  %4049 = vmatpush.msrb.mxu1 %v4029_v5  ;;  %v4027_v54 = vld [vmem:[#allocation14 + $0xb0] sm:$0xff] }
 0xc99   :  { %4050 = vmatpush.msrb.mxu1 %v4028_v22 }
 0xc9b   :  { %4051 = vmatpush.msrb.mxu1 %v4027_v54  ;;  %v4313_v54 = vld [vmem:[%s5909_s13] ss:$0 sm:$0xff] }
 0xcf4   :  { %v3909_v24 = vpop.f32.mrf.mxu3 }
 0xcf5   :  { %v3910_v27 = vadd.f32 %v4308_v61, %v3909_v24  ;;  %v4026_v24 = vld [vmem:[#allocation14 + $0xa8] sm:$0xff] }
 0xcf6   :  { %4052 = vmatpush.msrb.mxu1 %v4026_v24 }
 0xcf7   :  { %v5847_v28 = vadd.f32 %v3910_v27, %v5367_v53  ;;  %v3988_v53 = vld [vmem:[#allocation13 + $0xf0] sm:$0xff] }
 0xcf8   :  { %3996 = vmatpush.msrb.mxu0 %v3988_v53  ;;  %v4023_v53 = vld [vmem:[#allocation14 + $0x90] sm:$0xff] }
 0xcf9   :  { %3921 = vadd.xlane.f32.xlu1 %v5847_v28 }
 0xcfa   :  { %3997 = vmatpush.msrb.mxu0 %v3987_v50 }
 0xcfc   :  { %3998 = vmatpush.msrb.mxu0 %v3986_v51 }
 0xcfe   :  { %3999 = vmatpush.msrb.mxu0 %v3985_v20 }
 0xd00   :  { %4000 = vmatpush.msrb.mxu0 %v3984_v44 }
 0xd02   :  { %4001 = vmatpush.msrb.mxu0 %v3983_v52  ;;  %v4312_v52 = vld [vmem:[%s5908_s12 + $0x1] ss:$0 sm:$0xff] }
 0xd04   :  { %4002 = vmatpush.msrb.mxu0 %v3982_v36 }
 0xd06   :  { %4003 = vmatpush.msrb.mxu0 %v3981_v25 }
 0xd08   :  { %4004 = vmatpush.msrb.mxu0 %v3980_v32 }
 0xd0a   :  { %4005 = vmatpush.msrb.mxu0 %v3979_v57 }
 0xd0c   :  { %4006 = vmatpush.msrb.mxu0 %v3978_v15 }
 0xd0e   :  { %4007 = vmatpush.msrb.mxu0 %v3977_v9 }
 0xd10   :  { %4008 = vmatpush.msrb.mxu0 %v3976_v35 }
 0xd12   :  { %4009 = vmatpush.msrb.mxu0 %v3975_v62 }
 0xd14   :  { %4010 = vmatpush.msrb.mxu0 %v3974_v3 }
 0xd1a   :  { %v3912_v29 = vpop.f32.mrf.mxu3 }
 0xd1b   :  { %v3913_v30 = vadd.f32 %v4308_v61, %v3912_v29  ;;  %v4025_v29 = vld [vmem:[#allocation14 + $0xa0] sm:$0xff] }
 0xd1c   :  { %4053 = vmatpush.msrb.mxu1 %v4025_v29 }
 0xd1d   :  { %v5851_v12 = vadd.f32 %v3913_v30, %v5371_v56 }
 0xd1f   :  { %3923 = vadd.xlane.f32.xlu0 %v5851_v12 }
 0xd6c   :  { %v3922_v34 = vpop.xlane.xlu1 %3921 }
 0xd6d   :  { %v3925_v2 = vmul.f32 0.03125, %v3922_v34  ;;  %v4024_v34 = vld [vmem:[#allocation14 + $0x98] sm:$0xff] }
 0xd6e   :  { %4054 = vmatpush.msrb.mxu1 %v4024_v34 }
 0xd6f   :  { %v3927_v37 = vsub.f32 %v5847_v28, %v3925_v2 }
 0xd70   :  { %4055 = vmatpush.msrb.mxu1 %v4023_v53 }
 0xd71   :  { %v3929_v38 = vmul.f32 %v4814_v13, %v3927_v37 }
 0xd73   :  { %v3931_v39 = vmul.f32 %v3929_v38, %v3929_v38 }
 0xd75   :  { %3933 = vadd.xlane.f32.xlu2 %v3931_v39 }
 0xd92   :  { %v3924_v42 = vpop.xlane.xlu0 %3923 }
 0xd93   :  { %v3926_v43 = vmul.f32 0.03125, %v3924_v42  ;;  %v4022_v42 = vld [vmem:[#allocation14 + $0x88] sm:$0xff] }
 0xd94   :  { %4056 = vmatpush.msrb.mxu1 %v4022_v42 }
 0xd95   :  { %v3928_v8 = vsub.f32 %v5851_v12, %v3926_v43  ;;  %v4021_v43 = vld [vmem:[#allocation14 + $0x80] sm:$0xff] }
 0xd96   :  { %4057 = vmatpush.msrb.mxu1 %v4021_v43 }
 0xd97   :  { %v5858_v56 = vmul.f32 %v4814_v13, %v3928_v8  ;;  %v4311_v8 = vld [vmem:[%s5906_s10 + $0x1] ss:$0 sm:$0xff] }
 0xd99   :  { %v3932_v48 = vmul.f32 %v5858_v56, %v5858_v56 }
 0xd9b   :  { %3935 = vadd.xlane.f32.xlu1 %v3932_v48 }
 0xde8   :  { %v3934_v60 = vpop.xlane.xlu2 %3933 }
 0xde9   :  { %v3937_v0 = vmul.f32 0.03125, %v3934_v60 }
 0xdeb   :  { %v3939_v4 = vadd.f32 1e-05, %v3937_v0 }
 0xded   :  { %4392 = vrsqrt.f32 %v3939_v4  ;;  %vm3947_vm8 = vweird.f32 %v3939_v4 }
 0xdf3   :  { %v4393_v6 = vpop.eup %4392 }
 0xdf4   :  { %v3942_v31 = vmul.f32 %v4393_v6, %v3939_v4  ;;  %vm3948_vm7 = vweird.f32 %v4393_v6  ;;  %v4136_v4 = vld [vmem:[#allocation16 + $0x78] sm:$0xff] }
 0xdf5   :  { %vm3949_vm13 = vmor %vm3947_vm8, %vm3948_vm7  ;;  %4141 = vmatpush.msrb.mxu2 %v4136_v4 }
 0xdf6   :  { %v3943_v58 = vmul.f32 %v4393_v6, %v3942_v31 }
 0xdf8   :  { %v3944_v40 = vmul.f32 0.5, %v3943_v58 }
 0xdfa   :  { %v3945_v55 = vsub.f32 1.5, %v3944_v40 }
 0xdfc   :  { %v3946_v33 = vmul.f32 %v4393_v6, %v3945_v55  ;;  %v4134_v55 = vld [vmem:[#allocation16 + $0x68] sm:$0xff] }
 0xdfe   :  { %v3950_v46 = vsel %vm3949_vm13, %v4393_v6, %v3946_v33  ;;  %v4135_v6 = vld [vmem:[#allocation16 + $0x70] sm:$0xff]  ;;  %v4133_v33 = vld [vmem:[#allocation16 + $0x60] sm:$0xff] }
 0xdff   :  { %v3961_v45 = vmul.f32 %v3950_v46, %v3929_v38  ;;  %4142 = vmatpush.msrb.mxu2 %v4135_v6  ;;  %v4131_v46 = vld [vmem:[#allocation16 + $0x50] sm:$0xff] }
 0xe01   :  { %v3966_v7 = vmul.f32 %v4309_v11, %v3961_v45  ;;  %4143 = vmatpush.msrb.mxu2 %v4134_v55  ;;  %v4130_v45 = vld [vmem:[#allocation16 + $0x48] sm:$0xff] }
 0xe03   :  { %v3971_v10 = vadd.f32 %v4310_v47, %v3966_v7  ;;  %4144 = vmatpush.msrb.mxu2 %v4133_v33  ;;  %v4128_v7 = vld [vmem:[#allocation16 + $0x38] sm:$0xff] }
 0xe05   :  { %4011 = vmatmul.f32.vlgmr.msrb.gmra.mxu0 %v3971_v10  ;;  %v4126_v10 = vld [vmem:[#allocation16 + $0x28] sm:$0xff] }
 0xe0e   :  { %v3936_v17 = vpop.xlane.xlu1 %3935 }
 0xe0f   :  { %v3938_v18 = vmul.f32 0.03125, %v3936_v17 }
 0xe11   :  { %v3940_v49 = vadd.f32 1e-05, %v3938_v18  ;;  %v4122_v18 = vld [vmem:[#allocation16 + $0x8] sm:$0xff] }
 0xe13   :  { %4394 = vrsqrt.f32 %v3940_v49  ;;  %vm3957_vm15 = vweird.f32 %v3940_v49 }
 0xe19   :  { %v4395_v21 = vpop.eup %4394 }
 0xe1a   :  { %v3952_v23 = vmul.f32 %v4395_v21, %v3940_v49  ;;  %vm3958_vm14 = vweird.f32 %v4395_v21  ;;  %v4121_v49 = vld [vmem:[#allocation16] sm:$0xff] }
 0xe1b   :  { %vm3959_vm0 = vmor %vm3957_vm15, %vm3958_vm14 }
 0xe1c   :  { %v3953_v61 = vmul.f32 %v4395_v21, %v3952_v23 }
 0xe1e   :  { %v3954_v27 = vmul.f32 0.5, %v3953_v61 }
 0xe20   :  { %v3955_v30 = vsub.f32 1.5, %v3954_v27  ;;  %v4314_v27 = vld [vmem:[%s5910_s14] ss:$0 sm:$0xff] }
 0xe22   :  { %v3956_v2 = vmul.f32 %v4395_v21, %v3955_v30 }
 0xe24   :  { %v3960_v37 = vsel %vm3959_vm0, %v4395_v21, %v3956_v2 }
 0xe25   :  { %v3962_v38 = vmul.f32 %v3960_v37, %v5858_v56 }
 0xe27   :  { %v3967_v39 = vmul.f32 %v4309_v11, %v3962_v38  ;;  %v4132_v11 = vld [vmem:[#allocation16 + $0x58] sm:$0xff] }
 0xe28   :  { %4145 = vmatpush.msrb.mxu2 %v4132_v11 }
 0xe29   :  { %v3972_v41 = vadd.f32 %v4310_v47, %v3967_v39  ;;  %v4129_v47 = vld [vmem:[#allocation16 + $0x40] sm:$0xff] }
 0xe2a   :  { %4146 = vmatpush.msrb.mxu2 %v4131_v46 }
 0xe2b   :  { %4014 = vmatmul.f32.gmra.mxu0 %v3972_v41 }
 0xe2c   :  { %4147 = vmatpush.msrb.mxu2 %v4130_v45 }
 0xe2e   :  { %4148 = vmatpush.msrb.mxu2 %v4129_v47 }
 0xe30   :  { %4149 = vmatpush.msrb.mxu2 %v4128_v7 }
 0xe82   :  { %v4012_v48 = vpop.f32.mrf.mxu0 }
 0xe83   :  { %v4013_v50 = vadd.f32 %v4311_v8, %v4012_v48 }
 0xe85   :  { %v4018_v51 = vmax.f32 %v4013_v50, 0.0 }
 0xe87   :  { %4058 = vmatmul.f32.vlgmr.msrb.gmra.mxu1 %v4018_v51 }
 0xea8   :  { %v4015_v20 = vpop.f32.mrf.mxu0 }
 0xea9   :  { %v4016_v44 = vadd.f32 %v4311_v8, %v4015_v20  ;;  %v4315_v20 = vld [vmem:[%s5912_s16] ss:$0 sm:$0xff] }
 0xeab   :  { %v4019_v56 = vmax.f32 %v4016_v44, 0.0 }
 0xead   :  { %4061 = vmatmul.f32.gmra.mxu1 %v4019_v56 }
 0xf04   :  { %v4059_v36 = vpop.f32.mrf.mxu1 }
 0xf05   :  { %v4060_v25 = vadd.f32 %v4312_v52, %v4059_v36 }
 0xf07   :  { %v4065_v32 = vadd.f32 %v4060_v25, %v5847_v28 }
 0xf09   :  { %4069 = vadd.xlane.f32.xlu0 %v4065_v32 }
 0xf2a   :  { %v4062_v57 = vpop.f32.mrf.mxu1 }
 0xf2b   :  { %v4063_v15 = vadd.f32 %v4312_v52, %v4062_v57 }
 0xf2d   :  { %v4066_v9 = vadd.f32 %v4063_v15, %v5851_v12 }
 0xf2f   :  { %4071 = vadd.xlane.f32.xlu2 %v4066_v9 }
 0xf7c   :  { %v4070_v35 = vpop.xlane.xlu0 %4069 }
 0xf7d   :  { %v4073_v60 = vmul.f32 0.03125, %v4070_v35 }
 0xf7f   :  { %v4075_v62 = vsub.f32 %v4065_v32, %v4073_v60 }
 0xf81   :  { %v4077_v0 = vmul.f32 %v4814_v13, %v4075_v62 }
 0xf83   :  { %v4079_v3 = vmul.f32 %v4077_v0, %v4077_v0 }
 0xf85   :  { %4081 = vadd.xlane.f32.xlu1 %v4079_v3 }
 0xfa2   :  { %v4072_v31 = vpop.xlane.xlu2 %4071 }
 0xfa3   :  { %v4074_v58 = vmul.f32 0.03125, %v4072_v31 }
 0xfa5   :  { %v4076_v28 = vsub.f32 %v4066_v9, %v4074_v58 }
 0xfa7   :  { %v5876_v40 = vmul.f32 %v4814_v13, %v4076_v28  ;;  %v4127_v13 = vld [vmem:[#allocation16 + $0x30] sm:$0xff] }
 0xfa8   :  { %4150 = vmatpush.msrb.mxu2 %v4127_v13 }
 0xfa9   :  { %v4080_v12 = vmul.f32 %v5876_v40, %v5876_v40 }
 0xfaa   :  { %4151 = vmatpush.msrb.mxu2 %v4126_v10 }
 0xfab   :  { %4083 = vadd.xlane.f32.xlu0 %v4080_v12 }
 0xfac   :  { %4152 = vmatpush.msrb.mxu2 %v4125_v14 }
 0xfae   :  { %4153 = vmatpush.msrb.mxu2 %v4124_v16 }
 0xfb0   :  { %4154 = vmatpush.msrb.mxu2 %v4123_v1 }
 0xfb2   :  { %4155 = vmatpush.msrb.mxu2 %v4122_v18 }
 0xfb4   :  { %4156 = vmatpush.msrb.mxu2 %v4121_v49 }
 0xff8   :  { %v4082_v17 = vpop.xlane.xlu1 %4081 }
 0xff9   :  { %v4085_v19 = vmul.f32 0.03125, %v4082_v17 }
 0xffb   :  { %v4087_v26 = vadd.f32 1e-05, %v4085_v19 }
 0xffd   :  { %4396 = vrsqrt.f32 %v4087_v26  ;;  %vm4095_vm2 = vweird.f32 %v4087_v26 }
0x1003   :  { %v4397_v59 = vpop.eup %4396 }
0x1004   :  { %v4090_v63 = vmul.f32 %v4397_v59, %v4087_v26  ;;  %vm4096_vm1 = vweird.f32 %v4397_v59 }
0x1005   :  { %vm4097_vm3 = vmor %vm4095_vm2, %vm4096_vm1 }
0x1006   :  { %v4091_v5 = vmul.f32 %v4397_v59, %v4090_v63 }
0x1008   :  { %v4092_v21 = vmul.f32 0.5, %v4091_v5 }
0x100a   :  { %v4093_v22 = vsub.f32 1.5, %v4092_v21 }
0x100c   :  { %v4094_v23 = vmul.f32 %v4397_v59, %v4093_v22 }
0x100e   :  { %v4098_v61 = vsel %vm4097_vm3, %v4397_v59, %v4094_v23 }
0x100f   :  { %v4109_v24 = vmul.f32 %v4098_v61, %v4077_v0 }
0x1011   :  { %v4114_v29 = vmul.f32 %v4313_v54, %v4109_v24 }
0x1013   :  { %v4119_v30 = vadd.f32 %v4314_v27, %v4114_v29 }
0x1015   :  { %4157 = vmatmul.f32.vlgmr.msrb.gmra.mxu2 %v4119_v30 }
0x101e   :  { %v4084_v34 = vpop.xlane.xlu0 %4083 }
0x101f   :  { %v4086_v2 = vmul.f32 0.03125, %v4084_v34 }
0x1021   :  { %v4088_v37 = vadd.f32 1e-05, %v4086_v2 }
0x1023   :  { %4398 = vrsqrt.f32 %v4088_v37  ;;  %vm4105_vm5 = vweird.f32 %v4088_v37 }
0x1029   :  { %v4399_v38 = vpop.eup %4398 }
0x102a   :  { %v4100_v39 = vmul.f32 %v4399_v38, %v4088_v37  ;;  %vm4106_vm4 = vweird.f32 %v4399_v38 }
0x102b   :  { %vm4107_vm6 = vmor %vm4105_vm5, %vm4106_vm4 }
0x102c   :  { %v4101_v41 = vmul.f32 %v4399_v38, %v4100_v39 }
0x102e   :  { %v4102_v53 = vmul.f32 0.5, %v4101_v41 }
0x1030   :  { %v4103_v42 = vsub.f32 1.5, %v4102_v53 }
0x1032   :  { %v4104_v43 = vmul.f32 %v4399_v38, %v4103_v42 }
0x1034   :  { %v4108_v8 = vsel %vm4107_vm6, %v4399_v38, %v4104_v43 }
0x1035   :  { %v4110_v48 = vmul.f32 %v4108_v8, %v5876_v40 }
0x1037   :  { %v4115_v50 = vmul.f32 %v4313_v54, %v4110_v48 }
0x1039   :  { %v4120_v51 = vadd.f32 %v4314_v27, %v4115_v50 }
0x103b   :  { %4160 = vmatmul.f32.gmra.mxu2 %v4120_v51 }
0x1098   :  { %v4158_v44 = vpop.f32.mrf.mxu2 }
0x1099   :  { %v4159_v56 = vadd.f32 %v4315_v20, %v4158_v44 }
0x109b   :  { %4164 = vst [vmem:[#allocation17] sm:$0xff] %v4159_v56 }
0x10be   :  { %v4161_v52 = vpop.f32.mrf.mxu2 }
0x10bf   :  { %v4162_v36 = vadd.f32 %v4315_v20, %v4161_v52 }
0x10c1   :  { %4165 = vst [vmem:[#allocation17 + $0x8] sm:$0xff] %v4162_v36 }
0x10c2   :  { %4178 = dma.vmem_to_hbm [thread:$0]  %s4171_s19, 256, %s4173_s2, [#allocation4], %s4663_s22, %s4663_s22, %s4664_s23  }
0x10c3   :  { %4653 = dma.done.wait [#allocation4], 256  }
0x10c4   :  { %4654 = vsyncadd [#allocation4], 4294967040 }
0x10c5   :  { %4183 = vsyncpa [#allocation3], 1 }
0x10c6   :  { %4184 = vsyncpa [#allocation6], 1 }
0x10c7   :  { %4185 = vsyncpa [#allocation9], 1 }
0x10c8   :  { %4186 = vsyncpa [#allocation12], 1 }
0x10c9   :  { %4187 = vsyncpa [#allocation15], 1 }
0x10ca   :  { %4188 = vsyncpa [#allocation4], 1 }

</bundles_post_ra>
